<compile_context>
chip_gen: v5e
topology: v5e:2x2
jax: 0.10.0
libtpu: 0.0.40
codegen_flags: <defaults>
</compile_context>

<pallas_src>
import math
import functools

import jax
import jax.numpy as jnp
from jax import lax
from jax.experimental import pallas as pl
from jax.experimental.pallas import tpu as pltpu

EPS = 1e-9            # RMSNorm eps from the reference module
NEG_BIG = -1e30       # stands in for -inf in the additive attention mask (f32 only!)


def _vmem_limit_bytes():
    """~80% of per-core VMEM (≈102 MiB on v5e/v6e, ≈51 MiB on v7x)."""
    try:
        cap = getattr(pltpu.get_tpu_info(), "vmem_capacity_bytes", None)
    except Exception:
        cap = None
    if not cap:
        return 48 * 1024 * 1024          # conservative fallback (fits all generations)
    return int(0.8 * cap)


VMEM_LIMIT = _vmem_limit_bytes()


def _cparams(*sem):
    return pltpu.CompilerParams(dimension_semantics=sem,
                                vmem_limit_bytes=VMEM_LIMIT)


def _resident_spec(shape, index_map):
    """BlockSpec for constant-index weight/bias/gain blocks: single-buffered
    (no point double-buffering a block whose index never changes)."""
    buffered = getattr(pl, "Buffered", None)
    if buffered is None:
        return pl.BlockSpec(shape, index_map)
    try:
        return pl.BlockSpec(shape, index_map, pipeline_mode=buffered(1))
    except Exception:
        return pl.BlockSpec(shape, index_map)


def _divisor_tile(total, preferred, quantum):
    """Largest multiple of `quantum` dividing `total` and <= preferred;
    falls back to `total` (full dim — always BlockSpec-legal)."""
    if total <= preferred:
        return total
    t = (preferred // quantum) * quantum
    while t >= quantum:
        if total % t == 0:
            return t
        t -= quantum
    return total


def _row_tile(m):
    """Prefer 512-wide row tiles (HBM-roofline sweet spot) but keep >=2 blocks
    on the parallel axis when possible (v7x megacore)."""
    pref = 512 if m >= 1024 else max(8, m // 2)
    return _divisor_tile(m, pref, 8)


def _rms_norm(x, g):
    # x: (M, D) f32, g: (1, D) f32
    ms = jnp.mean(x * x, axis=-1, keepdims=True)
    return x * lax.rsqrt(ms + EPS) * g


def _erf(x):
    # Abramowitz & Stegun 7.1.26, |err| < 1.5e-7: uses only exp/mul/add/div so it
    # always lowers in Mosaic; matches torch's exact-erf GELU to f32 noise.
    a1, a2, a3, a4, a5 = 0.254829592, -0.284496736, 1.421413741, -1.453152027, 1.061405429
    p = 0.3275911
    ax = jnp.abs(x)
    t = 1.0 / (1.0 + p * ax)
    poly = ((((a5 * t + a4) * t + a3) * t + a2) * t + a1) * t
    y = 1.0 - poly * jnp.exp(-ax * ax)
    return jnp.sign(x) * y


def _gelu_exact(x):
    # nn.GELU() default = exact (erf) GELU
    return 0.5 * x * (1.0 + _erf(x * (1.0 / math.sqrt(2.0))))


# ---------------------------------------------------------------------------
# Pallas kernels
# ---------------------------------------------------------------------------
def norm_matmul_bias_kernel(x_ref, g_ref, w_ref, b_ref, o_ref, xn_ref):
    """RMSNorm (hoisted, once per row tile) + one output-feature tile of x_n @ W + b.

    x: (tm, D) f32, g: (1, D) f32, w: (D, tn) bf16, b: (1, tn) f32 -> o: (tm, tn) bf16
    xn scratch: (tm, D) bf16, persistent across the inner (feature-tile) grid axis.
    """
    @pl.when(pl.program_id(1) == 0)
    def _():
        xn_ref[...] = _rms_norm(x_ref[...], g_ref[...]).astype(jnp.bfloat16)
    y = jnp.dot(xn_ref[...], w_ref[...], preferred_element_type=jnp.float32)
    o_ref[...] = (y + b_ref[...]).astype(o_ref.dtype)


def norm_matmul_kernel(x_ref, g_ref, w_ref, o_ref, xn_ref):
    """Final RMSNorm (hoisted) + one vocab tile of the LM head (no bias)."""
    @pl.when(pl.program_id(1) == 0)
    def _():
        xn_ref[...] = _rms_norm(x_ref[...], g_ref[...]).astype(jnp.bfloat16)
    o_ref[...] = jnp.dot(xn_ref[...], w_ref[...],
                         preferred_element_type=jnp.float32).astype(o_ref.dtype)


def flash_attn_kernel(q_ref, k_ref, v_ref, pad_ref, o_ref, m_ref, l_ref, acc_ref, *,
                      scale):
    """Flash attention for one (batch, head), one KV block per inner grid step.

    q: (1, S, hd) bf16 (resident), k/v: (1, Tk, hd) bf16, pad: (1, 1, Tk) f32
    o: (1, S, hd) bf16 written into the (B, S, D) activation at lane offset h*hd.
    Scratch: m/l (S, 1) f32, acc (S, hd) f32 — online softmax state.
    """
    kv = pl.program_id(2)
    S = q_ref.shape[1]
    Tk = k_ref.shape[1]

    @pl.when(kv == 0)
    def _():
        m_ref[...] = jnp.full_like(m_ref, -jnp.inf)
        l_ref[...] = jnp.zeros_like(l_ref)
        acc_ref[...] = jnp.zeros_like(acc_ref)

    q = q_ref[0] * scale                                    # scale folded into q (bf16)
    s = jnp.dot(q, k_ref[0].T, preferred_element_type=jnp.float32)   # (S, Tk) f32

    # additive mask in f32: causal (key index > query index) + key padding
    row = lax.broadcasted_iota(jnp.int32, (S, Tk), 0)
    col = Tk * kv + lax.broadcasted_iota(jnp.int32, (S, Tk), 1)
    s = s + jnp.where(col > row, NEG_BIG, 0.0) + pad_ref[0]

    m_prev = m_ref[...]
    m_new = jnp.maximum(m_prev, jnp.max(s, axis=-1, keepdims=True))
    alpha = jnp.exp(m_prev - m_new)
    p = jnp.exp(s - m_new)                                  # f32 EUP (safe on v5e too)
    l_ref[...] = alpha * l_ref[...] + jnp.sum(p, axis=-1, keepdims=True)
    acc_ref[...] = alpha * acc_ref[...] + jnp.dot(
        p.astype(jnp.bfloat16), v_ref[0], preferred_element_type=jnp.float32)
    m_ref[...] = m_new

    @pl.when(kv == pl.num_programs(2) - 1)
    def _():
        # normalization deferred to after the PV matmuls: scales (S, hd), not (S, S)
        o_ref[0] = (acc_ref[...] * pl.reciprocal(l_ref[...], approx=False)
                    ).astype(o_ref.dtype)


def post_attn_ffn_kernel(attn_ref, x_ref, wo_ref, bo_ref, g2_ref, w1_ref, w2_ref,
                         o_ref, xres_ref, xn_ref, yacc_ref):
    """out-proj + residual + RMSNorm2 (once per row tile) + FFN tiled over the 4D hidden.

    attn: (tm, D) bf16, x: (tm, D) f32, wo: (D, D) bf16, bo/g2: (1, D) f32,
    w1: (D, Th) bf16, w2: (Th, D) bf16 -> o: (tm, D) f32 (written at last hidden tile)
    """
    j = pl.program_id(1)

    @pl.when(j == 0)
    def _():
        a = jnp.dot(attn_ref[...], wo_ref[...],
                    preferred_element_type=jnp.float32) + bo_ref[...]
        xr = x_ref[...] + a                                   # residual 1
        xres_ref[...] = xr
        xn_ref[...] = _rms_norm(xr, g2_ref[...]).astype(jnp.bfloat16)
        yacc_ref[...] = jnp.zeros_like(yacc_ref)

    h1 = jnp.dot(xn_ref[...], w1_ref[...], preferred_element_type=jnp.float32)
    h1 = _gelu_exact(h1)                                      # nn.GELU() (exact erf)
    yacc_ref[...] += jnp.dot(h1.astype(jnp.bfloat16), w2_ref[...],
                             preferred_element_type=jnp.float32)

    @pl.when(j == pl.num_programs(1) - 1)
    def _():
        o_ref[...] = (yacc_ref[...] + xres_ref[...]).astype(o_ref.dtype)  # residual 2


# ---------------------------------------------------------------------------
# Wrappers
# ---------------------------------------------------------------------------
def norm_qkv(x2d, g1, wqkv_t, bqkv):
    M, D = x2d.shape
    N3 = wqkv_t.shape[1]
    tm = _row_tile(M)
    tn = _divisor_tile(N3, 512, 128)
    return pl.pallas_call(
        norm_matmul_bias_kernel,
        out_shape=jax.ShapeDtypeStruct((M, N3), jnp.bfloat16),
        grid=(M // tm, N3 // tn),
        in_specs=[
            pl.BlockSpec((tm, D), lambda i, j: (i, 0)),
            _resident_spec((1, D), lambda i, j: (0, 0)),      # g1
            pl.BlockSpec((D, tn), lambda i, j: (0, j)),       # wqkv tile (N-tiled)
            pl.BlockSpec((1, tn), lambda i, j: (0, j)),       # bqkv tile
        ],
        out_specs=pl.BlockSpec((tm, tn), lambda i, j: (i, j)),
        scratch_shapes=[pltpu.VMEM((tm, D), jnp.bfloat16)],
        compiler_params=_cparams("parallel", "arbitrary"),
    )(x2d, g1, wqkv_t, bqkv)


def flash_attention(qkv3, pad_add, n_heads, head_dim, scale, kv_block=512):
    """qkv3: (B, S, 3D) bf16 with columns [q heads | k heads | v heads]."""
    B, S, D3 = qkv3.shape
    D = D3 // 3
    H, hd = n_heads, head_dim
    Tk = _divisor_tile(S, kv_block, 128)
    kernel = functools.partial(flash_attn_kernel, scale=scale)
    return pl.pallas_call(
        kernel,
        out_shape=jax.ShapeDtypeStruct((B, S, D), jnp.bfloat16),
        grid=(B, H, S // Tk),
        in_specs=[
            pl.BlockSpec((1, S, hd), lambda b, h, kv: (b, 0, h)),           # q (resident)
            pl.BlockSpec((1, Tk, hd), lambda b, h, kv: (b, kv, H + h)),     # k block
            pl.BlockSpec((1, Tk, hd), lambda b, h, kv: (b, kv, 2 * H + h)), # v block
            pl.BlockSpec((1, 1, Tk), lambda b, h, kv: (b, 0, kv)),          # key-pad mask
        ],
        out_specs=pl.BlockSpec((1, S, hd), lambda b, h, kv: (b, 0, h)),
        scratch_shapes=[
            pltpu.VMEM((S, 1), jnp.float32),     # running max
            pltpu.VMEM((S, 1), jnp.float32),     # running denom
            pltpu.VMEM((S, hd), jnp.float32),    # output accumulator
        ],
        compiler_params=_cparams("parallel", "parallel", "arbitrary"),
    )(qkv3, qkv3, qkv3, pad_add)


def post_attn_ffn(attn2d, x2d, p):
    M, D = x2d.shape
    D4 = p["w1_t"].shape[1]
    tm = _row_tile(M)
    th = _divisor_tile(D4, 512, 128)
    return pl.pallas_call(
        post_attn_ffn_kernel,
        out_shape=jax.ShapeDtypeStruct((M, D), jnp.float32),
        grid=(M // tm, D4 // th),
        in_specs=[
            pl.BlockSpec((tm, D), lambda i, j: (i, 0)),       # attention output (bf16)
            pl.BlockSpec((tm, D), lambda i, j: (i, 0)),       # residual stream (f32)
            _resident_spec((D, D), lambda i, j: (0, 0)),      # wo_t
            _resident_spec((1, D), lambda i, j: (0, 0)),      # bo
            _resident_spec((1, D), lambda i, j: (0, 0)),      # g2
            pl.BlockSpec((D, th), lambda i, j: (0, j)),       # w1 tile (hidden N)
            pl.BlockSpec((th, D), lambda i, j: (j, 0)),       # w2 tile (hidden K)
        ],
        out_specs=pl.BlockSpec((tm, D), lambda i, j: (i, 0)),
        scratch_shapes=[
            pltpu.VMEM((tm, D), jnp.float32),    # x + out-proj (residual)
            pltpu.VMEM((tm, D), jnp.bfloat16),   # rmsnorm2(x), reused for all tiles
            pltpu.VMEM((tm, D), jnp.float32),    # FFN output accumulator
        ],
        compiler_params=_cparams("parallel", "arbitrary"),
    )(attn2d, x2d, p["wo_t"], p["bo"], p["g2"], p["w1_t"], p["w2_t"])


def lm_head(x2d, g, wh_t, tv_pref=512):
    """Final RMSNorm + LM head; output (B*S, V) f32 with lane-dense vocab stores."""
    M, D = x2d.shape
    V = wh_t.shape[1]
    tm = _row_tile(M)
    tv = _divisor_tile(V, tv_pref, 128)
    return pl.pallas_call(
        norm_matmul_kernel,
        out_shape=jax.ShapeDtypeStruct((M, V), jnp.float32),
        grid=(M // tm, V // tv),
        in_specs=[
            pl.BlockSpec((tm, D), lambda i, j: (i, 0)),
            _resident_spec((1, D), lambda i, j: (0, 0)),      # final gain
            pl.BlockSpec((D, tv), lambda i, j: (0, j)),       # vocab tile of head weight
        ],
        out_specs=pl.BlockSpec((tm, tv), lambda i, j: (i, j)),
        scratch_shapes=[pltpu.VMEM((tm, D), jnp.bfloat16)],
        compiler_params=_cparams("parallel", "arbitrary"),
    )(x2d, g, wh_t)


# ---------------------------------------------------------------------------
# Model glue (plain JAX)
# ---------------------------------------------------------------------------
def positional_encoding(seq_len, d_model):
    position = jnp.arange(seq_len, dtype=jnp.float32)[:, None]
    div_term = jnp.exp(jnp.arange(0, d_model, 2, dtype=jnp.float32)
                       * (-math.log(10000.0) / d_model))
    pe = jnp.zeros((seq_len, d_model), dtype=jnp.float32)
    pe = pe.at[:, 0::2].set(jnp.sin(position * div_term))
    pe = pe.at[:, 1::2].set(jnp.cos(position * div_term))
    return pe                                              # (S, D)


def init_params(key, n_layers, D, V):
    layers = []
    s = 0.02
    for _ in range(n_layers):
        keys = jax.random.split(key, 5)
        key = keys[0]
        layers.append(dict(
            g1=jnp.ones((1, D), jnp.float32),
            g2=jnp.ones((1, D), jnp.float32),
            # column layout of wqkv_t = in_proj_weight.T: [q heads | k heads | v heads]
            wqkv_t=(s * jax.random.normal(keys[1], (D, 3 * D))).astype(jnp.bfloat16),
            bqkv=jnp.zeros((1, 3 * D), jnp.float32),
            wo_t=(s * jax.random.normal(keys[2], (D, D))).astype(jnp.bfloat16),
            bo=jnp.zeros((1, D), jnp.float32),
            w1_t=(s * jax.random.normal(keys[3], (D, 4 * D))).astype(jnp.bfloat16),
            w2_t=(s * jax.random.normal(keys[4], (4 * D, D))).astype(jnp.bfloat16),
        ))
    k_emb, k_head = jax.random.split(key)
    emb = jax.random.normal(k_emb, (V, D), jnp.float32)
    emb = emb.at[0].set(0.0)                               # padding_idx = 0
    head_w_t = (s * jax.random.normal(k_head, (D, V))).astype(jnp.bfloat16)  # (D, V)
    g_final = jnp.ones((1, D), jnp.float32)
    return layers, emb, head_w_t, g_final


def debugnet_forward(src, pad_mask, layers, emb, head_w_t, g_final, n_heads,
                     *, kv_block=512, head_tile=512):
    B, S = src.shape
    D = emb.shape[1]
    H = n_heads
    hd = D // H
    assert H * hd == D
    assert hd % 128 == 0, "attention BlockSpecs slice heads along the lane dim"
    scale = 1.0 / math.sqrt(hd)

    # embedding lookup (glue) + positional encoding; residual stream kept f32
    x = jnp.take(emb, src, axis=0) + positional_encoding(S, D)[None, :, :]
    x2d = x.reshape(B * S, D).astype(jnp.float32)

    # only the (B, 1, S) additive key-padding vector goes to the kernels (f32)
    pad_add = jnp.where(pad_mask, NEG_BIG, 0.0).astype(jnp.float32).reshape(B, 1, S)

    for p in layers:
        qkv = norm_qkv(x2d, p["g1"], p["wqkv_t"], p["bqkv"])          # (B*S, 3D) bf16
        attn = flash_attention(qkv.reshape(B, S, 3 * D), pad_add, H, hd, scale,
                               kv_block=kv_block)                     # (B, S, D) bf16
        x2d = post_attn_ffn(attn.reshape(B * S, D), x2d, p)           # (B*S, D) f32

    logits = lm_head(x2d, g_final, head_w_t, tv_pref=head_tile)       # (B*S, V) f32
    V = head_w_t.shape[1]
    # final (B,S,V) -> (B,V,S) permute left to XLA so kernel stores stay lane-dense in V
    return jnp.transpose(logits.reshape(B, S, V), (0, 2, 1))


if __name__ == "__main__":
    # small demo config: hd = D // H = 128 (lane-aligned heads), S multiple of 128
    B, S, D, H, L, V = 2, 256, 256, 2, 2, 512
    key = jax.random.PRNGKey(0)
    k_src, k_params = jax.random.split(key)

    src = jax.random.randint(k_src, (B, S), 1, V, dtype=jnp.int32)
    src = src.at[1, -32:].set(0)                           # pad tokens (id 0) at end of seq 1
    pad_mask = src == 0                                    # (B, S) True where padded

    layers, emb, head_w_t, g_final = init_params(k_params, L, D, V)

    out = debugnet_forward(src, pad_mask, layers, emb, head_w_t, g_final, H,
                           kv_block=128,                   # 2 KV blocks -> exercises flash loop
                           head_tile=256)                  # 2 vocab tiles -> exercises hoisted norm
    out = jax.block_until_ready(out)
    assert out.shape == (B, V, S), out.shape
    assert bool(jnp.all(jnp.isfinite(out)))
    print("KERNEL_OK")
</pallas_src>

<mosaic_0001>
module attributes {stable_mosaic.version = 11 : i64} {
  func.func @norm_matmul_bias_kernel(%arg0: i32, %arg1: i32, %arg2: memref<256x256xf32, #tpu.memory_space<vmem>>, %arg3: memref<1x256xf32, #tpu.memory_space<vmem>>, %arg4: memref<256x384xbf16, #tpu.memory_space<vmem>>, %arg5: memref<1x384xf32, #tpu.memory_space<vmem>>, %arg6: memref<256x384xbf16, #tpu.memory_space<vmem>>, %arg7: memref<256x256xbf16, #tpu.memory_space<vmem>>) attributes {dimension_semantics = [#tpu.dimension_semantics<parallel>, #tpu.dimension_semantics<arbitrary>], iteration_bounds = array<i64: 2, 2>, scalar_prefetch = 0 : i64, scratch_operands = 1 : i64, tpu.core_type = #tpu.core_type<tc>, window_params = [{transform_indices = @transform_0, window_bounds = array<i64: 256, 256>}, {pipeline_mode = #tpu.pipeline_mode<synchronous>, transform_indices = @transform_1, window_bounds = array<i64: 1, 256>}, {transform_indices = @transform_2, window_bounds = array<i64: 256, 384>}, {transform_indices = @transform_3, window_bounds = array<i64: 1, 384>}, {transform_indices = @transform_4, window_bounds = array<i64: 256, 384>}]} {
    %c0_i32 = arith.constant 0 : i32
    %0 = arith.cmpi eq, %arg1, %c0_i32 : i32
    %1 = arith.extui %0 : i1 to i32
    %c0_i32_0 = arith.constant 0 : i32
    %2 = arith.cmpi ne, %1, %c0_i32_0 : i32
    scf.if %2 {
      %c0_8 = arith.constant 0 : index
      %c0_9 = arith.constant 0 : index
      %11 = vector.load %arg2[%c0_8, %c0_9] : memref<256x256xf32, #tpu.memory_space<vmem>>, vector<256x256xf32>
      %c0_10 = arith.constant 0 : index
      %c0_11 = arith.constant 0 : index
      %12 = vector.load %arg3[%c0_10, %c0_11] : memref<1x256xf32, #tpu.memory_space<vmem>>, vector<1x256xf32>
      %13 = arith.mulf %11, %11 : vector<256x256xf32>
      %cst_12 = arith.constant dense<0.000000e+00> : vector<256xf32>
      %14 = vector.multi_reduction <add>, %13, %cst_12 [1] : vector<256x256xf32> to vector<256xf32>
      %15 = vector.shape_cast %14 : vector<256xf32> to vector<256x1xf32>
      %cst_13 = arith.constant 2.560000e+02 : f32
      %16 = vector.broadcast %cst_13 : f32 to vector<256x1xf32>
      %17 = arith.divf %15, %16 : vector<256x1xf32>
      %cst_14 = arith.constant 9.99999971E-10 : f32
      %18 = vector.broadcast %cst_14 : f32 to vector<256x1xf32>
      %19 = arith.addf %17, %18 : vector<256x1xf32>
      %20 = math.rsqrt %19 : vector<256x1xf32>
      %21 = vector.broadcast %20 : vector<256x1xf32> to vector<256x256xf32>
      %22 = arith.mulf %11, %21 : vector<256x256xf32>
      %23 = vector.broadcast %12 : vector<1x256xf32> to vector<256x256xf32>
      %24 = arith.mulf %22, %23 : vector<256x256xf32>
      %25 = arith.truncf %24 : vector<256x256xf32> to vector<256x256xbf16>
      %c0_15 = arith.constant 0 : index
      %c0_16 = arith.constant 0 : index
      %26 = vector.load %arg7[%c0_15, %c0_16] : memref<256x256xbf16, #tpu.memory_space<vmem>>, vector<256x256xbf16>
      tpu.vector_store %arg7[%c0_15, %c0_16], %25 {strides = array<i32>} : memref<256x256xbf16, #tpu.memory_space<vmem>>, vector<256x256xbf16>,
    } else {
    }
    %c0 = arith.constant 0 : index
    %c0_1 = arith.constant 0 : index
    %3 = vector.load %arg7[%c0, %c0_1] : memref<256x256xbf16, #tpu.memory_space<vmem>>, vector<256x256xbf16>
    %c0_2 = arith.constant 0 : index
    %c0_3 = arith.constant 0 : index
    %4 = vector.load %arg4[%c0_2, %c0_3] : memref<256x384xbf16, #tpu.memory_space<vmem>>, vector<256x384xbf16>
    %cst = arith.constant dense<0.000000e+00> : vector<256x384xf32>
    %5 = tpu.matmul %3, %4, %cst {dimension_numbers = #tpu.dot_dimension_numbers<[1], [0], [0], [1], [0, 0, 1, 1], [], []>} : vector<256x256xbf16>, vector<256x384xbf16>, vector<256x384xf32> -> vector<256x384xf32>
    %c0_4 = arith.constant 0 : index
    %c0_5 = arith.constant 0 : index
    %6 = vector.load %arg5[%c0_4, %c0_5] : memref<1x384xf32, #tpu.memory_space<vmem>>, vector<1x384xf32>
    %7 = vector.broadcast %6 : vector<1x384xf32> to vector<256x384xf32>
    %8 = arith.addf %5, %7 : vector<256x384xf32>
    %9 = arith.truncf %8 : vector<256x384xf32> to vector<256x384xbf16>
    %c0_6 = arith.constant 0 : index
    %c0_7 = arith.constant 0 : index
    %10 = vector.load %arg6[%c0_6, %c0_7] : memref<256x384xbf16, #tpu.memory_space<vmem>>, vector<256x384xbf16>
    tpu.vector_store %arg6[%c0_6, %c0_7], %9 {strides = array<i32>} : memref<256x384xbf16, #tpu.memory_space<vmem>>, vector<256x384xbf16>,
    return
  }
  func.func @transform_0(%arg0: i32, %arg1: i32) -> (i32, i32) {
    %c0_i32 = arith.constant 0 : i32
    %c0_i32_0 = arith.constant 0 : i32
    return %arg0, %c0_i32 : i32, i32
  }
  func.func @transform_1(%arg0: i32, %arg1: i32) -> (i32, i32) {
    %c0_i32 = arith.constant 0 : i32
    %c0_i32_0 = arith.constant 0 : i32
    %c0_i32_1 = arith.constant 0 : i32
    return %c0_i32, %c0_i32_0 : i32, i32
  }
  func.func @transform_2(%arg0: i32, %arg1: i32) -> (i32, i32) {
    %c0_i32 = arith.constant 0 : i32
    %c0_i32_0 = arith.constant 0 : i32
    return %c0_i32, %arg1 : i32, i32
  }
  func.func @transform_3(%arg0: i32, %arg1: i32) -> (i32, i32) {
    %c0_i32 = arith.constant 0 : i32
    %c0_i32_0 = arith.constant 0 : i32
    return %c0_i32, %arg1 : i32, i32
  }
  func.func @transform_4(%arg0: i32, %arg1: i32) -> (i32, i32) {
    %c0_i32 = arith.constant 0 : i32
    return %arg0, %arg1 : i32, i32
  }
}

</mosaic_0001>

<bundles_post_ra>
// kernel: tpu_custom_call.1
= control target key start
LH: loop header
LB: loop body
LE: loop exit
PB: predicated region body
PF: predicated region fallthrough
CT: control target
= control target key end

     0   :  { %s5059_s0 = inlined_call_operand.hbm [shape: f32[512,256], index: 0, kind: input, shape index: {}]   ;;  %s5060_s1 = inlined_call_operand.hbm [shape: f32[1,256], index: 1, kind: input, shape index: {}]   ;;  %s5061_s2 = inlined_call_operand.hbm [shape: bf16[256,768], index: 2, kind: input, shape index: {}]   ;;  %s5062_s3 = inlined_call_operand.hbm [shape: f32[1,768], index: 3, kind: input, shape index: {}]   ;;  %s5063_s4 = inlined_call_operand.hbm [shape: bf16[512,768], index: 4, kind: output, shape index: {}]  }
   0x1   :  { %5071 = sst [smem:[#allocation25_spill]] %s5059_s0 }
   0x2   :  { %5072 = sst [smem:[#allocation26_spill]] %s5060_s1 }
   0x3   :  { %5073 = sst [smem:[#allocation27_spill]] %s5061_s2 }
   0x4   :  { %5074 = sst [smem:[#allocation28_spill]] %s5062_s3 }
   0x5   :  { %5075 = sst [smem:[#allocation29_spill]] %s5063_s4 }
   0x6   :  { %9 = vsyncpa [#allocation4], 0 }
   0x7   :  { %11 = vsyncpa [#allocation4 + $0x1], 0 }
   0x8   :  { %12 = vsyncpa [#allocation7], 0 }
   0x9   :  { %13 = vsyncpa [#allocation5], 0 }
   0xa   :  { %15 = vsyncpa [#allocation5 + $0x1], 0  ;;  %s3490_s15 = smov 0   ;;  %s3492_s16 = smov 0  }
   0xb   :  { %s3494_s17 = smov 0   ;;  %s3496_s18 = smov 0  }
   0xc   :  { %s3498_s19 = smov 0   ;;  %s3500_s20 = smov 0  }
   0xd   :  { %s3502_s21 = smov 0   ;;  %s3504_s22 = smov 0  }
   0xe   :  { %s3506_s23 = smov 0   ;;  %s3508_s24 = smov 0  }
   0xf   :  { %s3510_s25 = smov 0   ;;  %s3512_s26 = smov 0  }
  0x10   :  { %s3514_s27 = smov 0   ;;  %s3516_s28 = smov 0  }
  0x11 LB: > { %5076 = sst [smem:[#allocation15_spill]] %s3437_s24  ;;  %s30_s29 = sadd.s32 1, %s3445_s26  ;;  %s3453_s28 = sphi %s3516_s28, %s21_s28   ;;  %s3449_s27 = sphi %s3514_s27, %s5111_s27   ;;  %s3445_s26 = sphi %s3512_s26, %s5110_s26   ;;  %s3441_s25 = sphi %s3510_s25, %s5109_s25   ;;  %s3437_s24 = sphi %s3508_s24, %s5108_s24   ;;  %s3433_s23 = sphi %s3506_s23, %s5120_s23   ;;  %s3429_s22 = sphi %s3504_s22, %s5119_s22   ;;  %s3425_s21 = sphi %s3502_s21, %s5118_s21   ;;  %s3421_s20 = sphi %s3500_s20, %s5117_s20   ;;  %s3417_s19 = sphi %s3498_s19, %s5116_s19   ;;  %s3413_s18 = sphi %s3496_s18, %s5115_s18   ;;  %s3409_s17 = sphi %s3494_s17, %s5114_s17   ;;  %s3405_s16 = sphi %s3492_s16, %s5113_s16   ;;  %s3401_s15 = sphi %s3490_s15, %s5112_s15  }
  0x12   : > { %5077 = sst [smem:[#allocation16_spill]] %s3441_s25  ;;  %s33_s30 = sadd.s32 1, %s3449_s27 }
  0x13   : > { %5078 = sst [smem:[#allocation17_spill]] %s3445_s26  ;;  %p31_p0 = scmp.ge.s32.totalorder %s30_s29, 2 }
  0x14   : > { %5079 = sst [smem:[#allocation18_spill]] %s3449_s27  ;;  %s40_s5 = sadd.s32 1, %s3433_s23 }
  0x15   : > { %p47_p1 = scmp.ne.s32.totalorder %s3433_s23, %s3429_s22  ;;  %p48_p2 = scmp.eq.s32.totalorder %s3453_s28, 0 }
  0x16   : > { %s5122_s29 = smov (%p31_p0, %s30_s29), 0  ;;  %s5124_s30 = smov (!%p31_p0, %s33_s30), %s3449_s27 }
  0x17   : > { %5080 = sst [smem:[#allocation19_spill]] %s5122_s29  ;;  %p3569_p3 = por %p48_p2, %p47_p1 }
  0x18   : > { %s84_s7 = ssub.s32 %s3445_s26, %s5122_s29  ;;  %p35_p4 = scmp.ge.s32.totalorder %s5124_s30, 2 }
  0x19   : > { %p85_p5 = scmp.eq.s32.totalorder %s84_s7, 0  ;;  %s87_s8 = sadd.s32 1, %s3421_s20 }
  0x1a   : > { %p94_p6 = scmp.ne.s32.totalorder %s3421_s20, %s3417_s19  ;;  %s5126_s30 = smov (%p35_p4, %s5124_s30), 0 }
  0x1b   : > { %5082 = sst [smem:[#allocation20_spill]] %s5126_s30  ;;  %s37_s10 = ssub.s32 %s3449_s27, %s5126_s30 }
  0x1c   : > { %s3581_s9 = scalar_select %p85_p5, %s3421_s20, %s87_s8  }
  0x1d   : > { %p3585_p7 = por %p94_p6, %p48_p2  ;;  %p38_p8 = scmp.eq.s32.totalorder %s37_s10, 0 }
  0x1e   : > { %5083 = sst [smem:[#allocation21_spill]] %s3581_s9  ;;  %s138_s12 = sor.u32 %s84_s7, %s37_s10 }
  0x1f   : > { %p3589_p9 = scmp.eq.s32.totalorder %s138_s12, 0  ;;  %p2958_p10 = scmp.lt.s32.totalorder %s3453_s28, 4 }
  0x20   : > { %s3594_s14 = scalar_select %p38_p8, %s3433_s23, %s40_s5  }
  0x21   : > { %s190_s29 = sand.u32 1, %s3453_s28   ;;  %s192_s8 = sand.u32 1, %s3433_s23  }
  0x22   : > { %5086 = sst [smem:[#allocation22_spill]] %s3594_s14  ;;  %s2488_s30 = sshll.u32 %s192_s8, 9 }
  0x23   : > { %s2823_s9 = sshll.u32 %s3449_s27, 9  ;;  %s5087_s0 = sld [smem:[#allocation25_spill]] }
  0x24   : > { %s194_s7 = scalar_lea.vmem [#allocation3], %s2488_s30  ;;  %p2944_p11 = pnand %p2958_p10, %p3569_p3 }
  0x25   : > { %s203_s10 = sshll.u32 %s194_s7, 4  ;;  %p3607_p12 = pnand %p2958_p10, %p3585_p7  ;;  %s204_s10 = int_to_ptr.vmem [resolvable:$true] %s203_s10 }
  0x26   : > { %s215_s12 = sand.u32 1, %s3421_s20   ;;  %s3612_s8 = scalar_lea.sflag [#allocation4], %s190_s29 }
  0x27   : > { %s3455_s4 = smov 256   ;;  %s2921_s25 = smul.u32 384, %s215_s12 }
  0x28   : > { %s2824_s30 = smul.u32 12, %s3445_s26  ;;  %s5089_s2 = sld [smem:[#allocation27_spill]] }
  0x29   : > { %s200_s24 = scalar_lea.hbm %s5087_s0, %s2823_s9  ;;  %s217_s11 = scalar_lea.vmem [#allocation8], %s2921_s25 }
  0x2a   : > { %s201_s3 = sshll.u32 %s200_s24, 4  ;;  %s3456_s24 = smov 16   ;;  %s202_s3 = int_to_ptr.hbm [resolvable:$true] %s201_s3 }
  0x2b   : > { %2946 = dma.hbm_to_vmem [thread:$0]  (!%p2944_p11), %s202_s3, 8192, %s204_s10, %s3612_s8, %s3455_s4, %s3455_s4, %s3456_s24  }
  0x2c   : > { %s225_s7 = sshll.u32 %s217_s11, 4  ;;  %s3457_s3 = smov 384   ;;  %s226_s7 = int_to_ptr.vmem [resolvable:$true] %s225_s7 }
  0x2d   : > { %s3458_s10 = smov 192   ;;  %s3459_s4 = smov 12  }
  0x2e   : > { %s222_s29 = scalar_lea.hbm %s5089_s2, %s2824_s30  ;;  %s3625_s24 = sadd.s32 4294967295, %s3453_s28  }
  0x2f   : > { %s223_s0 = sshll.u32 %s222_s29, 4  ;;  %s2484_s25 = sadd.s32 4294967294, %s3453_s28   ;;  %s224_s0 = int_to_ptr.hbm [resolvable:$true] %s223_s0 }
  0x30   : > { %2949 = dma.hbm_to_vmem [thread:$0]  (!%p3607_p12), %s224_s0, 6144, %s226_s7, %s3612_s8, %s3457_s3, %s3458_s10, %s3459_s4  }
  0x31   : > { %p53_p13 = scmp.ne.s32.totalorder %s3429_s22, %s3425_s21  ;;  %p54_p0 = scmp.eq.s32.totalorder %s3625_s24, 0 }
  0x32   : > { %p100_p1 = scmp.ne.s32.totalorder %s3417_s19, %s3413_s18  ;;  %s141_s30 = sadd.s32 1, %s3409_s17 }
  0x33   : > { %p3636_p2 = por %p54_p0, %p53_p13  ;;  %p151_p3 = scmp.ne.s32.totalorder %s3409_s17, %s3405_s16 }
  0x34   : > { %p3644_p4 = por %p100_p1, %p54_p0  ;;  %p152_p5 = scmp.eq.s32.totalorder %s3625_s24, 3 }
  0x35   : > { %s3652_s9 = scalar_select %p3589_p9, %s3409_s17, %s141_s30  }
  0x36   : > { %p3654_p6 = por %p152_p5, %p151_p3  ;;  %p157_p7 = scmp.ne.s32.totalorder %s3405_s16, %s3401_s15 }
  0x37   : > { %p158_p8 = scmp.eq.s32.totalorder %s2484_s25, 3  ;;  %p2485_p10 = scmp.ge.s32.totalorder %s3453_s28, 1 }
  0x38   : > { %p165_p11 = scmp.lt.s32.totalorder %s3453_s28, 5  ;;  %s5094_s1 = sld [smem:[#allocation26_spill]] }
  0x39   : > { %p3662_p13 = por %p158_p8, %p157_p7  ;;  %s2922_s3 = smul.u32 3, %s215_s12 }
  0x3a   : > { %p3669_p1 = pnand %p2485_p10, %p165_p11  ;;  %s3460_s10 = smov [#allocation6]  }
  0x3b   : > { %s179_s4 = sshll.u32 %s3460_s10, 4  ;;  %s240_s25 = smul.u32 3, %s3445_s26  ;;  %s180_s4 = int_to_ptr.vmem [resolvable:$true] %s179_s4 }
  0x3c   : > { %p2939_p9 = pneg %p3669_p1  ;;  %s239_s30 = scalar_lea.vmem [#allocation9], %s2922_s3 }
  0x3d   : > { %s247_s29 = sshll.u32 %s239_s30, 4  ;;  %s5096_s2 = sld [smem:[#allocation28_spill]]  ;;  %s248_s29 = int_to_ptr.vmem [resolvable:$true] %s247_s29 }
  0x3e   : > { %s177_s13 = sshll.u32 %s5094_s1, 4  ;;  %p2940_p3 = pnand %p2939_p9, %p54_p0  ;;  %s178_s13 = int_to_ptr.hbm [resolvable:$true] %s177_s13 }
  0x3f   : > { %s258_s12 = sand.u32 (!%p3669_p1), 1, %s3625_s24   ;;  %s260_s10 = sand.u32 (!%p3669_p1), 1, %s3429_s22  }
  0x40   : > { %2942 = dma.hbm_to_vmem [thread:$0]  (!%p2940_p3), %s178_s13, 32, %s180_s4, [#allocation7]  }
  0x41   : > { %256 = sbr.rel (%p3669_p1) target bundleno = 913 (0x391), region = 36  ;;  %s2494_s3 = sshll.u32 (!%p3669_p1), %s260_s10, 9 }
  0x42   : > { %s259_s30 = scalar_lea.sflag (!%p3669_p1), [#allocation4], %s258_s12  ;;  %s3690_s26 = scalar_lea.vmem (!%p3669_p1), [#allocation3], %s2494_s3 }
  0x43   : > { %s243_s27 = scalar_lea.hbm %s5096_s2, %s240_s25 }
  0x44   : > { %s245_s14 = sshll.u32 %s243_s27, 4  ;;  %s246_s14 = int_to_ptr.hbm [resolvable:$true] %s245_s14 }
  0x45   : > { %2952 = dma.hbm_to_vmem [thread:$0]  (!%p3607_p12), %s246_s14, 48, %s248_s29, %s3612_s8  }
  0x46   : > { %3384 = dma.done.wait (%p3636_p2), %s259_s30, 8192  }
  0x47   : > { %3386 = vsyncadd (%p3636_p2), %s259_s30, 4294959104 }
  0x48   : > { %3388 = dma.done.wait (%p54_p0), [#allocation7], 32  }
  0x49   : > { %3390 = vsyncadd (%p54_p0), [#allocation7], 4294967264  ;;  %s275_s1 = sand.u32 1, %s3417_s19  }
  0x4a   : > { %s2923_s2 = smul.u32 384, %s275_s1 }
  0x4c   : > { %s3701_s27 = scalar_lea.vmem [#allocation8], %s2923_s2 }
  0x4d   : > { %3392 = dma.done.wait (%p3644_p4), %s259_s30, 6192  }
  0x4e   : > { %3394 = vsyncadd (%p3644_p4), %s259_s30, 4294961104  ;;  %s3707_s14 = smul.u32 3, %s275_s1  ;;  %s320_s5 = sand.u32 1, %s3405_s16  }
  0x4f   : > { %s2925_s8 = smul.u32 384, %s320_s5  ;;  %s5097_s13 = sld [smem:[#allocation15_spill]] }
  0x50   : > { %s287_s24 = scalar_lea.vmem [#allocation9], %s3707_s14 }
  0x51   : > { %s3713_s6 = scalar_lea.vmem [#allocation10], %s2925_s8 }
  0x55   : > { %p2496_p12 = scmp.ne.s32.totalorder %s5097_s13, 0 }
  0x57   : > { %331 = sbr.rel (%p2496_p12) target bundleno = 359 (0x167), region = 56 }
  0x5c   : > { %v3717_v0 = vld [vmem:[%s3690_s26 + $0x40] sm:$0xff]  ;;  %v3720_v1 = vld [vmem:[%s3690_s26 + $0x48] sm:$0xff]  ;;  %v3747_v12 = vld [vmem:[%s3690_s26 + $0x50] sm:$0xff] }
  0x5d   : > { %v3723_v2 = vld [vmem:[%s3690_s26 + $0x20] sm:$0xff]  ;;  %v405_v3 = vmul.f32 %v3717_v0, %v3717_v0  ;;  %v406_v4 = vmul.f32 %v3720_v1, %v3720_v1  ;;  %v3730_v5 = vld [vmem:[%s3690_s26 + $0x28] sm:$0xff]  ;;  %v3750_v13 = vld [vmem:[%s3690_s26 + $0x58] sm:$0xff]  ;;  %v407_v21 = vmul.f32 %v3747_v12, %v3747_v12 }
  0x5e   : > { %v401_v6 = vmul.f32 %v3723_v2, %v3723_v2  ;;  %v3735_v7 = vld [vmem:[%s3690_s26] sm:$0xff]  ;;  %v3738_v8 = vld [vmem:[%s3690_s26 + $0x8] sm:$0xff]  ;;  %v402_v9 = vmul.f32 %v3730_v5, %v3730_v5  ;;  %v3753_v14 = vld [vmem:[%s3690_s26 + $0x30] sm:$0xff]  ;;  %v408_v22 = vmul.f32 %v3750_v13, %v3750_v13 }
  0x5f   : > { %v397_v10 = vmul.f32 %v3735_v7, %v3735_v7  ;;  %v398_v11 = vmul.f32 %v3738_v8, %v3738_v8  ;;  %v473_v15 = vadd.f32 %v406_v4, %v405_v3  ;;  %v3756_v16 = vld [vmem:[%s3690_s26 + $0x38] sm:$0xff]  ;;  %v3759_v17 = vld [vmem:[%s3690_s26 + $0x10] sm:$0xff]  ;;  %v403_v23 = vmul.f32 %v3753_v14, %v3753_v14  ;;  %v3777_v30 = vld [vmem:[%s3690_s26 + $0x80] sm:$0xff] }
  0x60   : > { %v3762_v18 = vld [vmem:[%s3690_s26 + $0x18] sm:$0xff]  ;;  %v467_v19 = vadd.f32 %v402_v9, %v401_v6  ;;  %v404_v24 = vmul.f32 %v3756_v16, %v3756_v16  ;;  %v399_v25 = vmul.f32 %v3759_v17, %v3759_v17  ;;  %v476_v27 = vadd.f32 %v408_v22, %v407_v21  ;;  %v3780_v31 = vld [vmem:[%s3690_s26 + $0x88] sm:$0xff]  ;;  %v3783_v32 = vld [vmem:[%s3690_s26 + $0x70] sm:$0xff] }
  0x61   : > { %v461_v20 = vadd.f32 %v398_v11, %v397_v10  ;;  %474 = vadd.xlane.f32.xlu2 %v473_v15  ;;  %v400_v26 = vmul.f32 %v3762_v18, %v3762_v18  ;;  %v3786_v33 = vld [vmem:[%s3690_s26 + $0x78] sm:$0xff]  ;;  %v3789_v34 = vld [vmem:[%s3690_s26 + $0x60] sm:$0xff]  ;;  %v3792_v35 = vld [vmem:[%s3690_s26 + $0x68] sm:$0xff]  ;;  %v413_v36 = vmul.f32 %v3777_v30, %v3777_v30  ;;  %v414_v37 = vmul.f32 %v3780_v31, %v3780_v31 }
  0x62   : > { %468 = vadd.xlane.f32.xlu1 %v467_v19  ;;  %v470_v28 = vadd.f32 %v404_v24, %v403_v23  ;;  %v411_v38 = vmul.f32 %v3783_v32, %v3783_v32  ;;  %v412_v39 = vmul.f32 %v3786_v33, %v3786_v33  ;;  %v409_v40 = vmul.f32 %v3789_v34, %v3789_v34  ;;  %v3807_v45 = vld [vmem:[%s3690_s26 + $0xb0] sm:$0xff]  ;;  %v3810_v46 = vld [vmem:[%s3690_s26 + $0xb8] sm:$0xff]  ;;  %v3813_v47 = vld [vmem:[%s3690_s26 + $0xa0] sm:$0xff] }
  0x63   : > { %462 = vadd.xlane.f32.xlu0 %v461_v20  ;;  %v464_v29 = vadd.f32 %v400_v26, %v399_v25  ;;  %v410_v41 = vmul.f32 %v3792_v35, %v3792_v35  ;;  %v485_v42 = vadd.f32 %v414_v37, %v413_v36  ;;  %v3816_v48 = vld [vmem:[%s3690_s26 + $0xa8] sm:$0xff]  ;;  %v3819_v49 = vld [vmem:[%s3690_s26 + $0x90] sm:$0xff]  ;;  %v3822_v50 = vld [vmem:[%s3690_s26 + $0x98] sm:$0xff]  ;;  %v419_v51 = vmul.f32 %v3807_v45, %v3807_v45 }
  0x64   : > { %v482_v43 = vadd.f32 %v412_v39, %v411_v38  ;;  %v420_v52 = vmul.f32 %v3810_v46, %v3810_v46  ;;  %v417_v53 = vmul.f32 %v3813_v47, %v3813_v47  ;;  %v418_v54 = vmul.f32 %v3816_v48, %v3816_v48  ;;  %v3837_v60 = vld [vmem:[%s3690_s26 + $0xe0] sm:$0xff]  ;;  %v3840_v61 = vld [vmem:[%s3690_s26 + $0xe8] sm:$0xff]  ;;  %v3843_v62 = vld [vmem:[%s3690_s26 + $0xd0] sm:$0xff] }
  0x65   : > { %v479_v44 = vadd.f32 %v410_v41, %v409_v40  ;;  %v415_v55 = vmul.f32 %v3819_v49, %v3819_v49  ;;  %v416_v56 = vmul.f32 %v3822_v50, %v3822_v50  ;;  %v3846_v63 = vld [vmem:[%s3690_s26 + $0xd8] sm:$0xff]  ;;  %v3849_v3 = vld [vmem:[%s3690_s26 + $0xc0] sm:$0xff]  ;;  %v3852_v4 = vld [vmem:[%s3690_s26 + $0xc8] sm:$0xff]  ;;  %v425_v6 = vmul.f32 %v3837_v60, %v3837_v60 }
  0x66   : > { %v494_v57 = vadd.f32 %v420_v52, %v419_v51  ;;  %v491_v58 = vadd.f32 %v418_v54, %v417_v53  ;;  %v426_v9 = vmul.f32 %v3840_v61, %v3840_v61  ;;  %v423_v10 = vmul.f32 %v3843_v62, %v3843_v62  ;;  %v3867_v23 = vld [vmem:[%s3690_s26 + $0x110] sm:$0xff]  ;;  %v3870_v24 = vld [vmem:[%s3690_s26 + $0x118] sm:$0xff]  ;;  %v3873_v25 = vld [vmem:[%s3690_s26 + $0x100] sm:$0xff] }
  0x67   : > { %v488_v59 = vadd.f32 %v416_v56, %v415_v55  ;;  %v424_v11 = vmul.f32 %v3846_v63, %v3846_v63  ;;  %v421_v15 = vmul.f32 %v3849_v3, %v3849_v3  ;;  %v422_v19 = vmul.f32 %v3852_v4, %v3852_v4  ;;  %5098 = vst [vmem:[#allocation23_spill] sm:$0xff] %v3873_v25  ;;  %v3876_v26 = vld [vmem:[%s3690_s26 + $0x108] sm:$0xff]  ;;  %v370_v52 = vld [vmem:[%s3690_s26 + $0x130] sm:$0xff]  ;;  %v371_v53 = vld [vmem:[%s3690_s26 + $0x138] sm:$0xff] }
  0x68   : > { %v503_v20 = vadd.f32 %v426_v9, %v425_v6  ;;  %5099 = vst [vmem:[#allocation24_spill] sm:$0xff] %v3876_v26  ;;  %v432_v36 = vmul.f32 %v3870_v24, %v3870_v24  ;;  %v429_v37 = vmul.f32 %v3873_v25, %v3873_v25  ;;  %v430_v38 = vmul.f32 %v3876_v26, %v3876_v26  ;;  %v373_v51 = vld [vmem:[%s3690_s26 + $0x148] sm:$0xff]  ;;  %v368_v54 = vld [vmem:[%s3690_s26 + $0x120] sm:$0xff] }
  0x69   : > { %477 = vadd.xlane.f32.xlu2 %v476_v27  ;;  %v500_v21 = vadd.f32 %v424_v11, %v423_v10  ;;  %v497_v22 = vadd.f32 %v422_v19, %v421_v15  ;;  %v362_v27 = vld [vmem:[%s3690_s26 + $0xf0] sm:$0xff]  ;;  %v369_v55 = vld [vmem:[%s3690_s26 + $0x128] sm:$0xff]  ;;  %v433_v6 = vmul.f32 %v368_v54, %v368_v54  ;;  %v380_v54 = vld [vmem:[%s3690_s26 + $0x180] sm:$0xff] }
  0x6a   : > { %471 = vadd.xlane.f32.xlu1 %v470_v28  ;;  %v363_v28 = vld [vmem:[%s3690_s26 + $0xf8] sm:$0xff]  ;;  %v427_v39 = vmul.f32 %v362_v27, %v362_v27  ;;  %v434_v9 = vmul.f32 %v369_v55, %v369_v55  ;;  %v378_v19 = vld [vmem:[%s3690_s26 + $0x170] sm:$0xff]  ;;  %v381_v55 = vld [vmem:[%s3690_s26 + $0x188] sm:$0xff] }
  0x6b   : > { %465 = vadd.xlane.f32.xlu0 %v464_v29  ;;  %v431_v29 = vmul.f32 %v3867_v23, %v3867_v23  ;;  %v428_v40 = vmul.f32 %v363_v28, %v363_v28  ;;  %v374_v27 = vld [vmem:[%s3690_s26 + $0x150] sm:$0xff]  ;;  %v375_v28 = vld [vmem:[%s3690_s26 + $0x158] sm:$0xff] }
  0x6c   : > { %v515_v15 = vadd.f32 %v434_v9, %v433_v6  ;;  %v445_v6 = vmul.f32 %v380_v54, %v380_v54  ;;  %v446_v9 = vmul.f32 %v381_v55, %v381_v55 }
  0x6d   : > { %v512_v41 = vadd.f32 %v432_v36, %v431_v29  ;;  %v443_v29 = vmul.f32 %v378_v19, %v378_v19  ;;  %v390_v19 = vld [vmem:[%s3690_s26 + $0x1d0] sm:$0xff] }
  0x71   : > { %486 = vadd.xlane.f32.xlu2 %v485_v42  ;;  %v509_v42 = vadd.f32 %v430_v38, %v429_v37 }
  0x72   : > { %483 = vadd.xlane.f32.xlu1 %v482_v43  ;;  %v506_v43 = vadd.f32 %v428_v40, %v427_v39  ;;  %v439_v39 = vmul.f32 %v374_v27, %v374_v27  ;;  %v440_v40 = vmul.f32 %v375_v28, %v375_v28  ;;  %v386_v27 = vld [vmem:[%s3690_s26 + $0x1b0] sm:$0xff]  ;;  %v387_v28 = vld [vmem:[%s3690_s26 + $0x1b8] sm:$0xff] }
  0x73   : > { %480 = vadd.xlane.f32.xlu0 %v479_v44  ;;  %v372_v44 = vld [vmem:[%s3690_s26 + $0x140] sm:$0xff] }
  0x74   : > { %v437_v56 = vmul.f32 %v372_v44, %v372_v44  ;;  %v384_v44 = vld [vmem:[%s3690_s26 + $0x1a0] sm:$0xff] }
  0x79   : > { %495 = vadd.xlane.f32.xlu2 %v494_v57  ;;  %v438_v57 = vmul.f32 %v373_v51, %v373_v51  ;;  %v385_v51 = vld [vmem:[%s3690_s26 + $0x1a8] sm:$0xff] }
  0x7a   : > { %492 = vadd.xlane.f32.xlu1 %v491_v58  ;;  %v435_v58 = vmul.f32 %v370_v52, %v370_v52  ;;  %v382_v52 = vld [vmem:[%s3690_s26 + $0x190] sm:$0xff] }
  0x7b   : > { %489 = vadd.xlane.f32.xlu0 %v488_v59  ;;  %v436_v59 = vmul.f32 %v371_v53, %v371_v53  ;;  %v521_v10 = vadd.f32 %v438_v57, %v437_v56  ;;  %v383_v53 = vld [vmem:[%s3690_s26 + $0x198] sm:$0xff]  ;;  %v449_v56 = vmul.f32 %v384_v44, %v384_v44  ;;  %v450_v57 = vmul.f32 %v385_v51, %v385_v51  ;;  %v394_v44 = vld [vmem:[%s3690_s26 + $0x1f0] sm:$0xff] }
  0x7c   : > { %v395_v51 = vld [vmem:[%s3690_s26 + $0x1f8] sm:$0xff]  ;;  %v459_v54 = vmul.f32 %v394_v44, %v394_v44 }
  0x7d   : > { %v518_v11 = vadd.f32 %v436_v59, %v435_v58  ;;  %v447_v58 = vmul.f32 %v382_v52, %v382_v52  ;;  %v448_v59 = vmul.f32 %v383_v53, %v383_v53  ;;  %v392_v52 = vld [vmem:[%s3690_s26 + $0x1e0] sm:$0xff]  ;;  %v393_v53 = vld [vmem:[%s3690_s26 + $0x1e8] sm:$0xff]  ;;  %v460_v55 = vmul.f32 %v395_v51, %v395_v51 }
  0x81   : > { %504 = vadd.xlane.f32.xlu2 %v503_v20  ;;  %v379_v20 = vld [vmem:[%s3690_s26 + $0x178] sm:$0xff] }
  0x82   : > { %501 = vadd.xlane.f32.xlu1 %v500_v21  ;;  %v376_v21 = vld [vmem:[%s3690_s26 + $0x160] sm:$0xff]  ;;  %v444_v36 = vmul.f32 %v379_v20, %v379_v20  ;;  %v391_v20 = vld [vmem:[%s3690_s26 + $0x1d8] sm:$0xff] }
  0x83   : > { %498 = vadd.xlane.f32.xlu0 %v497_v22  ;;  %v377_v22 = vld [vmem:[%s3690_s26 + $0x168] sm:$0xff]  ;;  %v441_v37 = vmul.f32 %v376_v21, %v376_v21  ;;  %v388_v21 = vld [vmem:[%s3690_s26 + $0x1c0] sm:$0xff] }
  0x84   : > { %v442_v38 = vmul.f32 %v377_v22, %v377_v22  ;;  %v389_v22 = vld [vmem:[%s3690_s26 + $0x1c8] sm:$0xff] }
  0x89   : > { %513 = vadd.xlane.f32.xlu2 %v512_v41  ;;  %v530_v41 = vadd.f32 %v444_v36, %v443_v29  ;;  %v455_v29 = vmul.f32 %v390_v19, %v390_v19  ;;  %v456_v36 = vmul.f32 %v391_v20, %v391_v20 }
  0x8a   : > { %510 = vadd.xlane.f32.xlu1 %v509_v42  ;;  %v527_v42 = vadd.f32 %v442_v38, %v441_v37  ;;  %v453_v37 = vmul.f32 %v388_v21, %v388_v21  ;;  %v454_v38 = vmul.f32 %v389_v22, %v389_v22 }
  0x8b   : > { %507 = vadd.xlane.f32.xlu0 %v506_v43  ;;  %v524_v43 = vadd.f32 %v440_v40, %v439_v39  ;;  %v451_v39 = vmul.f32 %v386_v27, %v386_v27  ;;  %v452_v40 = vmul.f32 %v387_v28, %v387_v28 }
  0x91   : > { %522 = vadd.xlane.f32.xlu2 %v521_v10  ;;  %v539_v10 = vadd.f32 %v450_v57, %v449_v56  ;;  %v457_v56 = vmul.f32 %v392_v52, %v392_v52  ;;  %v458_v57 = vmul.f32 %v393_v53, %v393_v53 }
  0x92   : > { %519 = vadd.xlane.f32.xlu1 %v518_v11  ;;  %v536_v11 = vadd.f32 %v448_v59, %v447_v58  ;;  %v554_v58 = vadd.f32 %v460_v55, %v459_v54  ;;  %v396_v55 = vld [vmem:[#allocation6] sm:$0x3] }
  0x93   : > { %516 = vadd.xlane.f32.xlu0 %v515_v15  ;;  %v533_v15 = vadd.f32 %v446_v9, %v445_v6  ;;  %v551_v59 = vadd.f32 %v458_v57, %v457_v56  ;;  %v3461_v6 = vmov 256.0  }
  0x94   : > { %3083 = vrcp.f32 %v3461_v6 }
  0x99   : > { %531 = vadd.xlane.f32.xlu2 %v530_v41  ;;  %v548_v41 = vadd.f32 %v456_v36, %v455_v29 }
  0x9a   : > { %528 = vadd.xlane.f32.xlu1 %v527_v42  ;;  %v545_v42 = vadd.f32 %v454_v38, %v453_v37  ;;  %v3084_v9 = vpop.eup %3083 }
  0x9b   : > { %525 = vadd.xlane.f32.xlu0 %v524_v43  ;;  %v542_v43 = vadd.f32 %v452_v40, %v451_v39  ;;  %vm562_vm0 = vweird.f32 %v3084_v9 }
  0xa1   : > { %540 = vadd.xlane.f32.xlu2 %v539_v10  ;;  %v558_v10 = vmul.f32 256.0, %v3084_v9 }
  0xa2   : > { %537 = vadd.xlane.f32.xlu1 %v536_v11 }
  0xa3   : > { %534 = vadd.xlane.f32.xlu0 %v533_v15  ;;  %v559_v11 = vsub.f32 1.0, %v558_v10 }
  0xa5   : > { %v560_v15 = vmul.f32 %v3084_v9, %v559_v11  ;;  %v3936_v11 = vperm.slane %v396_v55, 0 }
  0xa7   : > { %v561_v19 = vadd.f32 %v3084_v9, %v560_v15  ;;  %v3938_v15 = vperm.slane %v396_v55, 1 }
  0xa9   : > { %549 = vadd.xlane.f32.xlu2 %v548_v41  ;;  %v3916_v20 = vsel %vm562_vm0, %v3084_v9, %v561_v19 }
  0xaa   : > { %546 = vadd.xlane.f32.xlu1 %v545_v42 }
  0xab   : > { %543 = vadd.xlane.f32.xlu0 %v542_v43 }
  0xb2   : > { %555 = vadd.xlane.f32.xlu1 %v554_v58 }
  0xb3   : > { %552 = vadd.xlane.f32.xlu0 %v551_v59 }
  0xd4   : > { %v475_v21 = vpop.xlane.xlu2 %474 }
  0xd5   : > { %v568_v22 = vmul.f32 %v3916_v20, %v475_v21  ;;  %v469_v27 = vpop.xlane.xlu1 %468 }
  0xd6   : > { %v463_v28 = vpop.xlane.xlu0 %462  ;;  %v566_v29 = vmul.f32 %v3916_v20, %v469_v27 }
  0xd7   : > { %v564_v36 = vmul.f32 %v3916_v20, %v463_v28  ;;  %v600_v37 = vadd.f32 1e-09, %v568_v22 }
  0xd8   : > { %v598_v38 = vadd.f32 1e-09, %v566_v29 }
  0xd9   : > { %v3921_v39 = vadd.f32 1e-09, %v564_v36  ;;  %3085 = vrsqrt.f32 %v600_v37  ;;  %vm674_vm1 = vweird.f32 %v600_v37 }
  0xda   : > { %3087 = vrsqrt.f32 %v598_v38  ;;  %vm654_vm2 = vweird.f32 %v598_v38 }
  0xdb   : > { %3089 = vrsqrt.f32 %v3921_v39  ;;  %vm634_vm4 = vweird.f32 %v3921_v39 }
  0xdc   : > { %v478_v40 = vpop.xlane.xlu2 %477 }
  0xdd   : > { %v569_v41 = vmul.f32 %v3916_v20, %v478_v40  ;;  %v472_v42 = vpop.xlane.xlu1 %471 }
  0xde   : > { %v466_v43 = vpop.xlane.xlu0 %465  ;;  %v567_v44 = vmul.f32 %v3916_v20, %v472_v42 }
  0xdf   : > { %v565_v51 = vmul.f32 %v3916_v20, %v466_v43  ;;  %v3086_v52 = vpop.eup %3085  ;;  %v3927_v53 = vadd.f32 1e-09, %v569_v41 }
  0xe0   : > { %v3088_v54 = vpop.eup %3087  ;;  %v669_v56 = vmul.f32 %v3086_v52, %v600_v37  ;;  %v3929_v57 = vadd.f32 1e-09, %v567_v44  ;;  %vm675_vm3 = vweird.f32 %v3086_v52 }
  0xe1   : > { %v3931_v58 = vadd.f32 1e-09, %v565_v51  ;;  %v3090_v59 = vpop.eup %3089  ;;  %v649_v6 = vmul.f32 %v3088_v54, %v598_v38  ;;  %3091 = vrsqrt.f32 %v3927_v53  ;;  %vm655_vm5 = vweird.f32 %v3088_v54  ;;  %vm676_vm8 = vmor %vm674_vm1, %vm675_vm3 }
  0xe2   : > { %v670_v9 = vmul.f32 %v3086_v52, %v669_v56  ;;  %v629_v10 = vmul.f32 %v3090_v59, %v3921_v39  ;;  %3093 = vrsqrt.f32 %v3929_v57  ;;  %vm684_vm6 = vweird.f32 %v3927_v53  ;;  %vm656_vm10 = vmor %vm654_vm2, %vm655_vm5 }
  0xe3   : > { %v650_v19 = vmul.f32 %v3088_v54, %v649_v6  ;;  %3095 = vrsqrt.f32 %v3931_v58  ;;  %vm635_vm7 = vweird.f32 %v3090_v59  ;;  %vm664_vm11 = vweird.f32 %v3929_v57 }
  0xe4   : > { %v671_v21 = vmul.f32 0.5, %v670_v9  ;;  %v630_v22 = vmul.f32 %v3090_v59, %v629_v10  ;;  %v487_v27 = vpop.xlane.xlu2 %486  ;;  %vm636_vm12 = vmor %vm634_vm4, %vm635_vm7  ;;  %vm644_vm15 = vweird.f32 %v3931_v58 }
  0xe5   : > { %v651_v28 = vmul.f32 0.5, %v650_v19  ;;  %v572_v29 = vmul.f32 %v3916_v20, %v487_v27  ;;  %v484_v36 = vpop.xlane.xlu1 %483 }
  0xe6   : > { %v481_v40 = vpop.xlane.xlu0 %480  ;;  %v672_v41 = vsub.f32 1.5, %v671_v21  ;;  %v631_v42 = vmul.f32 0.5, %v630_v22  ;;  %v571_v55 = vmul.f32 %v3916_v20, %v484_v36 }
  0xe7   : > { %v3092_v43 = vpop.eup %3091  ;;  %v652_v44 = vsub.f32 1.5, %v651_v28  ;;  %v3944_v51 = vadd.f32 1e-09, %v572_v29  ;;  %v570_v19 = vmul.f32 %v3916_v20, %v481_v40 }
  0xe8   : > { %v3947_v56 = vpop.eup %3093  ;;  %v673_v6 = vmul.f32 %v3086_v52, %v672_v41  ;;  %v632_v9 = vsub.f32 1.5, %v631_v42  ;;  %v679_v10 = vmul.f32 %v3092_v43, %v3927_v53  ;;  %vm685_vm9 = vweird.f32 %v3092_v43 }
  0xe9   : > { %v3951_v21 = vpop.eup %3095  ;;  %v653_v22 = vmul.f32 %v3088_v54, %v652_v44  ;;  %v659_v27 = vmul.f32 %v3947_v56, %v3929_v57  ;;  %3097 = vrsqrt.f32 %v3944_v51  ;;  %vm665_vm13 = vweird.f32 %v3947_v56  ;;  %vm686_vm14 = vmor %vm684_vm6, %vm685_vm9 }
  0xea   : > { %v677_v28 = vsel %vm676_vm8, %v3086_v52, %v673_v6  ;;  %v633_v29 = vmul.f32 %v3090_v59, %v632_v9  ;;  %v680_v36 = vmul.f32 %v3092_v43, %v679_v10  ;;  %v639_v40 = vmul.f32 %v3951_v21, %v3931_v58  ;;  %vm666_vm1 = vmor %vm664_vm11, %vm665_vm13 }
  0xeb   : > { %v956_v37 = vmul.f32 %v677_v28, %v3717_v0  ;;  %v957_v41 = vmul.f32 %v677_v28, %v3720_v1  ;;  %v657_v42 = vsel %vm656_vm10, %v3088_v54, %v653_v22  ;;  %v660_v52 = vmul.f32 %v3947_v56, %v659_v27 }
  0xec   : > { %v952_v38 = vmul.f32 %v657_v42, %v3723_v2  ;;  %v953_v44 = vmul.f32 %v657_v42, %v3730_v5  ;;  %v637_v6 = vsel %vm636_vm12, %v3090_v59, %v633_v29  ;;  %v681_v9 = vmul.f32 0.5, %v680_v36  ;;  %v496_v10 = vpop.xlane.xlu2 %495 }
  0xed   : > { %v1025_v26 = vmul.f32 %v3936_v11, %v956_v37  ;;  %v1026_v0 = vmul.f32 %v3938_v15, %v957_v41  ;;  %v948_v1 = vmul.f32 %v637_v6, %v3735_v7  ;;  %v949_v54 = vmul.f32 %v637_v6, %v3738_v8  ;;  %v493_v22 = vpop.xlane.xlu1 %492 }
  0xee   : > { %v1021_v39 = vmul.f32 %v3936_v11, %v952_v38  ;;  %v1022_v27 = vmul.f32 %v3938_v15, %v953_v44  ;;  %v682_v28 = vsub.f32 1.5, %v681_v9  ;;  %v661_v2 = vmul.f32 0.5, %v660_v52 }
  0xef   : > { %v3977_v25 = vpop.eup %3097  ;;  %v1085_v5 = vpack.c.bf16 %v1026_v0, %v1025_v26  ;;  %v1017_v59 = vmul.f32 %v3936_v11, %v948_v1  ;;  %v1018_v29 = vmul.f32 %v3938_v15, %v949_v54  ;;  %v640_v36 = vmul.f32 %v3951_v21, %v639_v40 }
  0xf0   : > { %v1083_v37 = vpack.c.bf16 %v1022_v27, %v1021_v39  ;;  %v683_v7 = vmul.f32 %v3092_v43, %v682_v28  ;;  %v662_v41 = vsub.f32 1.5, %v661_v2  ;;  %v709_v26 = vmul.f32 %v3977_v25, %v3944_v51 }
  0xf1   : > { %1117 = vst [vmem:[#allocation2 + $0x20] sm:$0xff] %v1085_v5  ;;  %v1081_v8 = vpack.c.bf16 %v1018_v29, %v1017_v59  ;;  %v641_v42 = vmul.f32 0.5, %v640_v36  ;;  %vm645_vm0 = vweird.f32 %v3951_v21  ;;  %v3991_v38 = vadd.f32 1e-09, %v571_v55 }
  0xf2   : > { %1115 = vst [vmem:[#allocation2 + $0x10] sm:$0xff] %v1083_v37  ;;  %v687_v52 = vsel %vm686_vm14, %v3092_v43, %v683_v7  ;;  %v663_v40 = vmul.f32 %v3947_v56, %v662_v41  ;;  %v710_v9 = vmul.f32 %v3977_v25, %v709_v26  ;;  %v490_v43 = vpop.xlane.xlu0 %489  ;;  %vm714_vm2 = vweird.f32 %v3944_v51  ;;  %vm646_vm4 = vmor %vm644_vm15, %vm645_vm0 }
  0xf3   : > { %1113 = vst [vmem:[#allocation2] sm:$0xff] %v1081_v8  ;;  %v958_v44 = vmul.f32 %v687_v52, %v3747_v12  ;;  %v959_v53 = vmul.f32 %v687_v52, %v3750_v13  ;;  %v642_v6 = vsub.f32 1.5, %v641_v42  ;;  %3099 = vrsqrt.f32 %v3991_v38 }
  0xf4   : > { %v667_v0 = vsel %vm666_vm1, %v3947_v56, %v663_v40  ;;  %v4003_v55 = vadd.f32 1e-09, %v570_v19  ;;  %v505_v12 = vpop.xlane.xlu2 %504  ;;  %v711_v27 = vmul.f32 0.5, %v710_v9  ;;  %vm715_vm3 = vweird.f32 %v3977_v25 }
  0xf5   : > { %v1027_v13 = vmul.f32 %v3936_v11, %v958_v44  ;;  %v1028_v1 = vmul.f32 %v3938_v15, %v959_v53  ;;  %v954_v57 = vmul.f32 %v667_v0, %v3753_v14  ;;  %v955_v54 = vmul.f32 %v667_v0, %v3756_v16  ;;  %v502_v16 = vpop.xlane.xlu1 %501  ;;  %vm716_vm5 = vmor %vm714_vm2, %vm715_vm3 }
  0xf6   : > { %v643_v39 = vmul.f32 %v3951_v21, %v642_v6  ;;  %3101 = vrsqrt.f32 %v4003_v55  ;;  %v575_v14 = vmul.f32 %v3916_v20, %v496_v10  ;;  %v712_v5 = vsub.f32 1.5, %v711_v27 }
  0xf7   : > { %v1086_v56 = vpack.c.bf16 %v1028_v1, %v1027_v13  ;;  %v1023_v19 = vmul.f32 %v3936_v11, %v954_v57  ;;  %v1024_v28 = vmul.f32 %v3938_v15, %v955_v54  ;;  %v574_v59 = vmul.f32 %v3916_v20, %v493_v22 }
  0xf8   : > { %v647_v2 = vsel %vm646_vm4, %v3951_v21, %v643_v39  ;;  %v573_v29 = vmul.f32 %v3916_v20, %v490_v43  ;;  %v4024_v41 = vadd.f32 1e-09, %v575_v14  ;;  %v713_v8 = vmul.f32 %v3977_v25, %v712_v5 }
  0xf9   : > { %1118 = vst [vmem:[#allocation2 + $0x28] sm:$0xff] %v1086_v56  ;;  %v1084_v36 = vpack.c.bf16 %v1024_v28, %v1023_v19  ;;  %v950_v37 = vmul.f32 %v647_v2, %v3759_v17  ;;  %v951_v7 = vmul.f32 %v647_v2, %v3762_v18  ;;  %v3100_v58 = vpop.eup %3099  ;;  %v4027_v10 = vadd.f32 1e-09, %v574_v59 }
  0xfa   : > { %v699_v17 = vmul.f32 %v3100_v58, %v3991_v38  ;;  %v4036_v18 = vadd.f32 1e-09, %v573_v29  ;;  %v717_v26 = vsel %vm716_vm5, %v3977_v25, %v713_v8  ;;  %3103 = vrsqrt.f32 %v4024_v41  ;;  %v499_v51 = vpop.xlane.xlu0 %498 }
  0xfb   : > { %1116 = vst [vmem:[#allocation2 + $0x18] sm:$0xff] %v1084_v36  ;;  %v1019_v21 = vmul.f32 %v3936_v11, %v950_v37  ;;  %v1020_v22 = vmul.f32 %v3938_v15, %v951_v7  ;;  %v578_v52 = vmul.f32 %v3916_v20, %v505_v12  ;;  %v964_v44 = vmul.f32 %v717_v26, %v3777_v30 }
  0xfc   : > { %v4038_v42 = vpop.eup %3101  ;;  %v965_v53 = vmul.f32 %v717_v26, %v3780_v31  ;;  %v700_v6 = vmul.f32 %v3100_v58, %v699_v17  ;;  %vm704_vm6 = vweird.f32 %v3991_v38  ;;  %vm694_vm7 = vweird.f32 %v4003_v55  ;;  %v514_v25 = vpop.xlane.xlu2 %513 }
  0xfd   : > { %v1082_v40 = vpack.c.bf16 %v1020_v22, %v1019_v21  ;;  %v689_v9 = vmul.f32 %v4038_v42, %v4003_v55  ;;  %3105 = vrsqrt.f32 %v4027_v10  ;;  %v1033_v43 = vmul.f32 %v3936_v11, %v964_v44  ;;  %v511_v27 = vpop.xlane.xlu1 %510 }
  0xfe   : > { %v1034_v0 = vmul.f32 %v3938_v15, %v965_v53  ;;  %v701_v30 = vmul.f32 0.5, %v700_v6  ;;  %3107 = vrsqrt.f32 %v4036_v18  ;;  %v4054_v12 = vadd.f32 1e-09, %v578_v52 }
  0xff   : > { %1114 = vst [vmem:[#allocation2 + $0x8] sm:$0xff] %v1082_v40  ;;  %v690_v31 = vmul.f32 %v4038_v42, %v689_v9  ;;  %v577_v13 = vmul.f32 %v3916_v20, %v502_v16  ;;  %v576_v1 = vmul.f32 %v3916_v20, %v499_v51  ;;  %vm705_vm8 = vweird.f32 %v3100_v58 }
 0x100   : > { %v1089_v57 = vpack.c.bf16 %v1034_v0, %v1033_v43  ;;  %v702_v54 = vsub.f32 1.5, %v701_v30  ;;  %v581_v39 = vmul.f32 %v3916_v20, %v514_v25  ;;  %v3104_v56 = vpop.eup %3103  ;;  %vm744_vm9 = vweird.f32 %v4024_v41  ;;  %vm706_vm11 = vmor %vm704_vm6, %vm705_vm8 }
 0x101   : > { %v691_v19 = vmul.f32 0.5, %v690_v31  ;;  %3109 = vrsqrt.f32 %v4054_v12  ;;  %v4061_v28 = vadd.f32 1e-09, %v577_v13  ;;  %vm695_vm10 = vweird.f32 %v4038_v42 }
 0x102   : > { %1121 = vst [vmem:[#allocation2 + $0x40] sm:$0xff] %v1089_v57  ;;  %v703_v14 = vmul.f32 %v3100_v58, %v702_v54  ;;  %v739_v16 = vmul.f32 %v3104_v56, %v4024_v41  ;;  %v4065_v2 = vadd.f32 1e-09, %v576_v1  ;;  %vm745_vm12 = vweird.f32 %v3104_v56  ;;  %vm696_vm14 = vmor %vm694_vm7, %vm695_vm10 }
 0x103   : > { %v3106_v5 = vpop.eup %3105  ;;  %v692_v59 = vsub.f32 1.5, %v691_v19  ;;  %3111 = vrsqrt.f32 %v4061_v28  ;;  %v4071_v29 = vmul.f32 %v3916_v20, %v511_v27  ;;  %vm734_vm13 = vweird.f32 %v4027_v10  ;;  %vm746_vm3 = vmor %vm744_vm9, %vm745_vm12 }
 0x104   : > { %v4073_v36 = vpop.eup %3107  ;;  %v707_v37 = vsel %vm706_vm11, %v3100_v58, %v703_v14  ;;  %v740_v7 = vmul.f32 %v3104_v56, %v739_v16  ;;  %v729_v8 = vmul.f32 %v3106_v5, %v4027_v10  ;;  %v4077_v21 = vadd.f32 1e-09, %v581_v39  ;;  %v508_v14 = vpop.xlane.xlu0 %507 }
 0x105   : > { %v962_v38 = vmul.f32 %v707_v37, %v3783_v32  ;;  %v963_v22 = vmul.f32 %v707_v37, %v3786_v33  ;;  %v693_v17 = vmul.f32 %v4038_v42, %v692_v59  ;;  %v719_v26 = vmul.f32 %v4073_v36, %v4036_v18 }
 0x106   : > { %v741_v58 = vmul.f32 0.5, %v740_v7  ;;  %v730_v52 = vmul.f32 %v3106_v5, %v729_v8  ;;  %vm735_vm15 = vweird.f32 %v3106_v5  ;;  %vm724_vm0 = vweird.f32 %v4036_v18  ;;  %v523_v7 = vpop.xlane.xlu2 %522 }
 0x107   : > { %3113 = vrsqrt.f32 %v4065_v2  ;;  %v4090_v32 = vpop.eup %3109  ;;  %v1031_v33 = vmul.f32 %v3936_v11, %v962_v38  ;;  %v1032_v40 = vmul.f32 %v3938_v15, %v963_v22  ;;  %v697_v44 = vsel %vm696_vm14, %v4038_v42, %v693_v17  ;;  %vm736_vm7 = vmor %vm734_vm13, %vm735_vm15 }
 0x108   : > { %v720_v53 = vmul.f32 %v4073_v36, %v719_v26  ;;  %v960_v55 = vmul.f32 %v697_v44, %v3789_v34  ;;  %v961_v6 = vmul.f32 %v697_v44, %v3792_v35  ;;  %v742_v51 = vsub.f32 1.5, %v741_v58 }
 0x109   : > { %v731_v9 = vmul.f32 0.5, %v730_v52  ;;  %vm774_vm1 = vweird.f32 %v4054_v12  ;;  %v4099_v25 = vpop.eup %3111  ;;  %v1088_v43 = vpack.c.bf16 %v1032_v40, %v1031_v33  ;;  %vm725_vm2 = vweird.f32 %v4073_v36  ;;  %v520_v52 = vpop.xlane.xlu1 %519 }
 0x10a   : > { %v721_v0 = vmul.f32 0.5, %v720_v53  ;;  %v769_v30 = vmul.f32 %v4090_v32, %v4054_v12  ;;  %v1029_v42 = vmul.f32 %v3936_v11, %v960_v55  ;;  %v1030_v31 = vmul.f32 %v3938_v15, %v961_v6  ;;  %vm726_vm9 = vmor %vm724_vm0, %vm725_vm2 }
 0x10b   : > { %v743_v34 = vmul.f32 %v3104_v56, %v742_v51  ;;  %v732_v13 = vsub.f32 1.5, %v731_v9  ;;  %1120 = vst [vmem:[#allocation2 + $0x38] sm:$0xff] %v1088_v43  ;;  %vm775_vm4 = vweird.f32 %v4090_v32  ;;  %v759_v57 = vmul.f32 %v4099_v25, %v4061_v28 }
 0x10c   : > { %v722_v35 = vsub.f32 1.5, %v721_v0  ;;  %v770_v1 = vmul.f32 %v4090_v32, %v769_v30  ;;  %v1087_v39 = vpack.c.bf16 %v1030_v31, %v1029_v42  ;;  %vm764_vm5 = vweird.f32 %v4061_v28  ;;  %vm776_vm10 = vmor %vm774_vm1, %vm775_vm4 }
 0x10d   : > { %v4113_v54 = vpop.eup %3113  ;;  %v747_v27 = vsel %vm746_vm3, %v3104_v56, %v743_v34  ;;  %v733_v19 = vmul.f32 %v3106_v5, %v732_v13  ;;  %vm765_vm6 = vweird.f32 %v4099_v25  ;;  %v760_v8 = vmul.f32 %v4099_v25, %v759_v57 }
 0x10e   : > { %v970_v41 = vmul.f32 %v747_v27, %v3807_v45  ;;  %v971_v16 = vmul.f32 %v747_v27, %v3810_v46  ;;  %v723_v59 = vmul.f32 %v4073_v36, %v722_v35  ;;  %v771_v37 = vmul.f32 0.5, %v770_v1  ;;  %1119 = vst [vmem:[#allocation2 + $0x30] sm:$0xff] %v1087_v39  ;;  %vm766_vm12 = vmor %vm764_vm5, %vm765_vm6 }
 0x10f   : > { %v737_v56 = vsel %vm736_vm7, %v3106_v5, %v733_v19  ;;  %v749_v38 = vmul.f32 %v4113_v54, %v4065_v2  ;;  %vm754_vm8 = vweird.f32 %v4065_v2  ;;  %v761_v26 = vmul.f32 0.5, %v760_v8 }
 0x110   : > { %v1039_v45 = vmul.f32 %v3936_v11, %v970_v41  ;;  %v1040_v46 = vmul.f32 %v3938_v15, %v971_v16  ;;  %v968_v10 = vmul.f32 %v737_v56, %v3813_v47  ;;  %v969_v22 = vmul.f32 %v737_v56, %v3816_v48 }
 0x111   : > { %v727_v5 = vsel %vm726_vm9, %v4073_v36, %v723_v59  ;;  %v772_v17 = vsub.f32 1.5, %v771_v37  ;;  %v750_v58 = vmul.f32 %v4113_v54, %v749_v38  ;;  %v762_v18 = vsub.f32 1.5, %v761_v26 }
 0x112   : > { %v1092_v33 = vpack.c.bf16 %v1040_v46, %v1039_v45  ;;  %v1037_v40 = vmul.f32 %v3936_v11, %v968_v10  ;;  %v1038_v44 = vmul.f32 %v3938_v15, %v969_v22  ;;  %v966_v47 = vmul.f32 %v727_v5, %v3819_v49 }
 0x113   : > { %v967_v48 = vmul.f32 %v727_v5, %v3822_v50  ;;  %v773_v53 = vmul.f32 %v4090_v32, %v772_v17  ;;  %v751_v55 = vmul.f32 0.5, %v750_v58  ;;  %vm755_vm11 = vweird.f32 %v4113_v54 }
 0x114   : > { %1124 = vst [vmem:[#allocation2 + $0x58] sm:$0xff] %v1092_v33  ;;  %v1091_v36 = vpack.c.bf16 %v1038_v44, %v1037_v40  ;;  %v1035_v6 = vmul.f32 %v3936_v11, %v966_v47  ;;  %3115 = vrsqrt.f32 %v4077_v21  ;;  %v763_v51 = vmul.f32 %v4099_v25, %v762_v18  ;;  %vm756_vm13 = vmor %vm754_vm8, %vm755_vm11 }
 0x115   : > { %v1036_v49 = vmul.f32 %v3938_v15, %v967_v48  ;;  %v777_v50 = vsel %vm776_vm10, %v4090_v32, %v773_v53  ;;  %v752_v9 = vsub.f32 1.5, %v751_v55  ;;  %v4159_v12 = vadd.f32 1e-09, %v4071_v29  ;;  %v532_v29 = vpop.xlane.xlu2 %531 }
 0x116   : > { %1123 = vst [vmem:[#allocation2 + $0x50] sm:$0xff] %v1091_v36  ;;  %v976_v43 = vmul.f32 %v777_v50, %v3837_v60  ;;  %v977_v0 = vmul.f32 %v777_v50, %v3840_v61  ;;  %v579_v30 = vmul.f32 %v3916_v20, %v508_v14  ;;  %v767_v32 = vsel %vm766_vm12, %v4099_v25, %v763_v51  ;;  %v517_v60 = vpop.xlane.xlu0 %516  ;;  %v529_v14 = vpop.xlane.xlu1 %528 }
 0x117   : > { %v1090_v42 = vpack.c.bf16 %v1036_v49, %v1035_v6  ;;  %v753_v31 = vmul.f32 %v4113_v54, %v752_v9  ;;  %v584_v34 = vmul.f32 %v3916_v20, %v523_v7  ;;  %v974_v28 = vmul.f32 %v767_v32, %v3843_v62 }
 0x118   : > { %v1045_v61 = vmul.f32 %v3936_v11, %v976_v43  ;;  %v1046_v13 = vmul.f32 %v3938_v15, %v977_v0  ;;  %v975_v35 = vmul.f32 %v767_v32, %v3846_v63  ;;  %3117 = vrsqrt.f32 %v4159_v12 }
 0x119   : > { %1122 = vst [vmem:[#allocation2 + $0x48] sm:$0xff] %v1090_v42  ;;  %v757_v25 = vsel %vm756_vm13, %v4113_v54, %v753_v31  ;;  %v4175_v1 = vadd.f32 1e-09, %v579_v30  ;;  %v1043_v27 = vmul.f32 %v3936_v11, %v974_v28  ;;  %v4184_v16 = vadd.f32 1e-09, %v584_v34 }
 0x11a   : > { %v3116_v57 = vpop.eup %3115  ;;  %v1095_v39 = vpack.c.bf16 %v1046_v13, %v1045_v61  ;;  %v1044_v62 = vmul.f32 %v3938_v15, %v975_v35  ;;  %v972_v63 = vmul.f32 %v757_v25, %v3849_v3  ;;  %v973_v19 = vmul.f32 %v757_v25, %v3852_v4 }
 0x11b   : > { %v799_v2 = vmul.f32 %v3116_v57, %v4077_v21  ;;  %3119 = vrsqrt.f32 %v4175_v1  ;;  %v583_v7 = vmul.f32 %v3916_v20, %v520_v52  ;;  %v582_v3 = vmul.f32 %v3916_v20, %v517_v60 }
 0x11c   : > { %1127 = vst [vmem:[#allocation2 + $0x70] sm:$0xff] %v1095_v39  ;;  %v1094_v54 = vpack.c.bf16 %v1044_v62, %v1043_v27  ;;  %v1041_v41 = vmul.f32 %v3936_v11, %v972_v63  ;;  %v1042_v59 = vmul.f32 %v3938_v15, %v973_v19  ;;  %3121 = vrsqrt.f32 %v4184_v16  ;;  %v5100_v27 = vld [vmem:[#allocation23_spill] sm:$0xff]  ;;  %v5101_v63 = vld [vmem:[#allocation24_spill] sm:$0xff] }
 0x11d   : > { %v800_v37 = vmul.f32 %v3116_v57, %v799_v2  ;;  %v587_v4 = vmul.f32 %v3916_v20, %v532_v29  ;;  %v586_v56 = vmul.f32 %v3916_v20, %v529_v14  ;;  %v4192_v46 = vadd.f32 1e-09, %v583_v7  ;;  %v541_v44 = vpop.xlane.xlu2 %540 }
 0x11e   : > { %1126 = vst [vmem:[#allocation2 + $0x68] sm:$0xff] %v1094_v54  ;;  %v3118_v8 = vpop.eup %3117  ;;  %v1093_v38 = vpack.c.bf16 %v1042_v59, %v1041_v41  ;;  %v4194_v10 = vadd.f32 1e-09, %v582_v3  ;;  %vm804_vm14 = vweird.f32 %v4077_v21  ;;  %vm805_vm15 = vweird.f32 %v3116_v57  ;;  %v526_v52 = vpop.xlane.xlu0 %525  ;;  %v3149_v3 = vld [vmem:[%s3690_s26 + $0xf0] sm:$0xff] }
 0x11f   : > { %v801_v45 = vmul.f32 0.5, %v800_v37  ;;  %v789_v22 = vmul.f32 %v3118_v8, %v4159_v12  ;;  %v4198_v5 = vadd.f32 1e-09, %v587_v4  ;;  %3123 = vrsqrt.f32 %v4192_v46  ;;  %vm806_vm3 = vmor %vm804_vm14, %vm805_vm15  ;;  %v538_v43 = vpop.xlane.xlu1 %537  ;;  %v3150_v4 = vld [vmem:[%s3690_s26 + $0xf8] sm:$0xff] }
 0x120   : > { %1125 = vst [vmem:[#allocation2 + $0x60] sm:$0xff] %v1093_v38  ;;  %v4203_v58 = vadd.f32 1e-09, %v586_v56  ;;  %vm794_vm0 = vweird.f32 %v4159_v12  ;;  %3125 = vrsqrt.f32 %v4194_v10  ;;  %vm795_vm1 = vweird.f32 %v3118_v8 }
 0x121   : > { %v4200_v17 = vpop.eup %3119  ;;  %v802_v26 = vsub.f32 1.5, %v801_v45  ;;  %v790_v33 = vmul.f32 %v3118_v8, %v789_v22  ;;  %vm784_vm2 = vweird.f32 %v4175_v1  ;;  %3127 = vrsqrt.f32 %v4198_v5  ;;  %vm796_vm7 = vmor %vm794_vm0, %vm795_vm1 }
 0x122   : > { %v779_v40 = vmul.f32 %v4200_v17, %v4175_v1  ;;  %v4211_v48 = vpop.eup %3121  ;;  %vm785_vm4 = vweird.f32 %v4200_v17  ;;  %vm834_vm5 = vweird.f32 %v4184_v16  ;;  %v585_v55 = vmul.f32 %v3916_v20, %v526_v52 }
 0x123   : > { %v803_v47 = vmul.f32 %v3116_v57, %v802_v26  ;;  %v791_v53 = vmul.f32 0.5, %v790_v33  ;;  %v829_v6 = vmul.f32 %v4211_v48, %v4184_v16  ;;  %3129 = vrsqrt.f32 %v4203_v58  ;;  %vm786_vm12 = vmor %vm784_vm2, %vm785_vm4 }
 0x124   : > { %v780_v18 = vmul.f32 %v4200_v17, %v779_v40  ;;  %v590_v49 = vmul.f32 %v3916_v20, %v541_v44  ;;  %vm835_vm6 = vweird.f32 %v4211_v48  ;;  %v4229_v42 = vadd.f32 1e-09, %v585_v55 }
 0x125   : > { %v807_v36 = vsel %vm806_vm3, %v3116_v57, %v803_v47  ;;  %v792_v51 = vsub.f32 1.5, %v791_v53  ;;  %v4225_v0 = vpop.eup %3123  ;;  %v830_v30 = vmul.f32 %v4211_v48, %v829_v6  ;;  %vm824_vm8 = vweird.f32 %v4192_v46  ;;  %vm836_vm14 = vmor %vm834_vm5, %vm835_vm6 }
 0x126   : > { %v982_v21 = vmul.f32 %v807_v36, %v3867_v23  ;;  %v983_v50 = vmul.f32 %v807_v36, %v3870_v24  ;;  %v781_v9 = vmul.f32 0.5, %v780_v18  ;;  %v4231_v32 = vadd.f32 1e-09, %v590_v49  ;;  %v4233_v31 = vpop.eup %3125  ;;  %v3151_v36 = vld [vmem:[%s3690_s26 + $0x140] sm:$0xff]  ;;  %v3152_v49 = vld [vmem:[%s3690_s26 + $0x148] sm:$0xff] }
 0x127   : > { %v793_v24 = vmul.f32 %v3118_v8, %v792_v51  ;;  %v4237_v61 = vpop.eup %3127  ;;  %v831_v13 = vmul.f32 0.5, %v830_v30  ;;  %v819_v28 = vmul.f32 %v4225_v0, %v4192_v46  ;;  %v809_v35 = vmul.f32 %v4233_v31, %v4194_v10 }
 0x128   : > { %v1051_v34 = vmul.f32 %v3936_v11, %v982_v21  ;;  %v1052_v23 = vmul.f32 %v3938_v15, %v983_v50  ;;  %v782_v60 = vsub.f32 1.5, %v781_v9  ;;  %v4248_v29 = vmul.f32 %v3916_v20, %v538_v43 }
 0x129   : > { %v797_v57 = vsel %vm796_vm7, %v3118_v8, %v793_v24  ;;  %vm825_vm9 = vweird.f32 %v4225_v0  ;;  %vm814_vm10 = vweird.f32 %v4194_v10  ;;  %vm864_vm11 = vweird.f32 %v4198_v5  ;;  %v4254_v12 = vpop.eup %3129  ;;  %v4272_v8 = vpop.xlane.xlu0 %534  ;;  %v3155_v10 = vld [vmem:[%s3690_s26 + $0x120] sm:$0xff] }
 0x12a   : > { %v1098_v25 = vpack.c.bf16 %v1052_v23, %v1051_v34  ;;  %v783_v39 = vmul.f32 %v4200_v17, %v782_v60  ;;  %v980_v62 = vmul.f32 %v797_v57, %v5100_v27  ;;  %v981_v19 = vmul.f32 %v797_v57, %v5101_v63  ;;  %vm826_vm15 = vmor %vm824_vm8, %vm825_vm9  ;;  %v3153_v60 = vld [vmem:[%s3690_s26 + $0x130] sm:$0xff] }
 0x12b   : > { %v832_v2 = vsub.f32 1.5, %v831_v13  ;;  %v820_v14 = vmul.f32 %v4225_v0, %v819_v28  ;;  %v810_v41 = vmul.f32 %v4233_v31, %v809_v35  ;;  %vm815_vm13 = vweird.f32 %v4233_v31  ;;  %v3154_v28 = vld [vmem:[%s3690_s26 + $0x138] sm:$0xff] }
 0x12c   : > { %1130 = vst [vmem:[#allocation2 + $0x88] sm:$0xff] %v1098_v25  ;;  %v787_v54 = vsel %vm786_vm12, %v4200_v17, %v783_v39  ;;  %v859_v59 = vmul.f32 %v4237_v61, %v4198_v5  ;;  %v1049_v37 = vmul.f32 %v3936_v11, %v980_v62  ;;  %v1050_v7 = vmul.f32 %v3938_v15, %v981_v19  ;;  %vm816_vm1 = vmor %vm814_vm10, %vm815_vm13 }
 0x12d   : > { %v978_v1 = vmul.f32 %v3149_v3, %v787_v54  ;;  %v979_v56 = vmul.f32 %v3150_v4, %v787_v54  ;;  %v833_v38 = vmul.f32 %v4211_v48, %v832_v2  ;;  %v821_v45 = vmul.f32 0.5, %v820_v14  ;;  %v3157_v2 = vld [vmem:[%s3690_s26 + $0x170] sm:$0xff] }
 0x12e   : > { %v811_v22 = vmul.f32 0.5, %v810_v41  ;;  %v860_v17 = vmul.f32 %v4237_v61, %v859_v59  ;;  %v1097_v26 = vpack.c.bf16 %v1050_v7, %v1049_v37  ;;  %v849_v40 = vmul.f32 %v4254_v12, %v4203_v58  ;;  %v3158_v41 = vld [vmem:[%s3690_s26 + $0x178] sm:$0xff] }
 0x12f   : > { %v1047_v52 = vmul.f32 %v3936_v11, %v978_v1  ;;  %v1048_v33 = vmul.f32 %v3938_v15, %v979_v56  ;;  %v837_v44 = vsel %vm836_vm14, %v4211_v48, %v833_v38  ;;  %v822_v47 = vsub.f32 1.5, %v821_v45 }
 0x130   : > { %v812_v53 = vsub.f32 1.5, %v811_v22  ;;  %v861_v18 = vmul.f32 0.5, %v860_v17  ;;  %1129 = vst [vmem:[#allocation2 + $0x80] sm:$0xff] %v1097_v26  ;;  %v988_v6 = vmul.f32 %v3151_v36, %v837_v44  ;;  %v989_v21 = vmul.f32 %v3152_v49, %v837_v44  ;;  %v3159_v22 = vld [vmem:[%s3690_s26 + $0x160] sm:$0xff]  ;;  %v3160_v26 = vld [vmem:[%s3690_s26 + $0x168] sm:$0xff] }
 0x131   : > { %v1096_v55 = vpack.c.bf16 %v1048_v33, %v1047_v52  ;;  %v850_v50 = vmul.f32 %v4254_v12, %v849_v40  ;;  %v823_v51 = vmul.f32 %v4225_v0, %v822_v47  ;;  %vm865_vm0 = vweird.f32 %v4237_v61  ;;  %v544_v5 = vpop.xlane.xlu0 %543  ;;  %v550_v33 = vpop.xlane.xlu2 %549 }
 0x132   : > { %v813_v16 = vmul.f32 %v4233_v31, %v812_v53  ;;  %v862_v48 = vsub.f32 1.5, %v861_v18  ;;  %v1057_v9 = vmul.f32 %v3936_v11, %v988_v6  ;;  %v1058_v43 = vmul.f32 %v3938_v15, %v989_v21  ;;  %vm866_vm3 = vmor %vm864_vm11, %vm865_vm0 }
 0x133   : > { %1128 = vst [vmem:[#allocation2 + $0x78] sm:$0xff] %v1096_v55  ;;  %v851_v46 = vmul.f32 0.5, %v850_v50  ;;  %3131 = vrsqrt.f32 %v4229_v42  ;;  %v827_v30 = vsel %vm826_vm15, %v4225_v0, %v823_v51  ;;  %vm855_vm2 = vweird.f32 %v4254_v12  ;;  %v547_v0 = vpop.xlane.xlu1 %546 }
 0x134   : > { %v817_v34 = vsel %vm816_vm1, %v4233_v31, %v813_v16  ;;  %v863_v23 = vmul.f32 %v4237_v61, %v862_v48  ;;  %v1101_v24 = vpack.c.bf16 %v1058_v43, %v1057_v9  ;;  %v986_v13 = vmul.f32 %v3153_v60, %v827_v30  ;;  %v3156_v31 = vld [vmem:[%s3690_s26 + $0x128] sm:$0xff] }
 0x135   : > { %v987_v35 = vmul.f32 %v3154_v28, %v827_v30  ;;  %v984_v25 = vmul.f32 %v3155_v10, %v817_v34  ;;  %v985_v57 = vmul.f32 %v3156_v31, %v817_v34  ;;  %v852_v27 = vsub.f32 1.5, %v851_v46  ;;  %v3161_v10 = vld [vmem:[%s3690_s26 + $0x150] sm:$0xff] }
 0x136   : > { %v867_v39 = vsel %vm866_vm3, %v4237_v61, %v863_v23  ;;  %3133 = vrsqrt.f32 %v4231_v32  ;;  %1133 = vst [vmem:[#allocation2 + $0xa0] sm:$0xff] %v1101_v24  ;;  %v1055_v62 = vmul.f32 %v3936_v11, %v986_v13  ;;  %vm854_vm4 = vweird.f32 %v4203_v58 }
 0x137   : > { %v1056_v63 = vmul.f32 %v3938_v15, %v987_v35  ;;  %v1053_v19 = vmul.f32 %v3936_v11, %v984_v25  ;;  %v994_v14 = vmul.f32 %v3157_v2, %v867_v39  ;;  %v1054_v54 = vmul.f32 %v3938_v15, %v985_v57  ;;  %vm856_vm5 = vmor %vm854_vm4, %vm855_vm2 }
 0x138   : > { %v995_v59 = vmul.f32 %v3158_v41, %v867_v39  ;;  %v853_v61 = vmul.f32 %v4254_v12, %v852_v27  ;;  %v4328_v1 = vadd.f32 1e-09, %v4248_v29  ;;  %v588_v4 = vmul.f32 %v3916_v20, %v4272_v8 }
 0x139   : > { %v3132_v37 = vpop.eup %3131  ;;  %v1100_v7 = vpack.c.bf16 %v1056_v63, %v1055_v62  ;;  %v1063_v3 = vmul.f32 %v3936_v11, %v994_v14  ;;  %v1099_v56 = vpack.c.bf16 %v1054_v54, %v1053_v19  ;;  %v593_v55 = vmul.f32 %v3916_v20, %v550_v33  ;;  %v553_v30 = vpop.xlane.xlu0 %552 }
 0x13a   : > { %v1064_v38 = vmul.f32 %v3938_v15, %v995_v59  ;;  %v857_v45 = vsel %vm856_vm5, %v4254_v12, %v853_v61  ;;  %v839_v58 = vmul.f32 %v3132_v37, %v4229_v42  ;;  %3135 = vrsqrt.f32 %v4328_v1 }
 0x13b   : > { %1132 = vst [vmem:[#allocation2 + $0x98] sm:$0xff] %v1100_v7  ;;  %v992_v17 = vmul.f32 %v3159_v22, %v857_v45  ;;  %v993_v52 = vmul.f32 %v3160_v26, %v857_v45  ;;  %v4338_v8 = vadd.f32 1e-09, %v588_v4  ;;  %v592_v49 = vmul.f32 %v3916_v20, %v547_v0  ;;  %v556_v50 = vpop.xlane.xlu1 %555  ;;  %v3162_v0 = vld [vmem:[%s3690_s26 + $0x158] sm:$0xff] }
 0x13c   : > { %v3134_v29 = vpop.eup %3133  ;;  %1131 = vst [vmem:[#allocation2 + $0x90] sm:$0xff] %v1099_v56  ;;  %v1104_v40 = vpack.c.bf16 %v1064_v38, %v1063_v3  ;;  %v840_v44 = vmul.f32 %v3132_v37, %v839_v58  ;;  %v591_v21 = vmul.f32 %v3916_v20, %v544_v5  ;;  %vm844_vm6 = vweird.f32 %v4229_v42  ;;  %v3163_v5 = vld [vmem:[%s3690_s26 + $0x1a0] sm:$0xff] }
 0x13d   : > { %v1061_v47 = vmul.f32 %v3936_v11, %v992_v17  ;;  %v1062_v12 = vmul.f32 %v3938_v15, %v993_v52  ;;  %v889_v53 = vmul.f32 %v3134_v29, %v4231_v32  ;;  %3137 = vrsqrt.f32 %v4338_v8 }
 0x13e   : > { %1136 = vst [vmem:[#allocation2 + $0xb8] sm:$0xff] %v1104_v40  ;;  %v841_v18 = vmul.f32 0.5, %v840_v44  ;;  %vm845_vm7 = vweird.f32 %v3132_v37  ;;  %v4348_v16 = vadd.f32 1e-09, %v593_v55  ;;  %vm894_vm8 = vweird.f32 %v4231_v32  ;;  %v3164_v32 = vld [vmem:[%s3690_s26 + $0x1a8] sm:$0xff]  ;;  %v3165_v44 = vld [vmem:[%s3690_s26 + $0x190] sm:$0xff] }
 0x13f   : > { %v1103_v36 = vpack.c.bf16 %v1062_v12, %v1061_v47  ;;  %v890_v6 = vmul.f32 %v3134_v29, %v889_v53  ;;  %v4351_v43 = vadd.f32 1e-09, %v592_v49  ;;  %v4353_v46 = vadd.f32 1e-09, %v591_v21  ;;  %vm846_vm9 = vmor %vm844_vm6, %vm845_vm7  ;;  %v3166_v12 = vld [vmem:[%s3690_s26 + $0x198] sm:$0xff] }
 0x140   : > { %v842_v51 = vsub.f32 1.5, %v841_v18  ;;  %v3136_v48 = vpop.eup %3135  ;;  %3139 = vrsqrt.f32 %v4348_v16  ;;  %v595_v42 = vmul.f32 %v3916_v20, %v556_v50  ;;  %vm895_vm10 = vweird.f32 %v3134_v29 }
 0x141   : > { %1135 = vst [vmem:[#allocation2 + $0xb0] sm:$0xff] %v1103_v36  ;;  %v891_v9 = vmul.f32 0.5, %v890_v6  ;;  %v879_v23 = vmul.f32 %v3136_v48, %v4328_v1  ;;  %vm884_vm11 = vweird.f32 %v4328_v1  ;;  %3141 = vrsqrt.f32 %v4351_v43  ;;  %vm896_vm12 = vmor %vm894_vm8, %vm895_vm10 }
 0x142   : > { %v843_v34 = vmul.f32 %v3132_v37, %v842_v51  ;;  %3143 = vrsqrt.f32 %v4353_v46  ;;  %v594_v35 = vmul.f32 %v3916_v20, %v553_v30  ;;  %vm885_vm13 = vweird.f32 %v3136_v48  ;;  %v3168_v30 = vld [vmem:[%s3690_s26 + $0x188] sm:$0xff] }
 0x143   : > { %v892_v24 = vsub.f32 1.5, %v891_v9  ;;  %v4360_v60 = vpop.eup %3137  ;;  %v880_v28 = vmul.f32 %v3136_v48, %v879_v23  ;;  %vm874_vm14 = vweird.f32 %v4338_v8  ;;  %v4371_v62 = vadd.f32 1e-09, %v595_v42  ;;  %vm886_vm0 = vmor %vm884_vm11, %vm885_vm13 }
 0x144   : > { %v847_v13 = vsel %vm846_vm9, %v3132_v37, %v843_v34  ;;  %v869_v39 = vmul.f32 %v4360_v60, %v4338_v8  ;;  %vm924_vm15 = vweird.f32 %v4348_v16  ;;  %v4383_v4 = vadd.f32 1e-09, %v594_v35 }
 0x145   : > { %v990_v25 = vmul.f32 %v3161_v10, %v847_v13  ;;  %v991_v31 = vmul.f32 %v3162_v0, %v847_v13  ;;  %v893_v57 = vmul.f32 %v3134_v29, %v892_v24  ;;  %v881_v27 = vmul.f32 0.5, %v880_v28 }
 0x146   : > { %v870_v2 = vmul.f32 %v4360_v60, %v869_v39  ;;  %v3140_v14 = vpop.eup %3139  ;;  %3145 = vrsqrt.f32 %v4371_v62  ;;  %vm875_vm1 = vweird.f32 %v4360_v60  ;;  %vm914_vm5 = vweird.f32 %v4351_v43  ;;  %v3170_v39 = vld [vmem:[%s3690_s26 + $0x1d8] sm:$0xff] }
 0x147   : > { %v1059_v20 = vmul.f32 %v3936_v11, %v990_v25  ;;  %v1060_v63 = vmul.f32 %v3938_v15, %v991_v31  ;;  %v897_v19 = vsel %vm896_vm12, %v3134_v29, %v893_v57  ;;  %v882_v59 = vsub.f32 1.5, %v881_v27  ;;  %v4380_v61 = vpop.eup %3141  ;;  %vm876_vm3 = vmor %vm874_vm14, %vm875_vm1 }
 0x148   : > { %v1000_v54 = vmul.f32 %v3163_v5, %v897_v19  ;;  %v1001_v41 = vmul.f32 %v3164_v32, %v897_v19  ;;  %v871_v7 = vmul.f32 0.5, %v870_v2  ;;  %v919_v3 = vmul.f32 %v3140_v14, %v4348_v16  ;;  %v4385_v56 = vpop.eup %3143  ;;  %v3169_v16 = vld [vmem:[%s3690_s26 + $0x1d0] sm:$0xff]  ;;  %v3172_v2 = vld [vmem:[%s3690_s26 + $0x1c8] sm:$0xff] }
 0x149   : > { %v1102_v37 = vpack.c.bf16 %v1060_v63, %v1059_v20  ;;  %v883_v58 = vmul.f32 %v3136_v48, %v882_v59  ;;  %v909_v22 = vmul.f32 %v4380_v61, %v4351_v43  ;;  %v899_v52 = vmul.f32 %v4385_v56, %v4353_v46  ;;  %v3171_v63 = vld [vmem:[%s3690_s26 + $0x1c0] sm:$0xff] }
 0x14a   : > { %v1069_v38 = vmul.f32 %v3936_v11, %v1000_v54  ;;  %v1070_v45 = vmul.f32 %v3938_v15, %v1001_v41  ;;  %v872_v17 = vsub.f32 1.5, %v871_v7  ;;  %v920_v26 = vmul.f32 %v3140_v14, %v919_v3 }
 0x14b   : > { %1134 = vst [vmem:[#allocation2 + $0xa8] sm:$0xff] %v1102_v37  ;;  %v887_v29 = vsel %vm886_vm0, %v3136_v48, %v883_v58  ;;  %vm925_vm2 = vweird.f32 %v3140_v14  ;;  %v910_v40 = vmul.f32 %v4380_v61, %v909_v22  ;;  %vm915_vm4 = vweird.f32 %v4380_v61  ;;  %v3167_v48 = vld [vmem:[%s3690_s26 + $0x180] sm:$0xff]  ;;  %v3174_v22 = vld [vmem:[%s3690_s26 + $0x1b8] sm:$0xff] }
 0x14c   : > { %v1107_v33 = vpack.c.bf16 %v1070_v45, %v1069_v38  ;;  %v998_v47 = vmul.f32 %v3165_v44, %v887_v29  ;;  %v999_v53 = vmul.f32 %v3166_v12, %v887_v29  ;;  %v873_v1 = vmul.f32 %v4360_v60, %v872_v17  ;;  %v4401_v55 = vpop.eup %3145  ;;  %vm926_vm6 = vmor %vm924_vm15, %vm925_vm2  ;;  %v3173_v45 = vld [vmem:[%s3690_s26 + $0x1b0] sm:$0xff] }
 0x14d   : > { %v921_v18 = vmul.f32 0.5, %v920_v26  ;;  %v911_v36 = vmul.f32 0.5, %v910_v40  ;;  %v900_v6 = vmul.f32 %v4385_v56, %v899_v52  ;;  %3147 = vrsqrt.f32 %v4383_v4  ;;  %vm916_vm7 = vmor %vm914_vm5, %vm915_vm4 }
 0x14e   : > { %1139 = vst [vmem:[#allocation2 + $0xd0] sm:$0xff] %v1107_v33  ;;  %v1067_v49 = vmul.f32 %v3936_v11, %v998_v47  ;;  %v1068_v21 = vmul.f32 %v3938_v15, %v999_v53  ;;  %v877_v50 = vsel %vm876_vm3, %v4360_v60, %v873_v1  ;;  %v939_v13 = vmul.f32 %v4401_v55, %v4371_v62  ;;  %v3175_v47 = vld [vmem:[%s3690_s26 + $0x1f0] sm:$0xff]  ;;  %v3176_v53 = vld [vmem:[%s3690_s26 + $0x1f8] sm:$0xff] }
 0x14f   : > { %v922_v51 = vsub.f32 1.5, %v921_v18  ;;  %v996_v9 = vmul.f32 %v3167_v48, %v877_v50  ;;  %v997_v34 = vmul.f32 %v3168_v30, %v877_v50  ;;  %v912_v8 = vsub.f32 1.5, %v911_v36 }
 0x150   : > { %v901_v23 = vmul.f32 0.5, %v900_v6  ;;  %v1106_v42 = vpack.c.bf16 %v1068_v21, %v1067_v49  ;;  %vm904_vm8 = vweird.f32 %v4353_v46  ;;  %vm905_vm9 = vweird.f32 %v4385_v56  ;;  %v3177_v21 = vld [vmem:[%s3690_s26 + $0x1e0] sm:$0xff] }
 0x151   : > { %v923_v24 = vmul.f32 %v3140_v14, %v922_v51  ;;  %v1065_v28 = vmul.f32 %v3936_v11, %v996_v9  ;;  %v1066_v60 = vmul.f32 %v3938_v15, %v997_v34  ;;  %v913_v35 = vmul.f32 %v4380_v61, %v912_v8  ;;  %vm906_vm10 = vmor %vm904_vm8, %vm905_vm9  ;;  %v3178_v51 = vld [vmem:[%s3690_s26 + $0x1e8] sm:$0xff] }
 0x152   : > { %v902_v10 = vsub.f32 1.5, %v901_v23  ;;  %1138 = vst [vmem:[#allocation2 + $0xc8] sm:$0xff] %v1106_v42  ;;  %v940_v43 = vmul.f32 %v4401_v55, %v939_v13  ;;  %vm945_vm11 = vweird.f32 %v4401_v55  ;;  %vm944_vm12 = vweird.f32 %v4371_v62 }
 0x153   : > { %v927_v25 = vsel %vm926_vm6, %v3140_v14, %v923_v24  ;;  %v3148_v0 = vpop.eup %3147  ;;  %v1105_v31 = vpack.c.bf16 %v1066_v60, %v1065_v28  ;;  %v917_v20 = vsel %vm916_vm7, %v4380_v61, %v913_v35  ;;  %vm946_vm13 = vmor %vm944_vm12, %vm945_vm11  ;;  %vm934_vm15 = vweird.f32 %v4383_v4 }
 0x154   : > { %v1006_v57 = vmul.f32 %v3169_v16, %v927_v25  ;;  %v1007_v27 = vmul.f32 %v3170_v39, %v927_v25  ;;  %v1004_v19 = vmul.f32 %v3171_v63, %v917_v20  ;;  %v1005_v14 = vmul.f32 %v3172_v2, %v917_v20 }
 0x155   : > { %v903_v5 = vmul.f32 %v4385_v56, %v902_v10  ;;  %v941_v54 = vmul.f32 0.5, %v940_v43  ;;  %1137 = vst [vmem:[#allocation2 + $0xc0] sm:$0xff] %v1105_v31  ;;  %v929_v59 = vmul.f32 %v3148_v0, %v4383_v4  ;;  %vm935_vm14 = vweird.f32 %v3148_v0 }
 0x156   : > { %v1075_v32 = vmul.f32 %v3936_v11, %v1006_v57  ;;  %v1076_v41 = vmul.f32 %v3938_v15, %v1007_v27  ;;  %v1073_v61 = vmul.f32 %v3936_v11, %v1004_v19  ;;  %v1074_v37 = vmul.f32 %v3938_v15, %v1005_v14  ;;  %vm936_vm0 = vmor %vm934_vm15, %vm935_vm14 }
 0x157   : > { %v907_v7 = vsel %vm906_vm10, %v4385_v56, %v903_v5  ;;  %v942_v3 = vsub.f32 1.5, %v941_v54  ;;  %v930_v46 = vmul.f32 %v3148_v0, %v929_v59 }
 0x158   : > { %v1110_v38 = vpack.c.bf16 %v1076_v41, %v1075_v32  ;;  %v1002_v58 = vmul.f32 %v3173_v45, %v907_v7  ;;  %v1003_v17 = vmul.f32 %v3174_v22, %v907_v7  ;;  %v1109_v26 = vpack.c.bf16 %v1074_v37, %v1073_v61 }
 0x159   : > { %v943_v52 = vmul.f32 %v4401_v55, %v942_v3  ;;  %v931_v56 = vmul.f32 0.5, %v930_v46 }
 0x15a   : > { %1142 = vst [vmem:[#allocation2 + $0xe8] sm:$0xff] %v1110_v38  ;;  %v1071_v33 = vmul.f32 %v3936_v11, %v1002_v58  ;;  %v1072_v29 = vmul.f32 %v3938_v15, %v1003_v17 }
 0x15b   : > { %1141 = vst [vmem:[#allocation2 + $0xe0] sm:$0xff] %v1109_v26  ;;  %v947_v40 = vsel %vm946_vm13, %v4401_v55, %v943_v52  ;;  %v932_v1 = vsub.f32 1.5, %v931_v56 }
 0x15c   : > { %v1108_v44 = vpack.c.bf16 %v1072_v29, %v1071_v33  ;;  %v1010_v12 = vmul.f32 %v3175_v47, %v947_v40  ;;  %v1011_v62 = vmul.f32 %v3176_v53, %v947_v40 }
 0x15d   : > { %v933_v6 = vmul.f32 %v3148_v0, %v932_v1 }
 0x15e   : > { %1140 = vst [vmem:[#allocation2 + $0xd8] sm:$0xff] %v1108_v44  ;;  %v1079_v18 = vmul.f32 %v3936_v11, %v1010_v12  ;;  %v1080_v36 = vmul.f32 %v3938_v15, %v1011_v62 }
 0x15f   : > { %v937_v55 = vsel %vm936_vm0, %v3148_v0, %v933_v6 }
 0x160   : > { %v1112_v49 = vpack.c.bf16 %v1080_v36, %v1079_v18  ;;  %v1008_v50 = vmul.f32 %v3177_v21, %v937_v55  ;;  %v1009_v48 = vmul.f32 %v3178_v51, %v937_v55 }
 0x162   : > { %1144 = vst [vmem:[#allocation2 + $0xf8] sm:$0xff] %v1112_v49  ;;  %v1077_v9 = vmul.f32 %v3936_v11, %v1008_v50  ;;  %v1078_v30 = vmul.f32 %v3938_v15, %v1009_v48 }
 0x164   : > { %v1111_v34 = vpack.c.bf16 %v1078_v30, %v1077_v9 }
 0x166   : > { %1143 = vst [vmem:[#allocation2 + $0xf0] sm:$0xff] %v1111_v34 }
 0x167 PF: > { %v2711_v4 = vld [vmem:[%s3701_s27 + $0xa8] sm:$0xf]  ;;  %v2879_v8 = vld [vmem:[%s3701_s27 + $0xb0] sm:$0xf0]  ;;  %v2699_v42 = vld [vmem:[%s3701_s27 + $0x90] sm:$0xf] }
 0x168   : > { %v2807_v23 = vld [vmem:[%s3701_s27 + $0x168] sm:$0xf]  ;;  %v2712_v11 = vor.u32 %v2879_v8, %v2711_v4  ;;  %v2903_v15 = vld [vmem:[%s3701_s27 + $0x170] sm:$0xf0]  ;;  %v2876_v24 = vld [vmem:[%s3701_s27 + $0x98] sm:$0xf0] }
 0x169   : > { %v2808_v13 = vor.u32 %v2903_v15, %v2807_v23  ;;  %v2795_v28 = vld [vmem:[%s3701_s27 + $0x150] sm:$0xf]  ;;  %v2900_v60 = vld [vmem:[%s3701_s27 + $0x158] sm:$0xf0]  ;;  %v2700_v35 = vor.u32 %v2876_v24, %v2699_v42  ;;  %v2687_v25 = vld [vmem:[%s3701_s27 + $0x78] sm:$0xf] }
 0x16a   : > { %1665 = vmatpush.bf16.msra.mxu0 %v2712_v11  ;;  %2905 = vmatpush.bf16.msra.mxu2 %v2712_v11  ;;  %v2796_v10 = vor.u32 %v2900_v60, %v2795_v28  ;;  %v2873_v43 = vld [vmem:[%s3701_s27 + $0x80] sm:$0xf0]  ;;  %v2783_v0 = vld [vmem:[%s3701_s27 + $0x138] sm:$0xf]  ;;  %v2675_v39 = vld [vmem:[%s3701_s27 + $0x60] sm:$0xf] }
 0x16b   : > { %1754 = vmatpush.bf16.msra.mxu1 %v2808_v13  ;;  %2913 = vmatpush.bf16.msra.mxu3 %v2808_v13  ;;  %v2897_v31 = vld [vmem:[%s3701_s27 + $0x140] sm:$0xf0]  ;;  %v2688_v16 = vor.u32 %v2873_v43, %v2687_v25  ;;  %v2870_v27 = vld [vmem:[%s3701_s27 + $0x68] sm:$0xf0]  ;;  %v2771_v20 = vld [vmem:[%s3701_s27 + $0x120] sm:$0xf] }
 0x16c   : > { %v2784_v57 = vor.u32 %v2897_v31, %v2783_v0  ;;  %v2894_v63 = vld [vmem:[%s3701_s27 + $0x128] sm:$0xf0]  ;;  %v2676_v19 = vor.u32 %v2870_v27, %v2675_v39  ;;  %v2663_v14 = vld [vmem:[%s3701_s27 + $0x48] sm:$0xf]  ;;  %v2867_v5 = vld [vmem:[%s3701_s27 + $0x50] sm:$0xf0] }
 0x16d   : > { %v2772_v2 = vor.u32 %v2894_v63, %v2771_v20  ;;  %v2759_v54 = vld [vmem:[%s3701_s27 + $0x108] sm:$0xf]  ;;  %v2891_v32 = vld [vmem:[%s3701_s27 + $0x110] sm:$0xf0]  ;;  %v2664_v41 = vor.u32 %v2867_v5, %v2663_v14  ;;  %v2651_v61 = vld [vmem:[%s3701_s27 + $0x30] sm:$0xf] }
 0x16e   : > { %1666 = vmatpush.bf16.msra.mxu0 %v2700_v35  ;;  %2906 = vmatpush.bf16.msra.mxu2 %v2700_v35  ;;  %v2760_v59 = vor.u32 %v2891_v32, %v2759_v54  ;;  %v2864_v37 = vld [vmem:[%s3701_s27 + $0x38] sm:$0xf0]  ;;  %v2747_v7 = vld [vmem:[%s3701_s27 + $0xf0] sm:$0xf]  ;;  %v2639_v58 = vld [vmem:[%s3701_s27 + $0x18] sm:$0xf] }
 0x16f   : > { %1755 = vmatpush.bf16.msra.mxu1 %v2796_v10  ;;  %2914 = vmatpush.bf16.msra.mxu3 %v2796_v10  ;;  %v2888_v3 = vld [vmem:[%s3701_s27 + $0xf8] sm:$0xf0]  ;;  %v2652_v38 = vor.u32 %v2864_v37, %v2651_v61  ;;  %v2861_v22 = vld [vmem:[%s3701_s27 + $0x20] sm:$0xf0]  ;;  %v2735_v17 = vld [vmem:[%s3701_s27 + $0xd8] sm:$0xf] }
 0x170   : > { %v2748_v45 = vor.u32 %v2888_v3, %v2747_v7  ;;  %v2885_v46 = vld [vmem:[%s3701_s27 + $0xe0] sm:$0xf0]  ;;  %v2640_v26 = vor.u32 %v2861_v22, %v2639_v58  ;;  %v2627_v52 = vld [vmem:[%s3701_s27] sm:$0xf]  ;;  %v2858_v29 = vld [vmem:[%s3701_s27 + $0x8] sm:$0xf0] }
 0x171   : > { %v2736_v33 = vor.u32 %v2885_v46, %v2735_v17  ;;  %v2723_v56 = vld [vmem:[%s3701_s27 + $0xc0] sm:$0xf]  ;;  %v2882_v40 = vld [vmem:[%s3701_s27 + $0xc8] sm:$0xf0]  ;;  %v2826_v47 = vld [vmem:[#allocation2 + $0x4] sm:$0xf0]  ;;  %v2628_v6 = vor.u32 %v2858_v29, %v2627_v52 }
 0x172   : > { %1667 = vmatpush.bf16.msra.mxu0 %v2688_v16  ;;  %2907 = vmatpush.bf16.msra.mxu2 %v2688_v16  ;;  %v2499_v44 = vld [vmem:[#allocation2] sm:$0xf]  ;;  %v2842_v53 = vld [vmem:[#allocation2 + $0x84] sm:$0xf0]  ;;  %v2878_v62 = vld [vmem:[%s3701_s27 + $0xac] sm:$0xf]  ;;  %v2724_v50 = vor.u32 %v2882_v40, %v2723_v56 }
 0x173   : > { %1756 = vmatpush.bf16.msra.mxu1 %v2784_v57  ;;  %2915 = vmatpush.bf16.msra.mxu3 %v2784_v57  ;;  %v2563_v12 = vld [vmem:[#allocation2 + $0x80] sm:$0xf]  ;;  %v2713_v1 = vld [vmem:[%s3701_s27 + $0xb4] sm:$0xf0]  ;;  %v2902_v18 = vld [vmem:[%s3701_s27 + $0x16c] sm:$0xf]  ;;  %v4505_v11 = vor.u32 %v2826_v47, %v2499_v44 }
 0x174   : > { %v2809_v36 = vld [vmem:[%s3701_s27 + $0x174] sm:$0xf0]  ;;  %v2825_v49 = vld [vmem:[#allocation2 + $0x4] sm:$0xf]  ;;  %v2501_v55 = vld [vmem:[#allocation2 + $0x8] sm:$0xf0]  ;;  %v2716_v30 = vor.u32 %v2878_v62, %v2713_v1  ;;  %v4507_v15 = vor.u32 %v2842_v53, %v2563_v12 }
 0x175   : > { %v2841_v21 = vld [vmem:[#allocation2 + $0x84] sm:$0xf]  ;;  %v2565_v51 = vld [vmem:[#allocation2 + $0x88] sm:$0xf0]  ;;  %v2719_v48 = vld [vmem:[%s3701_s27 + $0xb0] sm:$0xf]  ;;  %v2812_v34 = vor.u32 %v2902_v18, %v2809_v36  ;;  %v4512_v28 = vor.u32 %v2825_v49, %v2501_v55 }
 0x176   : > { %1668 = vmatpush.bf16.msra.mxu0 %v2676_v19  ;;  %2908 = vmatpush.bf16.msra.mxu2 %v2676_v19  ;;  %v2880_v9 = vld [vmem:[%s3701_s27 + $0xb8] sm:$0xf0]  ;;  %v2815_v4 = vld [vmem:[%s3701_s27 + $0x170] sm:$0xf]  ;;  %v2875_v23 = vld [vmem:[%s3701_s27 + $0x94] sm:$0xf]  ;;  %v4514_v60 = vor.u32 %v2841_v21, %v2565_v51 }
 0x177   : > { %1757 = vmatpush.bf16.msra.mxu1 %v2772_v2  ;;  %2916 = vmatpush.bf16.msra.mxu3 %v2772_v2  ;;  %v2904_v8 = vld [vmem:[%s3701_s27 + $0x178] sm:$0xf0]  ;;  %v2701_v42 = vld [vmem:[%s3701_s27 + $0x9c] sm:$0xf0]  ;;  %v2899_v24 = vld [vmem:[%s3701_s27 + $0x154] sm:$0xf]  ;;  %v2720_v35 = vor.u32 %v2880_v9, %v2719_v48 }
 0x178   : > { %v2797_v13 = vld [vmem:[%s3701_s27 + $0x15c] sm:$0xf0]  ;;  %v2816_v10 = vor.u32 %v2904_v8, %v2815_v4  ;;  %v2707_v25 = vld [vmem:[%s3701_s27 + $0x98] sm:$0xf]  ;;  %v2704_v43 = vor.u32 %v2875_v23, %v2701_v42  ;;  %v2877_v31 = vld [vmem:[%s3701_s27 + $0xa0] sm:$0xf0] }
 0x179   : > { %v2800_v0 = vor.u32 %v2899_v24, %v2797_v13  ;;  %v2803_v16 = vld [vmem:[%s3701_s27 + $0x158] sm:$0xf]  ;;  %v2901_v57 = vld [vmem:[%s3701_s27 + $0x160] sm:$0xf0]  ;;  %v2872_v39 = vld [vmem:[%s3701_s27 + $0x7c] sm:$0xf]  ;;  %v2708_v63 = vor.u32 %v2877_v31, %v2707_v25 }
 0x17a   : > { %1669 = vmatpush.bf16.msra.mxu0 %v2664_v41  ;;  %2909 = vmatpush.bf16.msra.mxu2 %v2664_v41  ;;  %v2689_v27 = vld [vmem:[%s3701_s27 + $0x84] sm:$0xf0]  ;;  %v2896_v20 = vld [vmem:[%s3701_s27 + $0x13c] sm:$0xf]  ;;  %v2804_v19 = vor.u32 %v2901_v57, %v2803_v16  ;;  %v2695_v14 = vld [vmem:[%s3701_s27 + $0x80] sm:$0xf] }
 0x17b   : > { %1758 = vmatpush.bf16.msra.mxu1 %v2760_v59  ;;  %2917 = vmatpush.bf16.msra.mxu3 %v2760_v59  ;;  %v2785_v2 = vld [vmem:[%s3701_s27 + $0x144] sm:$0xf0]  ;;  %v2692_v5 = vor.u32 %v2872_v39, %v2689_v27  ;;  %v2874_v32 = vld [vmem:[%s3701_s27 + $0x88] sm:$0xf0]  ;;  %v2791_v41 = vld [vmem:[%s3701_s27 + $0x140] sm:$0xf] }
 0x17c   : > { %v2788_v54 = vor.u32 %v2896_v20, %v2785_v2  ;;  %v2898_v59 = vld [vmem:[%s3701_s27 + $0x148] sm:$0xf0]  ;;  %v2696_v61 = vor.u32 %v2874_v32, %v2695_v14  ;;  %v2828_v3 = vld [vmem:[#allocation2 + $0x14] sm:$0xf0]  ;;  %v2827_v58 = vld [vmem:[#allocation2 + $0x14] sm:$0xf] }
 0x17d   : > { %v2792_v37 = vor.u32 %v2898_v59, %v2791_v41  ;;  %v2507_v7 = vld [vmem:[#allocation2 + $0x10] sm:$0xf]  ;;  %v2509_v22 = vld [vmem:[#allocation2 + $0x18] sm:$0xf0]  ;;  %v2843_v17 = vld [vmem:[#allocation2 + $0x94] sm:$0xf] }
 0x17e   : > { %1670 = vmatpush.bf16.msra.mxu0 %v2652_v38  ;;  %2910 = vmatpush.bf16.msra.mxu2 %v2652_v38  ;;  %v2571_v38 = vld [vmem:[#allocation2 + $0x90] sm:$0xf]  ;;  %v2573_v46 = vld [vmem:[#allocation2 + $0x98] sm:$0xf0]  ;;  %v2869_v56 = vld [vmem:[%s3701_s27 + $0x64] sm:$0xf] }
 0x17f   : > { %1759 = vmatpush.bf16.msra.mxu1 %v2748_v45  ;;  %2918 = vmatpush.bf16.msra.mxu3 %v2748_v45  ;;  %v2844_v45 = vld [vmem:[#allocation2 + $0x94] sm:$0xf0]  ;;  %v4538_v29 = vor.u32 %v2843_v17, %v2573_v46  ;;  %v2677_v40 = vld [vmem:[%s3701_s27 + $0x6c] sm:$0xf0]  ;;  %v2893_v44 = vld [vmem:[%s3701_s27 + $0x124] sm:$0xf] }
 0x180   : > { %v4534_v52 = vor.u32 %v2844_v45, %v2571_v38  ;;  %v2680_v47 = vor.u32 %v2869_v56, %v2677_v40  ;;  %v2773_v12 = vld [vmem:[%s3701_s27 + $0x12c] sm:$0xf0]  ;;  %v2683_v53 = vld [vmem:[%s3701_s27 + $0x68] sm:$0xf]  ;;  %v2871_v62 = vld [vmem:[%s3701_s27 + $0x70] sm:$0xf0] }
 0x181   : > { %v2776_v1 = vor.u32 %v2893_v44, %v2773_v12  ;;  %v2684_v18 = vor.u32 %v2871_v62, %v2683_v53  ;;  %v2779_v36 = vld [vmem:[%s3701_s27 + $0x128] sm:$0xf]  ;;  %v2515_v55 = vld [vmem:[#allocation2 + $0x20] sm:$0xf]  ;;  %v2829_v48 = vld [vmem:[#allocation2 + $0x24] sm:$0xf] }
 0x182   : > { %1671 = vmatpush.bf16.msra.mxu0 %v2640_v26  ;;  %2911 = vmatpush.bf16.msra.mxu2 %v2640_v26  ;;  %v4532_v26 = vor.u32 %v2828_v3, %v2507_v7  ;;  %v2830_v21 = vld [vmem:[#allocation2 + $0x24] sm:$0xf0]  ;;  %v2517_v9 = vld [vmem:[#allocation2 + $0x28] sm:$0xf0]  ;;  %v2665_v13 = vld [vmem:[%s3701_s27 + $0x54] sm:$0xf0] }
 0x183   : > { %1760 = vmatpush.bf16.msra.mxu1 %v2736_v33  ;;  %2919 = vmatpush.bf16.msra.mxu3 %v2736_v33  ;;  %v4536_v33 = vor.u32 %v2827_v58, %v2509_v22  ;;  %v2846_v51 = vld [vmem:[#allocation2 + $0xa4] sm:$0xf0]  ;;  %v4552_v4 = vor.u32 %v2830_v21, %v2515_v55  ;;  %v4556_v23 = vor.u32 %v2829_v48, %v2517_v9  ;;  %v2866_v24 = vld [vmem:[%s3701_s27 + $0x4c] sm:$0xf]  ;;  %v2761_v25 = vld [vmem:[%s3701_s27 + $0x114] sm:$0xf0] }
 0x184   : > { %v2767_v57 = vld [vmem:[%s3701_s27 + $0x110] sm:$0xf]  ;;  %v2892_v39 = vld [vmem:[%s3701_s27 + $0x118] sm:$0xf0]  ;;  %v2848_v2 = vld [vmem:[#allocation2 + $0xb4] sm:$0xf0] }
 0x185   : > { %v2768_v27 = vor.u32 %v2892_v39, %v2767_v57  ;;  %v2523_v20 = vld [vmem:[#allocation2 + $0x30] sm:$0xf]  ;;  %v2831_v14 = vld [vmem:[#allocation2 + $0x34] sm:$0xf]  ;;  %v2589_v32 = vld [vmem:[#allocation2 + $0xb8] sm:$0xf0] }
 0x186   : > { %1672 = vmatpush.bf16.msra.mxu0 %v2628_v6  ;;  %2912 = vmatpush.bf16.msra.mxu2 %v2628_v6  ;;  %v2895_v6 = vld [vmem:[%s3701_s27 + $0x130] sm:$0xf0]  ;;  %v2653_v3 = vld [vmem:[%s3701_s27 + $0x3c] sm:$0xf0]  ;;  %v2659_v22 = vld [vmem:[%s3701_s27 + $0x38] sm:$0xf] }
 0x187   : > { %1761 = vmatpush.bf16.msra.mxu1 %v2724_v50  ;;  %2920 = vmatpush.bf16.msra.mxu3 %v2724_v50  ;;  %v2780_v49 = vor.u32 %v2895_v6, %v2779_v36  ;;  %v2579_v50 = vld [vmem:[#allocation2 + $0xa0] sm:$0xf]  ;;  %v2863_v7 = vld [vmem:[%s3701_s27 + $0x34] sm:$0xf]  ;;  %v2865_v17 = vld [vmem:[%s3701_s27 + $0x40] sm:$0xf0] }
 0x188   : > { %v4554_v8 = vor.u32 %v2846_v51, %v2579_v50  ;;  %v2887_v38 = vld [vmem:[%s3701_s27 + $0xf4] sm:$0xf]  ;;  %v2656_v45 = vor.u32 %v2863_v7, %v2653_v3  ;;  %v2749_v58 = vld [vmem:[%s3701_s27 + $0xfc] sm:$0xf0]  ;;  %v2660_v56 = vor.u32 %v2865_v17, %v2659_v22  ;;  %v2755_v40 = vld [vmem:[%s3701_s27 + $0xf8] sm:$0xf] }
 0x189   : > { %1673 = vmatmul.bf16.vlgmr.msra.gmra.mxu0 %v4505_v11  ;;  %1713 = vmatmul.bf16.vlgmr.msra.gmra.mxu2 %v4507_v15  ;;  %v2752_v46 = vor.u32 %v2887_v38, %v2749_v58  ;;  %v2889_v44 = vld [vmem:[%s3701_s27 + $0x100] sm:$0xf0]  ;;  %v2531_v12 = vld [vmem:[#allocation2 + $0x40] sm:$0xf]  ;;  %v2533_v36 = vld [vmem:[#allocation2 + $0x48] sm:$0xf0] }
 0x18a   : > { %1843 = vmatpush.bf16.msrb.mxu2 %v2716_v30  ;;  %1762 = vmatmul.bf16.vlgmr.msra.gmra.mxu1 %v4512_v28  ;;  %v2845_v30 = vld [vmem:[#allocation2 + $0xa4] sm:$0xf]  ;;  %v2834_v53 = vld [vmem:[#allocation2 + $0x44] sm:$0xf0]  ;;  %v2595_v62 = vld [vmem:[#allocation2 + $0xc0] sm:$0xf] }
 0x18b   : > { %1932 = vmatpush.bf16.msrb.mxu3 %v2812_v34  ;;  %2021 = vmatpush.bf16.msrb.mxu0 %v2720_v35  ;;  %v2581_v34 = vld [vmem:[#allocation2 + $0xa8] sm:$0xf0]  ;;  %v2849_v6 = vld [vmem:[#allocation2 + $0xc4] sm:$0xf]  ;;  %v4592_v55 = vor.u32 %v2834_v53, %v2531_v12  ;;  %v2860_v48 = vld [vmem:[%s3701_s27 + $0x1c] sm:$0xf] }
 0x18c   : > { %1802 = vmatmul.bf16.vlgmr.msra.gmra.mxu3 %v4514_v60  ;;  %2110 = vmatpush.bf16.msrb.mxu1 %v2816_v10  ;;  %v4558_v42 = vor.u32 %v2845_v30, %v2581_v34  ;;  %v2890_v35 = vld [vmem:[%s3701_s27 + $0x10c] sm:$0xf]  ;;  %v2668_v10 = vor.u32 %v2866_v24, %v2665_v13  ;;  %v2641_v9 = vld [vmem:[%s3701_s27 + $0x24] sm:$0xf0]  ;;  %v2884_v30 = vld [vmem:[%s3701_s27 + $0xdc] sm:$0xf] }
 0x18d   : > { %v2764_v31 = vor.u32 %v2890_v35, %v2761_v25  ;;  %v2644_v34 = vor.u32 %v2860_v48, %v2641_v9  ;;  %v2737_v24 = vld [vmem:[%s3701_s27 + $0xe4] sm:$0xf0]  ;;  %v2647_v13 = vld [vmem:[%s3701_s27 + $0x20] sm:$0xf]  ;;  %v2862_v35 = vld [vmem:[%s3701_s27 + $0x28] sm:$0xf0] }
 0x18e   : > { %1844 = vmatpush.bf16.msrb.mxu2 %v2704_v43  ;;  %v2671_v43 = vld [vmem:[%s3701_s27 + $0x50] sm:$0xf]  ;;  %v2648_v25 = vor.u32 %v2862_v35, %v2647_v13  ;;  %v2836_v57 = vld [vmem:[#allocation2 + $0x54] sm:$0xf0]  ;;  %v2857_v7 = vld [vmem:[%s3701_s27 + $0x4] sm:$0xf] }
 0x18f   : > { %1933 = vmatpush.bf16.msrb.mxu3 %v2800_v0  ;;  %2022 = vmatpush.bf16.msrb.mxu0 %v2708_v63  ;;  %v2868_v0 = vld [vmem:[%s3701_s27 + $0x58] sm:$0xf0]  ;;  %v2832_v63 = vld [vmem:[#allocation2 + $0x34] sm:$0xf0]  ;;  %v2603_v39 = vld [vmem:[#allocation2 + $0xd0] sm:$0xf] }
 0x190   : > { %2111 = vmatpush.bf16.msrb.mxu1 %v2804_v19  ;;  %v2672_v16 = vor.u32 %v2868_v0, %v2671_v43  ;;  %v2587_v19 = vld [vmem:[#allocation2 + $0xb0] sm:$0xf]  ;;  %v4572_v41 = vor.u32 %v2832_v63, %v2523_v20  ;;  %v2743_v43 = vld [vmem:[%s3701_s27 + $0xe0] sm:$0xf]  ;;  %v2835_v20 = vld [vmem:[#allocation2 + $0x54] sm:$0xf] }
 0x191   : > { %v4574_v59 = vor.u32 %v2848_v2, %v2587_v19  ;;  %v2886_v0 = vld [vmem:[%s3701_s27 + $0xe8] sm:$0xf0]  ;;  %v2541_v63 = vld [vmem:[#allocation2 + $0x58] sm:$0xf0]  ;;  %v2851_v19 = vld [vmem:[#allocation2 + $0xd4] sm:$0xf] }
 0x192   : > { %1845 = vmatpush.bf16.msrb.mxu2 %v2692_v5  ;;  %v2525_v5 = vld [vmem:[#allocation2 + $0x38] sm:$0xf0]  ;;  %v2629_v3 = vld [vmem:[%s3701_s27 + $0xc] sm:$0xf0]  ;;  %v2881_v38 = vld [vmem:[%s3701_s27 + $0xc4] sm:$0xf] }
 0x193   : > { %1934 = vmatpush.bf16.msrb.mxu3 %v2788_v54  ;;  %2023 = vmatpush.bf16.msrb.mxu0 %v2696_v61  ;;  %v2847_v54 = vld [vmem:[#allocation2 + $0xb4] sm:$0xf]  ;;  %v4576_v61 = vor.u32 %v2831_v14, %v2525_v5  ;;  %v2605_v2 = vld [vmem:[#allocation2 + $0xd8] sm:$0xf0]  ;;  %v2635_v22 = vld [vmem:[%s3701_s27 + $0x8] sm:$0xf] }
 0x194   : > { %2112 = vmatpush.bf16.msrb.mxu1 %v2792_v37  ;;  %v4578_v37 = vor.u32 %v2847_v54, %v2589_v32  ;;  %v4616_v54 = vor.u32 %v2835_v20, %v2541_v63  ;;  %v4618_v32 = vor.u32 %v2851_v19, %v2605_v2  ;;  %v2725_v58 = vld [vmem:[%s3701_s27 + $0xcc] sm:$0xf0]  ;;  %v2859_v17 = vld [vmem:[%s3701_s27 + $0x10] sm:$0xf0]  ;;  %v2547_v12 = vld [vmem:[#allocation2 + $0x60] sm:$0xf] }
 0x195   : > { %v2838_v53 = vld [vmem:[#allocation2 + $0x64] sm:$0xf0]  ;;  %v2840_v13 = vld [vmem:[#allocation2 + $0x74] sm:$0xf0]  ;;  %v2619_v35 = vld [vmem:[#allocation2 + $0xf0] sm:$0xf] }
 0x196   : > { %1846 = vmatpush.bf16.msrb.mxu2 %v2680_v47  ;;  %v2756_v47 = vor.u32 %v2889_v44, %v2755_v40  ;;  %v2731_v40 = vld [vmem:[%s3701_s27 + $0xc8] sm:$0xf]  ;;  %v2883_v44 = vld [vmem:[%s3701_s27 + $0xd0] sm:$0xf0]  ;;  %v4632_v48 = vor.u32 %v2838_v53, %v2547_v12  ;;  %v4658_v20 = vld [vmem:[%s287_s24] sm:$0x7] }
 0x197   : > { %1935 = vmatpush.bf16.msrb.mxu3 %v2776_v1  ;;  %2024 = vmatpush.bf16.msrb.mxu0 %v2684_v18  ;;  %v2850_v1 = vld [vmem:[#allocation2 + $0xc4] sm:$0xf0]  ;;  %v2833_v18 = vld [vmem:[#allocation2 + $0x44] sm:$0xf]  ;;  %v4661_v63 = vperm.slane %v4658_v20, 0  ;;  %s5102_s26 = sld [smem:[#allocation15_spill]] }
 0x198   : > { %2113 = vmatpush.bf16.msrb.mxu1 %v2780_v49  ;;  %v2597_v49 = vld [vmem:[#allocation2 + $0xc8] sm:$0xf0]  ;;  %v4594_v21 = vor.u32 %v2850_v1, %v2595_v62  ;;  %v4596_v50 = vor.u32 %v2833_v18, %v2533_v36  ;;  %v2611_v62 = vld [vmem:[#allocation2 + $0xe0] sm:$0xf]  ;;  %v2854_v1 = vld [vmem:[#allocation2 + $0xe4] sm:$0xf0] }
 0x199   : > { %1678 = vmatmul.bf16.gmra.mxu0 %v4532_v26  ;;  %1718 = vmatmul.bf16.gmra.mxu2 %v4534_v52  ;;  %v4598_v51 = vor.u32 %v2849_v6, %v2597_v49  ;;  %v2837_v18 = vld [vmem:[#allocation2 + $0x64] sm:$0xf]  ;;  %v2549_v36 = vld [vmem:[#allocation2 + $0x68] sm:$0xf0]  ;;  %v4634_v9 = vor.u32 %v2854_v1, %v2611_v62  ;;  %s5103_s0 = sld [smem:[#allocation16_spill]]  ;;  %s2343_s30 = sshll.u32 %s3713_s6, 4  ;;  %s2344_s30 = int_to_ptr.vmem [resolvable:$true] %s2343_s30 }
 0x19a   : > { %1767 = vmatmul.bf16.gmra.mxu1 %v4536_v33  ;;  %1847 = vmatpush.bf16.msrb.mxu2 %v2668_v10  ;;  %v2740_v10 = vor.u32 %v2884_v30, %v2737_v24  ;;  %v2853_v6 = vld [vmem:[#allocation2 + $0xe4] sm:$0xf]  ;;  %v2613_v49 = vld [vmem:[#allocation2 + $0xe8] sm:$0xf0]  ;;  %v4636_v30 = vor.u32 %v2837_v18, %v2549_v36  ;;  %v2555_v24 = vld [vmem:[#allocation2 + $0x70] sm:$0xf] }
 0x19b   : > { %1936 = vmatpush.bf16.msrb.mxu3 %v2764_v31  ;;  %2025 = vmatpush.bf16.msrb.mxu0 %v2672_v16  ;;  %v2744_v31 = vor.u32 %v2886_v0, %v2743_v43  ;;  %v2539_v16 = vld [vmem:[#allocation2 + $0x50] sm:$0xf]  ;;  %v2557_v43 = vld [vmem:[#allocation2 + $0x78] sm:$0xf0]  ;;  %v2855_v0 = vld [vmem:[#allocation2 + $0xf4] sm:$0xf] }
 0x19c   : > { %1807 = vmatmul.bf16.gmra.mxu3 %v4538_v29  ;;  %2114 = vmatpush.bf16.msrb.mxu1 %v2768_v27  ;;  %v2852_v27 = vld [vmem:[#allocation2 + $0xd4] sm:$0xf0]  ;;  %v4612_v14 = vor.u32 %v2836_v57, %v2539_v16  ;;  %v4644_v16 = vor.u32 %v2840_v13, %v2555_v24  ;;  %s5104_s10 = sld [smem:[#allocation29_spill]]  ;;  %s2328_s2 = scalar_lea.sflag [#allocation5], %s320_s5 }
 0x19d   : > { %v4614_v5 = vor.u32 %v2852_v27, %v2603_v39  ;;  %s2336_s7 = smul.u32 3, %s5102_s26 }
 0x19e   : > { %1848 = vmatpush.bf16.msrb.mxu2 %v2656_v45  ;;  %v2632_v45 = vor.u32 %v2857_v7, %v2629_v3 }
 0x19f   : > { %1937 = vmatpush.bf16.msrb.mxu3 %v2752_v46  ;;  %2026 = vmatpush.bf16.msrb.mxu0 %v2660_v56  ;;  %v2728_v46 = vor.u32 %v2881_v38, %v2725_v58  ;;  %v2636_v56 = vor.u32 %v2859_v17, %v2635_v22  ;;  %s2926_s4 = smul.u32 192, %s5103_s0 }
 0x1a0   : > { %2115 = vmatpush.bf16.msrb.mxu1 %v2756_v47  ;;  %v2732_v47 = vor.u32 %v2883_v44, %v2731_v40 }
 0x1a1   : > { %s2340_s25 = sadd.s32 %s2926_s4, %s2336_s7 }
 0x1a2   : > { %1849 = vmatpush.bf16.msrb.mxu2 %v2644_v34  ;;  %v4638_v34 = vor.u32 %v2853_v6, %v2613_v49  ;;  %s2819_s29 = sshll.u32 %s2340_s25, 2  ;;  %s3319_s13 = scalar_lea.hbm %s5104_s10, 1536 }
 0x1a3   : > { %1938 = vmatpush.bf16.msrb.mxu3 %v2740_v10  ;;  %2027 = vmatpush.bf16.msrb.mxu0 %v2648_v25  ;;  %v2856_v10 = vld [vmem:[#allocation2 + $0xf4] sm:$0xf0]  ;;  %v2839_v25 = vld [vmem:[#allocation2 + $0x74] sm:$0xf]  ;;  %s2342_s3 = scalar_lea.hbm %s5104_s10, %s2819_s29 }
 0x1a4   : > { %2116 = vmatpush.bf16.msrb.mxu1 %v2744_v31  ;;  %v2621_v31 = vld [vmem:[#allocation2 + $0xf8] sm:$0xf0]  ;;  %v4646_v57 = vor.u32 %v2856_v10, %v2619_v35  ;;  %v4648_v39 = vor.u32 %v2839_v25, %v2557_v43  ;;  %s2345_s1 = sshll.u32 %s2342_s3, 4  ;;  %s2346_s1 = int_to_ptr.hbm [resolvable:$true] %s2345_s1 }
 0x1a5   : > { %v4650_v27 = vor.u32 %v2855_v0, %v2621_v31  ;;  %s3313_s27 = sshra.s32 %s2346_s1, 4  ;;  %s3314_s27 = int_to_ptr.hbm [resolvable:$true] %s3313_s27 }
 0x1a6   : > { %1850 = vmatpush.bf16.msrb.mxu2 %v2632_v45  ;;  %s3315_s14 = scalar_lea.hbm %s3314_s27, 384  ;;  %p3320_p5 = scmp.lt.s32.totalorder %s3314_s27, %s5104_s10 }
 0x1a7   : > { %1939 = vmatpush.bf16.msrb.mxu3 %v2728_v46  ;;  %2028 = vmatpush.bf16.msrb.mxu0 %v2636_v56  ;;  %p3316_p0 = scmp.ne.s32.totalorder %s3314_s27, %s3315_s14  ;;  %p3321_p7 = scmp.lt.s32.totalorder %s3319_s13, %s3315_s14 }
 0x1a8   : > { %2117 = vmatpush.bf16.msrb.mxu1 %v2732_v47 }
 0x1a9   : > { %1683 = vmatmul.bf16.gmra.mxu0 %v4552_v4  ;;  %1723 = vmatmul.bf16.gmra.mxu2 %v4554_v8  ;;  %p3317_p2 = pnand %p3316_p0, %p3654_p6  ;;  %p3322_p8 = por %p3321_p7, %p3320_p5 }
 0x1aa   : > { %1772 = vmatmul.bf16.gmra.mxu1 %v4556_v23 }
 0x1ab   : > { %p3318_p4 = pneg %p3317_p2 }
 0x1ac   : > { %1812 = vmatmul.bf16.gmra.mxu3 %v4558_v42 }
 0x1ad   : > { %p3323_p10 = pnand %p3322_p8, %p3318_p4 }
 0x1b9   : > { %1688 = vmatmul.bf16.gmra.mxu0 %v4572_v41  ;;  %1728 = vmatmul.bf16.gmra.mxu2 %v4574_v59 }
 0x1ba   : > { %1777 = vmatmul.bf16.gmra.mxu1 %v4576_v61 }
 0x1bc   : > { %1817 = vmatmul.bf16.gmra.mxu3 %v4578_v37 }
 0x1c9   : > { %1693 = vmatmul.bf16.gmra.mxu0 %v4592_v55  ;;  %1733 = vmatmul.bf16.gmra.mxu2 %v4594_v21 }
 0x1ca   : > { %1782 = vmatmul.bf16.gmra.mxu1 %v4596_v50 }
 0x1cc   : > { %1822 = vmatmul.bf16.gmra.mxu3 %v4598_v51 }
 0x1d9   : > { %1698 = vmatmul.bf16.gmra.mxu0 %v4612_v14  ;;  %1738 = vmatmul.bf16.gmra.mxu2 %v4614_v5 }
 0x1da   : > { %1787 = vmatmul.bf16.gmra.mxu1 %v4616_v54 }
 0x1dc   : > { %1827 = vmatmul.bf16.gmra.mxu3 %v4618_v32 }
 0x1e9   : > { %1703 = vmatmul.bf16.gmra.mxu0 %v4632_v48  ;;  %1743 = vmatmul.bf16.gmra.mxu2 %v4634_v9 }
 0x1ea   : > { %1792 = vmatmul.bf16.gmra.mxu1 %v4636_v30 }
 0x1ec   : > { %1832 = vmatmul.bf16.gmra.mxu3 %v4638_v34 }
 0x1f9   : > { %1708 = vmatmul.bf16.gmra.mxu0 %v4644_v16  ;;  %1748 = vmatmul.bf16.gmra.mxu2 %v4646_v57 }
 0x1fa   : > { %1797 = vmatmul.bf16.gmra.mxu1 %v4648_v39 }
 0x1fc   : > { %1837 = vmatmul.bf16.gmra.mxu3 %v4650_v27 }
 0x206   : > { %v1674_v19 = vpop.f32.mrf.mxu0 }
 0x207   : > { %v1675_v2 = vadd.f32 %v1674_v19, %v4661_v63  ;;  %v1763_v7 = vpop.f32.mrf.mxu1 }
 0x209   : > { %v4664_v3 = vadd.f32 %v1763_v7, %v1675_v2  ;;  %1851 = vmatmul.bf16.vlgmr.msrb.gmra.mxu2 %v4505_v11  ;;  %2029 = vmatmul.bf16.vlgmr.msrb.gmra.mxu0 %v4505_v11 }
 0x20a   : > { %2118 = vmatmul.bf16.vlgmr.msrb.gmra.mxu1 %v4512_v28 }
 0x20c   : > { %1940 = vmatmul.bf16.vlgmr.msrb.gmra.mxu3 %v4512_v28  ;;  %v1714_v38 = vpop.f32.mrf.mxu2 }
 0x20d   : > { %v1715_v45 = vadd.f32 %v1714_v38, %v4661_v63 }
 0x20e   : > { %v1676_v22 = vpop.f32.mrf.mxu0 }
 0x20f   : > { %v1803_v58 = vpop.f32.mrf.mxu3  ;;  %v1677_v46 = vadd.f32 %v1676_v22, %v4661_v63  ;;  %v1765_v56 = vpop.f32.mrf.mxu1 }
 0x210   : > { %v4671_v17 = vadd.f32 %v1803_v58, %v1715_v45 }
 0x211   : > { %v4674_v40 = vadd.f32 %v1765_v56, %v1677_v46 }
 0x214   : > { %v1716_v44 = vpop.f32.mrf.mxu2 }
 0x215   : > { %v1717_v47 = vadd.f32 %v1716_v44, %v4661_v63 }
 0x216   : > { %v1679_v12 = vpop.f32.mrf.mxu0 }
 0x217   : > { %v1805_v11 = vpop.f32.mrf.mxu3  ;;  %v1680_v28 = vadd.f32 %v1679_v12, %v4661_v63  ;;  %v1768_v62 = vpop.f32.mrf.mxu1 }
 0x218   : > { %v4677_v53 = vadd.f32 %v1805_v11, %v1717_v47 }
 0x219   : > { %v4680_v1 = vadd.f32 %v1768_v62, %v1680_v28  ;;  %1856 = vmatmul.bf16.gmra.mxu2 %v4532_v26  ;;  %2034 = vmatmul.bf16.gmra.mxu0 %v4532_v26 }
 0x21a   : > { %2123 = vmatmul.bf16.gmra.mxu1 %v4536_v33 }
 0x21c   : > { %1945 = vmatmul.bf16.gmra.mxu3 %v4536_v33  ;;  %v1719_v18 = vpop.f32.mrf.mxu2 }
 0x21d   : > { %v1720_v36 = vadd.f32 %v1719_v18, %v4661_v63 }
 0x21e   : > { %v1681_v49 = vpop.f32.mrf.mxu0 }
 0x21f   : > { %v1808_v6 = vpop.f32.mrf.mxu3  ;;  %v1682_v13 = vadd.f32 %v1681_v49, %v4661_v63  ;;  %v1770_v35 = vpop.f32.mrf.mxu1 }
 0x220   : > { %v4687_v24 = vadd.f32 %v1808_v6, %v1720_v36 }
 0x221   : > { %v4690_v10 = vadd.f32 %v1770_v35, %v1682_v13 }
 0x224   : > { %v1721_v25 = vpop.f32.mrf.mxu2 }
 0x225   : > { %v1722_v43 = vadd.f32 %v1721_v25, %v4661_v63 }
 0x226   : > { %v1684_v0 = vpop.f32.mrf.mxu0 }
 0x227   : > { %v1810_v26 = vpop.f32.mrf.mxu3  ;;  %v1685_v33 = vadd.f32 %v1684_v0, %v4661_v63  ;;  %v1773_v19 = vpop.f32.mrf.mxu1 }
 0x228   : > { %v4693_v31 = vadd.f32 %v1810_v26, %v1722_v43 }
 0x229   : > { %v4696_v2 = vadd.f32 %v1773_v19, %v1685_v33  ;;  %1861 = vmatmul.bf16.gmra.mxu2 %v4552_v4  ;;  %2039 = vmatmul.bf16.gmra.mxu0 %v4552_v4 }
 0x22a   : > { %2128 = vmatmul.bf16.gmra.mxu1 %v4556_v23 }
 0x22c   : > { %1950 = vmatmul.bf16.gmra.mxu3 %v4556_v23  ;;  %v1724_v7 = vpop.f32.mrf.mxu2 }
 0x22d   : > { %v1725_v38 = vadd.f32 %v1724_v7, %v4661_v63 }
 0x22e   : > { %v1686_v58 = vpop.f32.mrf.mxu0 }
 0x22f   : > { %v1813_v45 = vpop.f32.mrf.mxu3  ;;  %v1687_v46 = vadd.f32 %v1686_v58, %v4661_v63  ;;  %v1775_v56 = vpop.f32.mrf.mxu1 }
 0x230   : > { %v4703_v22 = vadd.f32 %v1813_v45, %v1725_v38 }
 0x231   : > { %v4706_v44 = vadd.f32 %v1775_v56, %v1687_v46 }
 0x234   : > { %v1726_v47 = vpop.f32.mrf.mxu2 }
 0x235   : > { %v1727_v11 = vadd.f32 %v1726_v47, %v4661_v63 }
 0x236   : > { %v1689_v12 = vpop.f32.mrf.mxu0 }
 0x237   : > { %v1815_v4 = vpop.f32.mrf.mxu3  ;;  %v1690_v23 = vadd.f32 %v1689_v12, %v4661_v63  ;;  %v1778_v62 = vpop.f32.mrf.mxu1 }
 0x238   : > { %v4709_v28 = vadd.f32 %v1815_v4, %v1727_v11 }
 0x239   : > { %v4712_v18 = vadd.f32 %v1778_v62, %v1690_v23  ;;  %1866 = vmatmul.bf16.gmra.mxu2 %v4572_v41  ;;  %2044 = vmatmul.bf16.gmra.mxu0 %v4572_v41 }
 0x23a   : > { %2133 = vmatmul.bf16.gmra.mxu1 %v4576_v61 }
 0x23c   : > { %1955 = vmatmul.bf16.gmra.mxu3 %v4576_v61  ;;  %v1729_v36 = vpop.f32.mrf.mxu2 }
 0x23d   : > { %v1730_v6 = vadd.f32 %v1729_v36, %v4661_v63 }
 0x23e   : > { %v1691_v13 = vpop.f32.mrf.mxu0 }
 0x23f   : > { %v1818_v49 = vpop.f32.mrf.mxu3  ;;  %v1692_v25 = vadd.f32 %v1691_v13, %v4661_v63  ;;  %v1780_v43 = vpop.f32.mrf.mxu1 }
 0x240   : > { %v4719_v35 = vadd.f32 %v1818_v49, %v1730_v6 }
 0x241   : > { %v4722_v26 = vadd.f32 %v1780_v43, %v1692_v25 }
 0x244   : > { %v1731_v0 = vpop.f32.mrf.mxu2 }
 0x245   : > { %v1732_v33 = vadd.f32 %v1731_v0, %v4661_v63 }
 0x246   : > { %v1694_v19 = vpop.f32.mrf.mxu0 }
 0x247   : > { %v1820_v41 = vpop.f32.mrf.mxu3  ;;  %v1695_v61 = vadd.f32 %v1694_v19, %v4661_v63  ;;  %v1783_v38 = vpop.f32.mrf.mxu1 }
 0x248   : > { %v4725_v7 = vadd.f32 %v1820_v41, %v1732_v33 }
 0x249   : > { %v4728_v45 = vadd.f32 %v1783_v38, %v1695_v61  ;;  %1871 = vmatmul.bf16.gmra.mxu2 %v4592_v55  ;;  %2049 = vmatmul.bf16.gmra.mxu0 %v4592_v55 }
 0x24a   : > { %2138 = vmatmul.bf16.gmra.mxu1 %v4596_v50 }
 0x24c   : > { %1960 = vmatmul.bf16.gmra.mxu3 %v4596_v50  ;;  %v1734_v58 = vpop.f32.mrf.mxu2 }
 0x24d   : > { %v1735_v46 = vadd.f32 %v1734_v58, %v4661_v63 }
 0x24e   : > { %v1696_v47 = vpop.f32.mrf.mxu0 }
 0x24f   : > { %v1823_v56 = vpop.f32.mrf.mxu3  ;;  %v1697_v4 = vadd.f32 %v1696_v47, %v4661_v63  ;;  %v1785_v12 = vpop.f32.mrf.mxu1 }
 0x250   : > { %v4735_v11 = vadd.f32 %v1823_v56, %v1735_v46 }
 0x251   : > { %v4738_v23 = vadd.f32 %v1785_v12, %v1697_v4 }
 0x254   : > { %v1736_v62 = vpop.f32.mrf.mxu2 }
 0x255   : > { %v1737_v36 = vadd.f32 %v1736_v62, %v4661_v63 }
 0x256   : > { %v1699_v6 = vpop.f32.mrf.mxu0 }
 0x257   : > { %v1825_v55 = vpop.f32.mrf.mxu3  ;;  %v1700_v50 = vadd.f32 %v1699_v6, %v4661_v63  ;;  %v1788_v13 = vpop.f32.mrf.mxu1 }
 0x258   : > { %v4741_v49 = vadd.f32 %v1825_v55, %v1737_v36 }
 0x259   : > { %v4744_v25 = vadd.f32 %v1788_v13, %v1700_v50  ;;  %1876 = vmatmul.bf16.gmra.mxu2 %v4612_v14  ;;  %2054 = vmatmul.bf16.gmra.mxu0 %v4612_v14 }
 0x25a   : > { %2143 = vmatmul.bf16.gmra.mxu1 %v4616_v54 }
 0x25c   : > { %1965 = vmatmul.bf16.gmra.mxu3 %v4616_v54  ;;  %v1739_v43 = vpop.f32.mrf.mxu2 }
 0x25d   : > { %v1740_v0 = vadd.f32 %v1739_v43, %v4661_v63 }
 0x25e   : > { %v1701_v41 = vpop.f32.mrf.mxu0 }
 0x25f   : > { %v1828_v33 = vpop.f32.mrf.mxu3  ;;  %v1702_v61 = vadd.f32 %v1701_v41, %v4661_v63  ;;  %v1790_v38 = vpop.f32.mrf.mxu1 }
 0x260   : > { %v4751_v19 = vadd.f32 %v1828_v33, %v1740_v0 }
 0x261   : > { %v4754_v58 = vadd.f32 %v1790_v38, %v1702_v61 }
 0x264   : > { %v1741_v46 = vpop.f32.mrf.mxu2 }
 0x265   : > { %v1742_v56 = vadd.f32 %v1741_v46, %v4661_v63 }
 0x266   : > { %v1704_v47 = vpop.f32.mrf.mxu0 }
 0x267   : > { %v1830_v14 = vpop.f32.mrf.mxu3  ;;  %v1705_v54 = vadd.f32 %v1704_v47, %v4661_v63  ;;  %v1793_v12 = vpop.f32.mrf.mxu1 }
 0x268   : > { %v4757_v4 = vadd.f32 %v1830_v14, %v1742_v56 }
 0x269   : > { %v4760_v62 = vadd.f32 %v1793_v12, %v1705_v54  ;;  %1881 = vmatmul.bf16.gmra.mxu2 %v4632_v48  ;;  %2059 = vmatmul.bf16.gmra.mxu0 %v4632_v48 }
 0x26a   : > { %2148 = vmatmul.bf16.gmra.mxu1 %v4636_v30 }
 0x26c   : > { %1970 = vmatmul.bf16.gmra.mxu3 %v4636_v30  ;;  %v1744_v36 = vpop.f32.mrf.mxu2 }
 0x26d   : > { %v1745_v55 = vadd.f32 %v1744_v36, %v4661_v63 }
 0x26e   : > { %v1706_v50 = vpop.f32.mrf.mxu0 }
 0x26f   : > { %v1833_v6 = vpop.f32.mrf.mxu3  ;;  %v1707_v43 = vadd.f32 %v1706_v50, %v4661_v63  ;;  %v1795_v0 = vpop.f32.mrf.mxu1 }
 0x270   : > { %v4767_v13 = vadd.f32 %v1833_v6, %v1745_v55 }
 0x271   : > { %v4770_v33 = vadd.f32 %v1795_v0, %v1707_v43  ;;  %v4789_v0 = vperm.slane %v4658_v20, 2 }
 0x274   : > { %v1746_v41 = vpop.f32.mrf.mxu2 }
 0x275   : > { %v1747_v61 = vadd.f32 %v1746_v41, %v4661_v63 }
 0x276   : > { %v1709_v38 = vpop.f32.mrf.mxu0 }
 0x277   : > { %v1835_v48 = vpop.f32.mrf.mxu3  ;;  %v1710_v30 = vadd.f32 %v1709_v38, %v4661_v63  ;;  %v1798_v56 = vpop.f32.mrf.mxu1 }
 0x278   : > { %v4773_v46 = vadd.f32 %v1835_v48, %v1747_v61 }
 0x279   : > { %v4776_v14 = vadd.f32 %v1798_v56, %v1710_v30  ;;  %1886 = vmatmul.bf16.gmra.mxu2 %v4644_v16  ;;  %2064 = vmatmul.bf16.gmra.mxu0 %v4644_v16 }
 0x27a   : > { %2153 = vmatmul.bf16.gmra.mxu1 %v4648_v39 }
 0x27c   : > { %1975 = vmatmul.bf16.gmra.mxu3 %v4648_v39  ;;  %v1749_v47 = vpop.f32.mrf.mxu2 }
 0x27d   : > { %v1750_v54 = vadd.f32 %v1749_v47, %v4661_v63  ;;  %v4798_v47 = vperm.slane %v4658_v20, 1 }
 0x27e   : > { %v1711_v36 = vpop.f32.mrf.mxu0 }
 0x27f   : > { %v1838_v12 = vpop.f32.mrf.mxu3  ;;  %v1712_v6 = vadd.f32 %v1711_v36, %v4661_v63  ;;  %v1800_v50 = vpop.f32.mrf.mxu1 }
 0x280   : > { %v4783_v55 = vadd.f32 %v1838_v12, %v1750_v54 }
 0x281   : > { %v4786_v43 = vadd.f32 %v1800_v50, %v1712_v6 }
 0x284   : > { %v1751_v16 = vpop.f32.mrf.mxu2 }
 0x285   : > { %v1752_v41 = vadd.f32 %v1751_v16, %v4661_v63 }
 0x286   : > { %v2030_v61 = vpop.f32.mrf.mxu0 }
 0x287   : > { %v1840_v39 = vpop.f32.mrf.mxu3  ;;  %v2031_v38 = vadd.f32 %v2030_v61, %v4789_v0  ;;  %v2119_v30 = vpop.f32.mrf.mxu1 }
 0x288   : > { %v4792_v48 = vadd.f32 %v1840_v39, %v1752_v41 }
 0x289   : > { %v2120_v56 = vadd.f32 %v2119_v30, %v2031_v38  ;;  %1891 = vmatmul.bf16.gmra.mxu2 %v4507_v15  ;;  %2069 = vmatmul.bf16.gmra.mxu0 %v4507_v15 }
 0x28a   : > { %2158 = vmatmul.bf16.gmra.mxu1 %v4514_v60 }
 0x28b   : > { %v2200_v63 = vpack.c.bf16 %v2120_v56, %v2120_v56 }
 0x28c   : > { %1980 = vmatmul.bf16.gmra.mxu3 %v4514_v60  ;;  %v1852_v54 = vpop.f32.mrf.mxu2 }
 0x28d   : > { %2264 = vst [vmem:[%s3713_s6 + $0x8] sm:$0xf] %v2200_v63  ;;  %v1853_v12 = vadd.f32 %v1852_v54, %v4798_v47 }
 0x28e   : > { %v2032_v6 = vpop.f32.mrf.mxu0 }
 0x28f   : > { %v1941_v36 = vpop.f32.mrf.mxu3  ;;  %v2033_v16 = vadd.f32 %v2032_v6, %v4789_v0  ;;  %v2121_v41 = vpop.f32.mrf.mxu1 }
 0x290   : > { %v1942_v50 = vadd.f32 %v1941_v36, %v1853_v12 }
 0x291   : > { %v2122_v20 = vadd.f32 %v2121_v41, %v2033_v16 }
 0x292   : > { %v2199_v15 = vpack.c.bf16 %v1942_v50, %v4664_v3 }
 0x293   : > { %v2202_v39 = vpack.c.bf16 %v2122_v20, %v2122_v20 }
 0x294   : > { %2263 = vst [vmem:[%s3713_s6] sm:$0xff] %v2199_v15  ;;  %v1854_v61 = vpop.f32.mrf.mxu2 }
 0x295   : > { %2266 = vst [vmem:[%s3713_s6 + $0x14] sm:$0xf] %v2202_v39  ;;  %v1855_v60 = vadd.f32 %v1854_v61, %v4798_v47 }
 0x296   : > { %v2035_v30 = vpop.f32.mrf.mxu0 }
 0x297   : > { %v1943_v38 = vpop.f32.mrf.mxu3  ;;  %v2036_v63 = vadd.f32 %v2035_v30, %v4789_v0  ;;  %v2124_v54 = vpop.f32.mrf.mxu1 }
 0x298   : > { %v1944_v56 = vadd.f32 %v1943_v38, %v1855_v60 }
 0x299   : > { %v2125_v36 = vadd.f32 %v2124_v54, %v2036_v63  ;;  %1896 = vmatmul.bf16.gmra.mxu2 %v4534_v52  ;;  %2074 = vmatmul.bf16.gmra.mxu0 %v4534_v52 }
 0x29a   : > { %v2201_v12 = vpack.c.bf16 %v1944_v56, %v4674_v40  ;;  %2163 = vmatmul.bf16.gmra.mxu1 %v4538_v29 }
 0x29b   : > { %v2204_v3 = vpack.c.bf16 %v2125_v36, %v2125_v36 }
 0x29c   : > { %1985 = vmatmul.bf16.gmra.mxu3 %v4538_v29  ;;  %2265 = vst [vmem:[%s3713_s6 + $0xc] sm:$0xff] %v2201_v12  ;;  %v1857_v6 = vpop.f32.mrf.mxu2 }
 0x29d   : > { %2268 = vst [vmem:[%s3713_s6 + $0x20] sm:$0xf] %v2204_v3  ;;  %v1858_v50 = vadd.f32 %v1857_v6, %v4798_v47 }
 0x29e   : > { %v2037_v41 = vpop.f32.mrf.mxu0 }
 0x29f   : > { %v1946_v16 = vpop.f32.mrf.mxu3  ;;  %v2038_v15 = vadd.f32 %v2037_v41, %v4789_v0  ;;  %v2126_v20 = vpop.f32.mrf.mxu1 }
 0x2a0   : > { %v1947_v40 = vadd.f32 %v1946_v16, %v1858_v50 }
 0x2a1   : > { %v2127_v52 = vadd.f32 %v2126_v20, %v2038_v15 }
 0x2a2   : > { %v2203_v39 = vpack.c.bf16 %v1947_v40, %v4680_v1 }
 0x2a3   : > { %v2206_v61 = vpack.c.bf16 %v2127_v52, %v2127_v52 }
 0x2a4   : > { %2267 = vst [vmem:[%s3713_s6 + $0x18] sm:$0xff] %v2203_v39  ;;  %v1859_v29 = vpop.f32.mrf.mxu2 }
 0x2a5   : > { %2270 = vst [vmem:[%s3713_s6 + $0x2c] sm:$0xf] %v2206_v61  ;;  %v1860_v60 = vadd.f32 %v1859_v29, %v4798_v47 }
 0x2a6   : > { %v2040_v30 = vpop.f32.mrf.mxu0 }
 0x2a7   : > { %v1948_v38 = vpop.f32.mrf.mxu3  ;;  %v2041_v63 = vadd.f32 %v2040_v30, %v4789_v0  ;;  %v2129_v54 = vpop.f32.mrf.mxu1 }
 0x2a8   : > { %v1949_v56 = vadd.f32 %v1948_v38, %v1860_v60 }
 0x2a9   : > { %v2130_v36 = vadd.f32 %v2129_v54, %v2041_v63  ;;  %1901 = vmatmul.bf16.gmra.mxu2 %v4554_v8  ;;  %2079 = vmatmul.bf16.gmra.mxu0 %v4554_v8 }
 0x2aa   : > { %v2205_v12 = vpack.c.bf16 %v1949_v56, %v4690_v10  ;;  %2168 = vmatmul.bf16.gmra.mxu1 %v4558_v42 }
 0x2ab   : > { %v2208_v1 = vpack.c.bf16 %v2130_v36, %v2130_v36 }
 0x2ac   : > { %1990 = vmatmul.bf16.gmra.mxu3 %v4558_v42  ;;  %2269 = vst [vmem:[%s3713_s6 + $0x24] sm:$0xff] %v2205_v12  ;;  %v1862_v3 = vpop.f32.mrf.mxu2 }
 0x2ad   : > { %2272 = vst [vmem:[%s3713_s6 + $0x38] sm:$0xf] %v2208_v1  ;;  %v1863_v6 = vadd.f32 %v1862_v3, %v4798_v47 }
 0x2ae   : > { %v2042_v16 = vpop.f32.mrf.mxu0 }
 0x2af   : > { %v1951_v50 = vpop.f32.mrf.mxu3  ;;  %v2043_v41 = vadd.f32 %v2042_v16, %v4789_v0  ;;  %v2131_v40 = vpop.f32.mrf.mxu1 }
 0x2b0   : > { %v1952_v10 = vadd.f32 %v1951_v50, %v1863_v6 }
 0x2b1   : > { %v2132_v8 = vadd.f32 %v2131_v40, %v2043_v41 }
 0x2b2   : > { %v2207_v15 = vpack.c.bf16 %v1952_v10, %v4696_v2 }
 0x2b3   : > { %v2210_v20 = vpack.c.bf16 %v2132_v8, %v2132_v8 }
 0x2b4   : > { %2271 = vst [vmem:[%s3713_s6 + $0x30] sm:$0xff] %v2207_v15  ;;  %v1864_v42 = vpop.f32.mrf.mxu2 }
 0x2b5   : > { %2274 = vst [vmem:[%s3713_s6 + $0x44] sm:$0xf] %v2210_v20  ;;  %v1865_v39 = vadd.f32 %v1864_v42, %v4798_v47 }
 0x2b6   : > { %v2045_v61 = vpop.f32.mrf.mxu0 }
 0x2b7   : > { %v1953_v52 = vpop.f32.mrf.mxu3  ;;  %v2046_v60 = vadd.f32 %v2045_v61, %v4789_v0  ;;  %v2134_v38 = vpop.f32.mrf.mxu1 }
 0x2b8   : > { %v1954_v29 = vadd.f32 %v1953_v52, %v1865_v39 }
 0x2b9   : > { %v2135_v56 = vadd.f32 %v2134_v38, %v2046_v60  ;;  %1906 = vmatmul.bf16.gmra.mxu2 %v4574_v59  ;;  %2084 = vmatmul.bf16.gmra.mxu0 %v4574_v59 }
 0x2ba   : > { %v2209_v30 = vpack.c.bf16 %v1954_v29, %v4706_v44  ;;  %2173 = vmatmul.bf16.gmra.mxu1 %v4578_v37 }
 0x2bb   : > { %v2212_v2 = vpack.c.bf16 %v2135_v56, %v2135_v56 }
 0x2bc   : > { %1995 = vmatmul.bf16.gmra.mxu3 %v4578_v37  ;;  %2273 = vst [vmem:[%s3713_s6 + $0x3c] sm:$0xff] %v2209_v30  ;;  %v1867_v63 = vpop.f32.mrf.mxu2 }
 0x2bd   : > { %2276 = vst [vmem:[%s3713_s6 + $0x50] sm:$0xf] %v2212_v2  ;;  %v1868_v54 = vadd.f32 %v1867_v63, %v4798_v47 }
 0x2be   : > { %v2047_v36 = vpop.f32.mrf.mxu0 }
 0x2bf   : > { %v1956_v12 = vpop.f32.mrf.mxu3  ;;  %v2048_v1 = vadd.f32 %v2047_v36, %v4789_v0  ;;  %v2136_v3 = vpop.f32.mrf.mxu1 }
 0x2c0   : > { %v1957_v44 = vadd.f32 %v1956_v12, %v1868_v54 }
 0x2c1   : > { %v2137_v59 = vadd.f32 %v2136_v3, %v2048_v1 }
 0x2c2   : > { %v2211_v6 = vpack.c.bf16 %v1957_v44, %v4712_v18 }
 0x2c3   : > { %v2214_v50 = vpack.c.bf16 %v2137_v59, %v2137_v59 }
 0x2c4   : > { %2275 = vst [vmem:[%s3713_s6 + $0x48] sm:$0xff] %v2211_v6  ;;  %v1869_v37 = vpop.f32.mrf.mxu2 }
 0x2c5   : > { %2278 = vst [vmem:[%s3713_s6 + $0x5c] sm:$0xf] %v2214_v50  ;;  %v1870_v16 = vadd.f32 %v1869_v37, %v4798_v47 }
 0x2c6   : > { %v2050_v41 = vpop.f32.mrf.mxu0 }
 0x2c7   : > { %v1958_v10 = vpop.f32.mrf.mxu3  ;;  %v2051_v15 = vadd.f32 %v2050_v41, %v4789_v0  ;;  %v2139_v8 = vpop.f32.mrf.mxu1 }
 0x2c8   : > { %v1959_v40 = vadd.f32 %v1958_v10, %v1870_v16 }
 0x2c9   : > { %v2140_v42 = vadd.f32 %v2139_v8, %v2051_v15  ;;  %1911 = vmatmul.bf16.gmra.mxu2 %v4594_v21  ;;  %2089 = vmatmul.bf16.gmra.mxu0 %v4594_v21 }
 0x2ca   : > { %v2213_v20 = vpack.c.bf16 %v1959_v40, %v4722_v26  ;;  %2178 = vmatmul.bf16.gmra.mxu1 %v4598_v51 }
 0x2cb   : > { %v2216_v18 = vpack.c.bf16 %v2140_v42, %v2140_v42 }
 0x2cc   : > { %2000 = vmatmul.bf16.gmra.mxu3 %v4598_v51  ;;  %2277 = vst [vmem:[%s3713_s6 + $0x54] sm:$0xff] %v2213_v20  ;;  %v1872_v39 = vpop.f32.mrf.mxu2 }
 0x2cd   : > { %2280 = vst [vmem:[%s3713_s6 + $0x68] sm:$0xf] %v2216_v18  ;;  %v1873_v52 = vadd.f32 %v1872_v39, %v4798_v47 }
 0x2ce   : > { %v2052_v29 = vpop.f32.mrf.mxu0 }
 0x2cf   : > { %v1961_v61 = vpop.f32.mrf.mxu3  ;;  %v2053_v60 = vadd.f32 %v2052_v29, %v4789_v0  ;;  %v2141_v38 = vpop.f32.mrf.mxu1 }
 0x2d0   : > { %v1962_v26 = vadd.f32 %v1961_v61, %v1873_v52 }
 0x2d1   : > { %v2142_v21 = vadd.f32 %v2141_v38, %v2053_v60 }
 0x2d2   : > { %v2215_v30 = vpack.c.bf16 %v1962_v26, %v4728_v45 }
 0x2d3   : > { %v2218_v56 = vpack.c.bf16 %v2142_v21, %v2142_v21 }
 0x2d4   : > { %2279 = vst [vmem:[%s3713_s6 + $0x60] sm:$0xff] %v2215_v30  ;;  %v1874_v51 = vpop.f32.mrf.mxu2 }
 0x2d5   : > { %2282 = vst [vmem:[%s3713_s6 + $0x74] sm:$0xf] %v2218_v56  ;;  %v1875_v2 = vadd.f32 %v1874_v51, %v4798_v47 }
 0x2d6   : > { %v2055_v54 = vpop.f32.mrf.mxu0 }
 0x2d7   : > { %v1963_v63 = vpop.f32.mrf.mxu3  ;;  %v2056_v36 = vadd.f32 %v2055_v54, %v4789_v0  ;;  %v2144_v44 = vpop.f32.mrf.mxu1 }
 0x2d8   : > { %v1964_v12 = vadd.f32 %v1963_v63, %v1875_v2 }
 0x2d9   : > { %v2145_v3 = vadd.f32 %v2144_v44, %v2056_v36  ;;  %1916 = vmatmul.bf16.gmra.mxu2 %v4614_v5  ;;  %2094 = vmatmul.bf16.gmra.mxu0 %v4614_v5 }
 0x2da   : > { %v2217_v1 = vpack.c.bf16 %v1964_v12, %v4738_v23  ;;  %2183 = vmatmul.bf16.gmra.mxu1 %v4618_v32 }
 0x2db   : > { %v2220_v45 = vpack.c.bf16 %v2145_v3, %v2145_v3 }
 0x2dc   : > { %2005 = vmatmul.bf16.gmra.mxu3 %v4618_v32  ;;  %2281 = vst [vmem:[%s3713_s6 + $0x6c] sm:$0xff] %v2217_v1  ;;  %v1877_v6 = vpop.f32.mrf.mxu2 }
 0x2dd   : > { %2284 = vst [vmem:[%s3713_s6 + $0x80] sm:$0xf] %v2220_v45  ;;  %v1878_v59 = vadd.f32 %v1877_v6, %v4798_v47 }
 0x2de   : > { %v2057_v37 = vpop.f32.mrf.mxu0 }
 0x2df   : > { %v1966_v50 = vpop.f32.mrf.mxu3  ;;  %v2058_v16 = vadd.f32 %v2057_v37, %v4789_v0  ;;  %v2146_v10 = vpop.f32.mrf.mxu1 }
 0x2e0   : > { %v1967_v23 = vadd.f32 %v1966_v50, %v1878_v59 }
 0x2e1   : > { %v2147_v5 = vadd.f32 %v2146_v10, %v2058_v16 }
 0x2e2   : > { %v2219_v41 = vpack.c.bf16 %v1967_v23, %v4744_v25 }
 0x2e3   : > { %v2222_v40 = vpack.c.bf16 %v2147_v5, %v2147_v5 }
 0x2e4   : > { %2283 = vst [vmem:[%s3713_s6 + $0x78] sm:$0xff] %v2219_v41  ;;  %v1879_v32 = vpop.f32.mrf.mxu2 }
 0x2e5   : > { %2286 = vst [vmem:[%s3713_s6 + $0x8c] sm:$0xf] %v2222_v40  ;;  %v1880_v15 = vadd.f32 %v1879_v32, %v4798_v47 }
 0x2e6   : > { %v2060_v20 = vpop.f32.mrf.mxu0 }
 0x2e7   : > { %v1968_v8 = vpop.f32.mrf.mxu3  ;;  %v2061_v18 = vadd.f32 %v2060_v20, %v4789_v0  ;;  %v2149_v39 = vpop.f32.mrf.mxu1 }
 0x2e8   : > { %v1969_v42 = vadd.f32 %v1968_v8, %v1880_v15 }
 0x2e9   : > { %v2150_v61 = vadd.f32 %v2149_v39, %v2061_v18  ;;  %1921 = vmatmul.bf16.gmra.mxu2 %v4634_v9  ;;  %2099 = vmatmul.bf16.gmra.mxu0 %v4634_v9 }
 0x2ea   : > { %v2221_v52 = vpack.c.bf16 %v1969_v42, %v4754_v58  ;;  %2188 = vmatmul.bf16.gmra.mxu1 %v4638_v34 }
 0x2eb   : > { %v2224_v25 = vpack.c.bf16 %v2150_v61, %v2150_v61 }
 0x2ec   : > { %2010 = vmatmul.bf16.gmra.mxu3 %v4638_v34  ;;  %2285 = vst [vmem:[%s3713_s6 + $0x84] sm:$0xff] %v2221_v52  ;;  %v1882_v29 = vpop.f32.mrf.mxu2 }
 0x2ed   : > { %2288 = vst [vmem:[%s3713_s6 + $0x98] sm:$0xf] %v2224_v25  ;;  %v1883_v26 = vadd.f32 %v1882_v29, %v4798_v47 }
 0x2ee   : > { %v2062_v38 = vpop.f32.mrf.mxu0 }
 0x2ef   : > { %v1971_v60 = vpop.f32.mrf.mxu3  ;;  %v2063_v30 = vadd.f32 %v2062_v38, %v4789_v0  ;;  %v2151_v21 = vpop.f32.mrf.mxu1 }
 0x2f0   : > { %v1972_v58 = vadd.f32 %v1971_v60, %v1883_v26 }
 0x2f1   : > { %v2152_v9 = vadd.f32 %v2151_v21, %v2063_v30 }
 0x2f2   : > { %v2223_v56 = vpack.c.bf16 %v1972_v58, %v4760_v62 }
 0x2f3   : > { %v2226_v51 = vpack.c.bf16 %v2152_v9, %v2152_v9 }
 0x2f4   : > { %2287 = vst [vmem:[%s3713_s6 + $0x90] sm:$0xff] %v2223_v56  ;;  %v1884_v34 = vpop.f32.mrf.mxu2 }
 0x2f5   : > { %2290 = vst [vmem:[%s3713_s6 + $0xa4] sm:$0xf] %v2226_v51  ;;  %v1885_v2 = vadd.f32 %v1884_v34, %v4798_v47 }
 0x2f6   : > { %v2065_v54 = vpop.f32.mrf.mxu0 }
 0x2f7   : > { %v1973_v63 = vpop.f32.mrf.mxu3  ;;  %v2066_v36 = vadd.f32 %v2065_v54, %v4789_v0  ;;  %v2154_v44 = vpop.f32.mrf.mxu1 }
 0x2f8   : > { %v1974_v12 = vadd.f32 %v1973_v63, %v1885_v2 }
 0x2f9   : > { %v2155_v3 = vadd.f32 %v2154_v44, %v2066_v36  ;;  %1926 = vmatmul.bf16.gmra.mxu2 %v4646_v57  ;;  %2104 = vmatmul.bf16.gmra.mxu0 %v4646_v57 }
 0x2fa   : > { %v2225_v1 = vpack.c.bf16 %v1974_v12, %v4770_v33  ;;  %2193 = vmatmul.bf16.gmra.mxu1 %v4650_v27 }
 0x2fb   : > { %v2228_v62 = vpack.c.bf16 %v2155_v3, %v2155_v3 }
 0x2fc   : > { %2015 = vmatmul.bf16.gmra.mxu3 %v4650_v27  ;;  %2289 = vst [vmem:[%s3713_s6 + $0x9c] sm:$0xff] %v2225_v1  ;;  %v1887_v45 = vpop.f32.mrf.mxu2 }
 0x2fd   : > { %2292 = vst [vmem:[%s3713_s6 + $0xb0] sm:$0xf] %v2228_v62  ;;  %v1888_v6 = vadd.f32 %v1887_v45, %v4798_v47 }
 0x2fe   : > { %v2067_v50 = vpop.f32.mrf.mxu0 }
 0x2ff   : > { %v1976_v59 = vpop.f32.mrf.mxu3  ;;  %v2068_v37 = vadd.f32 %v2067_v50, %v4789_v0  ;;  %v2156_v23 = vpop.f32.mrf.mxu1 }
 0x300   : > { %v1977_v33 = vadd.f32 %v1976_v59, %v1888_v6 }
 0x301   : > { %v2157_v16 = vadd.f32 %v2156_v23, %v2068_v37 }
 0x302   : > { %v2227_v57 = vpack.c.bf16 %v1977_v33, %v4776_v14 }
 0x303   : > { %v2230_v27 = vpack.c.bf16 %v2157_v16, %v2157_v16 }
 0x304   : > { %2291 = vst [vmem:[%s3713_s6 + $0xa8] sm:$0xff] %v2227_v57  ;;  %v1889_v10 = vpop.f32.mrf.mxu2 }
 0x305   : > { %2294 = vst [vmem:[%s3713_s6 + $0xbc] sm:$0xf] %v2230_v27  ;;  %v1890_v41 = vadd.f32 %v1889_v10, %v4798_v47 }
 0x306   : > { %v2070_v40 = vpop.f32.mrf.mxu0 }
 0x307   : > { %v1978_v5 = vpop.f32.mrf.mxu3  ;;  %v2071_v15 = vadd.f32 %v2070_v40, %v4789_v0  ;;  %v2159_v8 = vpop.f32.mrf.mxu1 }
 0x308   : > { %v1979_v32 = vadd.f32 %v1978_v5, %v1890_v41 }
 0x309   : > { %v2160_v42 = vadd.f32 %v2159_v8, %v2071_v15 }
 0x30a   : > { %v2229_v20 = vpack.c.bf16 %v1979_v32, %v4786_v43 }
 0x30b   : > { %v2232_v14 = vpack.c.bf16 %v2160_v42, %v2160_v42 }
 0x30c   : > { %2293 = vst [vmem:[%s3713_s6 + $0xb4] sm:$0xff] %v2229_v20  ;;  %v1892_v18 = vpop.f32.mrf.mxu2 }
 0x30d   : > { %2296 = vst [vmem:[%s3713_s6 + $0xc8] sm:$0xf] %v2232_v14  ;;  %v1893_v39 = vadd.f32 %v1892_v18, %v4798_v47 }
 0x30e   : > { %v2072_v61 = vpop.f32.mrf.mxu0 }
 0x30f   : > { %v1981_v52 = vpop.f32.mrf.mxu3  ;;  %v2073_v29 = vadd.f32 %v2072_v61, %v4789_v0  ;;  %v2161_v26 = vpop.f32.mrf.mxu1 }
 0x310   : > { %v1982_v25 = vadd.f32 %v1981_v52, %v1893_v39 }
 0x311   : > { %v2162_v38 = vadd.f32 %v2161_v26, %v2073_v29 }
 0x312   : > { %v2231_v60 = vpack.c.bf16 %v1982_v25, %v4671_v17 }
 0x313   : > { %v2234_v43 = vpack.c.bf16 %v2162_v38, %v2162_v38 }
 0x314   : > { %2295 = vst [vmem:[%s3713_s6 + $0xc0] sm:$0xff] %v2231_v60  ;;  %v1894_v58 = vpop.f32.mrf.mxu2 }
 0x315   : > { %2298 = vst [vmem:[%s3713_s6 + $0xd4] sm:$0xf] %v2234_v43  ;;  %v1895_v30 = vadd.f32 %v1894_v58, %v4798_v47 }
 0x316   : > { %v2075_v56 = vpop.f32.mrf.mxu0 }
 0x317   : > { %v1983_v21 = vpop.f32.mrf.mxu3  ;;  %v2076_v51 = vadd.f32 %v2075_v56, %v4789_v0  ;;  %v2164_v34 = vpop.f32.mrf.mxu1 }
 0x318   : > { %v1984_v9 = vadd.f32 %v1983_v21, %v1895_v30 }
 0x319   : > { %v2165_v63 = vadd.f32 %v2164_v34, %v2076_v51 }
 0x31a   : > { %v2233_v2 = vpack.c.bf16 %v1984_v9, %v4677_v53 }
 0x31b   : > { %v2236_v17 = vpack.c.bf16 %v2165_v63, %v2165_v63 }
 0x31c   : > { %2297 = vst [vmem:[%s3713_s6 + $0xcc] sm:$0xff] %v2233_v2  ;;  %v1897_v54 = vpop.f32.mrf.mxu2 }
 0x31d   : > { %2300 = vst [vmem:[%s3713_s6 + $0xe0] sm:$0xf] %v2236_v17  ;;  %v1898_v12 = vadd.f32 %v1897_v54, %v4798_v47 }
 0x31e   : > { %v2077_v44 = vpop.f32.mrf.mxu0 }
 0x31f   : > { %v1986_v36 = vpop.f32.mrf.mxu3  ;;  %v2078_v3 = vadd.f32 %v2077_v44, %v4789_v0  ;;  %v2166_v62 = vpop.f32.mrf.mxu1 }
 0x320   : > { %v1987_v1 = vadd.f32 %v1986_v36, %v1898_v12 }
 0x321   : > { %v2167_v6 = vadd.f32 %v2166_v62, %v2078_v3 }
 0x322   : > { %v2235_v45 = vpack.c.bf16 %v1987_v1, %v4687_v24 }
 0x323   : > { %v2238_v53 = vpack.c.bf16 %v2167_v6, %v2167_v6 }
 0x324   : > { %2299 = vst [vmem:[%s3713_s6 + $0xd8] sm:$0xff] %v2235_v45  ;;  %v1899_v59 = vpop.f32.mrf.mxu2 }
 0x325   : > { %2302 = vst [vmem:[%s3713_s6 + $0xec] sm:$0xf] %v2238_v53  ;;  %v1900_v50 = vadd.f32 %v1899_v59, %v4798_v47 }
 0x326   : > { %v2080_v37 = vpop.f32.mrf.mxu0 }
 0x327   : > { %v1988_v33 = vpop.f32.mrf.mxu3  ;;  %v2081_v57 = vadd.f32 %v2080_v37, %v4789_v0  ;;  %v2169_v16 = vpop.f32.mrf.mxu1 }
 0x328   : > { %v1989_v23 = vadd.f32 %v1988_v33, %v1900_v50 }
 0x329   : > { %v2170_v10 = vadd.f32 %v2169_v16, %v2081_v57 }
 0x32a   : > { %v2237_v27 = vpack.c.bf16 %v1989_v23, %v4693_v31 }
 0x32b   : > { %v2240_v24 = vpack.c.bf16 %v2170_v10, %v2170_v10 }
 0x32c   : > { %2301 = vst [vmem:[%s3713_s6 + $0xe4] sm:$0xff] %v2237_v27  ;;  %v1902_v41 = vpop.f32.mrf.mxu2 }
 0x32d   : > { %2304 = vst [vmem:[%s3713_s6 + $0xf8] sm:$0xf] %v2240_v24  ;;  %v1903_v5 = vadd.f32 %v1902_v41, %v4798_v47 }
 0x32e   : > { %v2082_v32 = vpop.f32.mrf.mxu0 }
 0x32f   : > { %v1991_v40 = vpop.f32.mrf.mxu3  ;;  %v2083_v8 = vadd.f32 %v2082_v32, %v4789_v0  ;;  %v2171_v20 = vpop.f32.mrf.mxu1 }
 0x330   : > { %v1992_v15 = vadd.f32 %v1991_v40, %v1903_v5 }
 0x331   : > { %v2172_v14 = vadd.f32 %v2171_v20, %v2083_v8 }
 0x332   : > { %v2239_v42 = vpack.c.bf16 %v1992_v15, %v4703_v22 }
 0x333   : > { %v2242_v31 = vpack.c.bf16 %v2172_v14, %v2172_v14 }
 0x334   : > { %2303 = vst [vmem:[%s3713_s6 + $0xf0] sm:$0xff] %v2239_v42  ;;  %v1904_v18 = vpop.f32.mrf.mxu2 }
 0x335   : > { %2306 = vst [vmem:[%s3713_s6 + $0x104] sm:$0xf] %v2242_v31  ;;  %v1905_v39 = vadd.f32 %v1904_v18, %v4798_v47 }
 0x336   : > { %v2085_v61 = vpop.f32.mrf.mxu0 }
 0x337   : > { %v1993_v52 = vpop.f32.mrf.mxu3  ;;  %v2086_v29 = vadd.f32 %v2085_v61, %v4789_v0  ;;  %v2174_v26 = vpop.f32.mrf.mxu1 }
 0x338   : > { %v1994_v25 = vadd.f32 %v1993_v52, %v1905_v39 }
 0x339   : > { %v2175_v38 = vadd.f32 %v2174_v26, %v2086_v29 }
 0x33a   : > { %v2241_v60 = vpack.c.bf16 %v1994_v25, %v4709_v28 }
 0x33b   : > { %v2244_v22 = vpack.c.bf16 %v2175_v38, %v2175_v38 }
 0x33c   : > { %2305 = vst [vmem:[%s3713_s6 + $0xfc] sm:$0xff] %v2241_v60  ;;  %v1907_v43 = vpop.f32.mrf.mxu2 }
 0x33d   : > { %2308 = vst [vmem:[%s3713_s6 + $0x110] sm:$0xf] %v2244_v22  ;;  %v1908_v58 = vadd.f32 %v1907_v43, %v4798_v47 }
 0x33e   : > { %v2087_v21 = vpop.f32.mrf.mxu0 }
 0x33f   : > { %v1996_v30 = vpop.f32.mrf.mxu3  ;;  %v2088_v9 = vadd.f32 %v2087_v21, %v4789_v0  ;;  %v2176_v51 = vpop.f32.mrf.mxu1 }
 0x340   : > { %v1997_v56 = vadd.f32 %v1996_v30, %v1908_v58 }
 0x341   : > { %v2177_v2 = vadd.f32 %v2176_v51, %v2088_v9 }
 0x342   : > { %v2243_v34 = vpack.c.bf16 %v1997_v56, %v4719_v35 }
 0x343   : > { %v2246_v28 = vpack.c.bf16 %v2177_v2, %v2177_v2 }
 0x344   : > { %2307 = vst [vmem:[%s3713_s6 + $0x108] sm:$0xff] %v2243_v34  ;;  %v1909_v63 = vpop.f32.mrf.mxu2 }
 0x345   : > { %2310 = vst [vmem:[%s3713_s6 + $0x11c] sm:$0xf] %v2246_v28  ;;  %v1910_v17 = vadd.f32 %v1909_v63, %v4798_v47 }
 0x346   : > { %v2090_v12 = vpop.f32.mrf.mxu0 }
 0x347   : > { %v1998_v54 = vpop.f32.mrf.mxu3  ;;  %v2091_v44 = vadd.f32 %v2090_v12, %v4789_v0  ;;  %v2179_v1 = vpop.f32.mrf.mxu1 }
 0x348   : > { %v1999_v36 = vadd.f32 %v1998_v54, %v1910_v17 }
 0x349   : > { %v2180_v62 = vadd.f32 %v2179_v1, %v2091_v44 }
 0x34a   : > { %v2245_v3 = vpack.c.bf16 %v1999_v36, %v4725_v7 }
 0x34b   : > { %v2248_v35 = vpack.c.bf16 %v2180_v62, %v2180_v62 }
 0x34c   : > { %2309 = vst [vmem:[%s3713_s6 + $0x114] sm:$0xff] %v2245_v3  ;;  %v1912_v45 = vpop.f32.mrf.mxu2 }
 0x34d   : > { %2312 = vst [vmem:[%s3713_s6 + $0x128] sm:$0xf] %v2248_v35  ;;  %v1913_v6 = vadd.f32 %v1912_v45, %v4798_v47 }
 0x34e   : > { %v2092_v59 = vpop.f32.mrf.mxu0 }
 0x34f   : > { %v2001_v53 = vpop.f32.mrf.mxu3  ;;  %v2093_v33 = vadd.f32 %v2092_v59, %v4789_v0  ;;  %v2181_v37 = vpop.f32.mrf.mxu1 }
 0x350   : > { %v2002_v50 = vadd.f32 %v2001_v53, %v1913_v6 }
 0x351   : > { %v2182_v57 = vadd.f32 %v2181_v37, %v2093_v33 }
 0x352   : > { %v2247_v23 = vpack.c.bf16 %v2002_v50, %v4735_v11 }
 0x353   : > { %v2250_v7 = vpack.c.bf16 %v2182_v57, %v2182_v57 }
 0x354   : > { %2311 = vst [vmem:[%s3713_s6 + $0x120] sm:$0xff] %v2247_v23  ;;  %v1914_v16 = vpop.f32.mrf.mxu2 }
 0x355   : > { %2314 = vst [vmem:[%s3713_s6 + $0x134] sm:$0xf] %v2250_v7  ;;  %v1915_v27 = vadd.f32 %v1914_v16, %v4798_v47 }
 0x356   : > { %v2095_v24 = vpop.f32.mrf.mxu0 }
 0x357   : > { %v2003_v10 = vpop.f32.mrf.mxu3  ;;  %v2096_v5 = vadd.f32 %v2095_v24, %v4789_v0  ;;  %v2184_v40 = vpop.f32.mrf.mxu1 }
 0x358   : > { %v2004_v41 = vadd.f32 %v2003_v10, %v1915_v27 }
 0x359   : > { %v2185_v15 = vadd.f32 %v2184_v40, %v2096_v5 }
 0x35a   : > { %v2249_v32 = vpack.c.bf16 %v2004_v41, %v4741_v49 }
 0x35b   : > { %v2252_v11 = vpack.c.bf16 %v2185_v15, %v2185_v15 }
 0x35c   : > { %2313 = vst [vmem:[%s3713_s6 + $0x12c] sm:$0xff] %v2249_v32  ;;  %v1917_v8 = vpop.f32.mrf.mxu2 }
 0x35d   : > { %2316 = vst [vmem:[%s3713_s6 + $0x140] sm:$0xf] %v2252_v11  ;;  %v1918_v20 = vadd.f32 %v1917_v8, %v4798_v47 }
 0x35e   : > { %v2097_v14 = vpop.f32.mrf.mxu0 }
 0x35f   : > { %v2006_v42 = vpop.f32.mrf.mxu3  ;;  %v2098_v18 = vadd.f32 %v2097_v14, %v4789_v0  ;;  %v2186_v39 = vpop.f32.mrf.mxu1 }
 0x360   : > { %v2007_v31 = vadd.f32 %v2006_v42, %v1918_v20 }
 0x361   : > { %v2187_v61 = vadd.f32 %v2186_v39, %v2098_v18 }
 0x362   : > { %v2251_v52 = vpack.c.bf16 %v2007_v31, %v4751_v19 }
 0x363   : > { %v2254_v49 = vpack.c.bf16 %v2187_v61, %v2187_v61 }
 0x364   : > { %2315 = vst [vmem:[%s3713_s6 + $0x138] sm:$0xff] %v2251_v52  ;;  %v1919_v25 = vpop.f32.mrf.mxu2 }
 0x365   : > { %2318 = vst [vmem:[%s3713_s6 + $0x14c] sm:$0xf] %v2254_v49  ;;  %v1920_v29 = vadd.f32 %v1919_v25, %v4798_v47 }
 0x366   : > { %v2100_v60 = vpop.f32.mrf.mxu0 }
 0x367   : > { %v2008_v26 = vpop.f32.mrf.mxu3  ;;  %v2101_v22 = vadd.f32 %v2100_v60, %v4789_v0  ;;  %v2189_v43 = vpop.f32.mrf.mxu1 }
 0x368   : > { %v2009_v38 = vadd.f32 %v2008_v26, %v1920_v29 }
 0x369   : > { %v2190_v30 = vadd.f32 %v2189_v43, %v2101_v22 }
 0x36a   : > { %v2253_v58 = vpack.c.bf16 %v2009_v38, %v4757_v4 }
 0x36b   : > { %v2256_v19 = vpack.c.bf16 %v2190_v30, %v2190_v30 }
 0x36c   : > { %2317 = vst [vmem:[%s3713_s6 + $0x144] sm:$0xff] %v2253_v58  ;;  %v1922_v21 = vpop.f32.mrf.mxu2 }
 0x36d   : > { %2320 = vst [vmem:[%s3713_s6 + $0x158] sm:$0xf] %v2256_v19  ;;  %v1923_v56 = vadd.f32 %v1922_v21, %v4798_v47 }
 0x36e   : > { %v2102_v51 = vpop.f32.mrf.mxu0 }
 0x36f   : > { %v2011_v9 = vpop.f32.mrf.mxu3  ;;  %v2103_v2 = vadd.f32 %v2102_v51, %v4789_v0  ;;  %v2191_v28 = vpop.f32.mrf.mxu1 }
 0x370   : > { %v2012_v34 = vadd.f32 %v2011_v9, %v1923_v56 }
 0x371   : > { %v2192_v4 = vadd.f32 %v2191_v28, %v2103_v2 }
 0x372   : > { %v2255_v63 = vpack.c.bf16 %v2012_v34, %v4767_v13 }
 0x373   : > { %v2258_v17 = vpack.c.bf16 %v2192_v4, %v2192_v4 }
 0x374   : > { %2319 = vst [vmem:[%s3713_s6 + $0x150] sm:$0xff] %v2255_v63  ;;  %v1924_v54 = vpop.f32.mrf.mxu2 }
 0x375   : > { %2322 = vst [vmem:[%s3713_s6 + $0x164] sm:$0xf] %v2258_v17  ;;  %v1925_v12 = vadd.f32 %v1924_v54, %v4798_v47 }
 0x376   : > { %v2105_v44 = vpop.f32.mrf.mxu0 }
 0x377   : > { %v2013_v36 = vpop.f32.mrf.mxu3  ;;  %v2106_v3 = vadd.f32 %v2105_v44, %v4789_v0  ;;  %v2194_v62 = vpop.f32.mrf.mxu1 }
 0x378   : > { %v2014_v1 = vadd.f32 %v2013_v36, %v1925_v12 }
 0x379   : > { %v2195_v13 = vadd.f32 %v2194_v62, %v2106_v3 }
 0x37a   : > { %v2257_v35 = vpack.c.bf16 %v2014_v1, %v4773_v46 }
 0x37b   : > { %v2260_v45 = vpack.c.bf16 %v2195_v13, %v2195_v13 }
 0x37c   : > { %2321 = vst [vmem:[%s3713_s6 + $0x15c] sm:$0xff] %v2257_v35  ;;  %v1927_v6 = vpop.f32.mrf.mxu2 }
 0x37d   : > { %2324 = vst [vmem:[%s3713_s6 + $0x170] sm:$0xf] %v2260_v45  ;;  %v1928_v53 = vadd.f32 %v1927_v6, %v4798_v47 }
 0x37e   : > { %v2107_v50 = vpop.f32.mrf.mxu0 }
 0x37f   : > { %v2016_v59 = vpop.f32.mrf.mxu3  ;;  %v2108_v37 = vadd.f32 %v2107_v50, %v4789_v0  ;;  %v2196_v23 = vpop.f32.mrf.mxu1 }
 0x380   : > { %v2017_v33 = vadd.f32 %v2016_v59, %v1928_v53 }
 0x381   : > { %v2197_v57 = vadd.f32 %v2196_v23, %v2108_v37 }
 0x382   : > { %v2259_v46 = vpack.c.bf16 %v2017_v33, %v4783_v55 }
 0x383   : > { %v2262_v7 = vpack.c.bf16 %v2197_v57, %v2197_v57 }
 0x384   : > { %2323 = vst [vmem:[%s3713_s6 + $0x168] sm:$0xff] %v2259_v46  ;;  %v1929_v16 = vpop.f32.mrf.mxu2 }
 0x385   : > { %2326 = vst [vmem:[%s3713_s6 + $0x17c] sm:$0xf] %v2262_v7  ;;  %v1930_v27 = vadd.f32 %v1929_v16, %v4798_v47 }
 0x387   : > { %v2018_v0 = vpop.f32.mrf.mxu3 }
 0x388   : > { %v2019_v10 = vadd.f32 %v2018_v0, %v1930_v27 }
 0x38a   : > { %v2261_v55 = vpack.c.bf16 %v2019_v10, %v4792_v48 }
 0x38c   : > { %2325 = vst [vmem:[%s3713_s6 + $0x174] sm:$0xff] %v2261_v55 }
 0x38d   : > { %3326 = shalt.err (!%p3323_p10)
}
 0x38e   : > { %s3462_s5 = smov 192   ;;  %s3463_s6 = smov 384  }
 0x38f   : > { %s3464_s7 = smov 12  }
 0x390   : > { %2937 = dma.vmem_to_hbm [thread:$0]  (%p3654_p6), %s2344_s30, 6144, %s2346_s1, %s2328_s2, %s3462_s5, %s3463_s6, %s3464_s7  }
 0x391 PF: > { %p2960_p11 = scmp.ge.s32.totalorder %s3453_s28, 2  ;;  %s2360_s4 = sand.u32 1, %s3401_s15  }
 0x392   : > { %s2361_s25 = scalar_lea.sflag [#allocation5], %s2360_s4 }
 0x393   : > { %p2954_p1 = pnand %p2960_p11, %p3662_p13 }
 0x395   : > { %p2955_p9 = pneg %p2954_p1 }
 0x397   : > { %3396 = dma.done.wait (%p2955_p9), %s2361_s25, 6144  }
 0x398   : > { %3398 = vsyncadd (%p2955_p9), %s2361_s25, 4294961152  ;;  %s21_s28 = sadd.s32 1, %s3453_s28   ;;  %s5106_s11 = sld [smem:[#allocation21_spill]] }
 0x399   : > { %p5012_p3 = scmp.ge.s32.totalorder %s21_s28, 6   ;;  %s5107_s12 = sld [smem:[#allocation22_spill]] }
 0x39a   : > { %s5108_s24 = sld [smem:[#allocation17_spill]]  ;;  %s5112_s15 = smov %s3405_s16 }
 0x39b   : > { %s5109_s25 = sld [smem:[#allocation18_spill]]  ;;  %s5113_s16 = smov %s3409_s17 }
 0x39c   : > { %s5110_s26 = sld [smem:[#allocation19_spill]]  ;;  %s5114_s17 = smov %s3652_s9 }
 0x39d   : > { %s5111_s27 = sld [smem:[#allocation20_spill]]  ;;  %s5115_s18 = smov %s3417_s19 }
 0x39e   : > { %s5116_s19 = smov %s3421_s20  ;;  %s5117_s20 = smov %s5106_s11 }
 0x39f   : > { %s5118_s21 = smov %s3429_s22  ;;  %s5119_s22 = smov %s3433_s23 }
 0x3a0   : > { %s5120_s23 = smov %s5107_s12  ;;  %20 = sbr.rel (!%p5012_p3) target bundleno = 17 (0x11), region = 111 }
 0x3a5   :  { %2367 = vsyncpa [#allocation4], 1 }
 0x3a6   :  { %2369 = vsyncpa [#allocation4 + $0x1], 1 }
 0x3a7   :  { %2370 = vsyncpa [#allocation7], 1 }
 0x3a8   :  { %2371 = vsyncpa [#allocation5], 1 }
 0x3a9   :  { %2373 = vsyncpa [#allocation5 + $0x1], 1 }

</bundles_post_ra>
